<compile_context>
chip_gen: v6e
topology: v6e:2x2x1
jax: 0.10.0
libtpu: 0.0.40
codegen_flags: <defaults>
</compile_context>

<pallas_src>
import functools

import jax
import jax.numpy as jnp
import numpy as np
from jax import lax
from jax.experimental import pallas as pl
from jax.experimental.pallas import tpu as pltpu

NUM_CLASSES = 10


def _round_up(x, m):
    return ((x + m - 1) // m) * m


# ----------------------------- Pallas kernels -------------------------------

def conv_pool_kernel(x_ref, w_ref, b_ref, o_ref, *, Wq, L):
    """Fused Conv2d(k=5, s=1, p=2) + 2x2 MaxPool + bias + ReLU for one batch group.

    The conv is evaluated directly on the pooled (half-resolution) grid: the padded input
    was pre-split into its 4 row/col parity planes, so every conv tap (kh, kw) at every
    pool position (dh, dw) is a STATIC lane-shifted view of one parity plane.  The im2col
    patch matrix never exists in HBM -- it is built in VMEM from 36 shifted views and fed
    to 4 MXU matmuls (one per pool position), whose elementwise max is the 2x2 pool.

    x_ref: (1, 4, Cin, L+margin) bf16  parity planes; lanes = (img-in-group, i, j) flat
    w_ref: (Cout, 25*Cin)        bf16  conv weight, rows ordered (kh, kw, ci)
    b_ref: (Cout, 1)             f32
    o_ref: (1, Cout, L)          bf16  pooled output; lanes = (img-in-group, i, j) flat
    """
    xv = x_ref[0]                      # (4, Cin, L+margin), VMEM resident
    w = w_ref[...]
    # 36 shifted half-res views S[(r, c)], r = dh+kh, c = dw+kw (static slices, VMEM only).
    S = {}
    for r in range(6):
        for c in range(6):
            plane = (r % 2) * 2 + (c % 2)
            off = (r // 2) * Wq + (c // 2)
            S[(r, c)] = xv[plane, :, off:off + L]          # (Cin, L)
    z = None
    for dh in range(2):
        for dw in range(2):
            patch = jnp.concatenate(
                [S[(dh + kh, dw + kw)] for kh in range(5) for kw in range(5)], axis=0)
            zz = jnp.dot(w, patch, preferred_element_type=jnp.float32)   # (Cout, L)
            z = zz if z is None else jnp.maximum(z, zz)                  # 2x2 pool-max
    # bias + ReLU hoisted after the pool-max (per-channel bias, ReLU monotone); bf16 store.
    o_ref[0, :, :] = jnp.maximum(z + b_ref[...], 0.0).astype(o_ref.dtype)


def linear_kernel(x_ref, w_ref, b_ref, o_ref):
    """out = x @ W + b.  x: (tb, Din) bf16, W: (Din, Dpad) bf16, b: (1, Dpad) f32."""
    o_ref[...] = (jnp.dot(x_ref[...], w_ref[...], preferred_element_type=jnp.float32)
                  + b_ref[...])


# ------------------------------- wrappers ------------------------------------

def conv_pool_stage(x, w_mat, b_col, *, target_lanes=512):
    """Conv2d(5,1,2) + ReLU + MaxPool2d(2).  NCHW in -> NCHW bf16 out (B, Cout, H//2, W//2)."""
    B, Cin, H, W = x.shape
    Cout, D = w_mat.shape
    assert D == Cin * 25 and H % 2 == 0 and W % 2 == 0
    Ho, Wo = H // 2, W // 2
    Hq, Wq = Ho + 2, Wo + 2            # half-res grid of the (pad=2) padded input
    Sq = Hq * Wq                       # lanes per image (incl. phantom rows/cols >= Ho/Wo)
    # Images per grid step, sized for ~target_lanes lanes/step: few, large steps suit
    # single-TC v5e/v6e; for larger B the "parallel" grid still feeds both v7x TensorCores.
    TB = min(B, -(-target_lanes // Sq))
    G = -(-B // TB)
    Bp = G * TB
    L = TB * Sq                        # output lanes per grid step
    margin = 2 * Wq + 2                # max static shift used by the 36 in-kernel views

    # XLA prep touches only raw-size data (no 25x im2col inflation): pad batch + spatial,
    # split row/col parities, flatten (img, i, j) onto lanes, append the slide margin.
    xb = x.astype(jnp.bfloat16)
    xp = jnp.pad(xb, ((0, Bp - B), (0, 0), (2, 2), (2, 2)))        # (Bp, Cin, 2Hq, 2Wq)
    xq = xp.reshape(G, TB, Cin, Hq, 2, Wq, 2)
    xq = xq.transpose(0, 4, 6, 2, 1, 3, 5)                         # (G, 2, 2, Cin, TB, Hq, Wq)
    xq = xq.reshape(G, 4, Cin, L)
    xq = jnp.pad(xq, ((0, 0), (0, 0), (0, 0), (0, margin)))        # margin only feeds phantoms

    kernel = functools.partial(conv_pool_kernel, Wq=Wq, L=L)
    out = pl.pallas_call(
        kernel,
        out_shape=jax.ShapeDtypeStruct((G, Cout, L), jnp.bfloat16),
        grid=(G,),
        in_specs=[
            pl.BlockSpec((1, 4, Cin, L + margin), lambda g: (g, 0, 0, 0)),
            pl.BlockSpec((Cout, D), lambda g: (0, 0)),
            pl.BlockSpec((Cout, 1), lambda g: (0, 0)),
        ],
        out_specs=pl.BlockSpec((1, Cout, L), lambda g: (g, 0, 0)),
        compiler_params=pltpu.CompilerParams(dimension_semantics=("parallel",)),
    )(xq, w_mat, b_col)

    # (G, Cout, TB*Sq) -> (Bp, Cout, Hq, Wq) -> drop phantom rows/cols -> NCHW bf16.
    out = out.reshape(G, Cout, TB, Hq, Wq).transpose(0, 2, 1, 3, 4)
    out = out.reshape(Bp, Cout, Hq, Wq)
    return out[:B, :, :Ho, :Wo]


def linear_layer(x, w_t, b_row, *, tb_max=512):
    """nn.Linear: out = x @ w_t + b.  w_t: (Din, Dpad) bf16 (Dout zero-padded to 128)."""
    B, Din = x.shape
    Dpad = w_t.shape[1]
    Bpad = _round_up(B, 8)
    tb = min(tb_max, Bpad)
    Bpad = _round_up(Bpad, tb)
    xb = jnp.pad(x.astype(jnp.bfloat16), ((0, Bpad - B), (0, 0)))
    out = pl.pallas_call(
        linear_kernel,
        out_shape=jax.ShapeDtypeStruct((Bpad, Dpad), jnp.float32),
        grid=(Bpad // tb,),
        in_specs=[
            pl.BlockSpec((tb, Din), lambda i: (i, 0)),
            pl.BlockSpec((Din, Dpad), lambda i: (0, 0)),
            pl.BlockSpec((1, Dpad), lambda i: (0, 0)),
        ],
        out_specs=pl.BlockSpec((tb, Dpad), lambda i: (i, 0)),
        compiler_params=pltpu.CompilerParams(dimension_semantics=("parallel",)),
    )(xb, w_t, b_row)
    return out[:B]


def prepare_params(params):
    """One-time repack of PyTorch-layout params into kernel-ready operands."""
    def conv_w(w):   # (Cout, Cin, 5, 5) -> (Cout, 25*Cin), rows ordered (kh, kw, ci)
        return jnp.transpose(w, (0, 2, 3, 1)).reshape(w.shape[0], -1).astype(jnp.bfloat16)

    dpad = _round_up(NUM_CLASSES, 128)    # lane-dense FC store; logits sliced to 10 afterwards
    fc_w = jnp.pad(params["fc_w"].T.astype(jnp.bfloat16),
                   ((0, 0), (0, dpad - NUM_CLASSES)))                   # (1568, 128) bf16
    fc_b = jnp.pad(params["fc_b"].astype(jnp.float32),
                   ((0, dpad - NUM_CLASSES),)).reshape(1, -1)            # (1, 128)
    return dict(
        conv1_w=conv_w(params["conv1_w"]),                               # (16, 25)  bf16
        conv1_b=params["conv1_b"].reshape(-1, 1).astype(jnp.float32),    # (16, 1)
        conv2_w=conv_w(params["conv2_w"]),                               # (32, 400) bf16
        conv2_b=params["conv2_b"].reshape(-1, 1).astype(jnp.float32),    # (32, 1)
        fc_w=fc_w, fc_b=fc_b,
    )


def cnn_forward(prep, x):
    """Pallas version of CNN.forward (conv1 -> conv2 -> flatten -> linear)."""
    x = conv_pool_stage(x, prep["conv1_w"], prep["conv1_b"])   # (B, 16, 14, 14) bf16
    x = conv_pool_stage(x, prep["conv2_w"], prep["conv2_b"])   # (B, 32, 7, 7)  bf16
    x = x.reshape(x.shape[0], -1)                              # torch (C,H,W)-order flatten
    # TODO(synk): fold the FC matmul into the conv2 kernel epilogue to drop this pallas_call
    # and the (B,1568) HBM round trip (needs an in-kernel (Cout,Sq)->(1,Cout*Sq) relayout).
    logits = linear_layer(x, prep["fc_w"], prep["fc_b"])       # (B, 128) f32
    return logits[:, :NUM_CLASSES]


# ----------------------- deterministic parameter init ------------------------

def init_params(key):
    ks = jax.random.split(key, 6)

    def u(k, shape, fan_in):
        bound = 1.0 / np.sqrt(fan_in)
        return jax.random.uniform(k, shape, jnp.float32, -bound, bound)

    return dict(
        conv1_w=u(ks[0], (16, 1, 5, 5), 1 * 5 * 5),
        conv1_b=u(ks[1], (16,), 1 * 5 * 5),
        conv2_w=u(ks[2], (32, 16, 5, 5), 16 * 5 * 5),
        conv2_b=u(ks[3], (32,), 16 * 5 * 5),
        fc_w=u(ks[4], (10, 32 * 7 * 7), 32 * 7 * 7),
        fc_b=u(ks[5], (10,), 32 * 7 * 7),
    )


# --------------------------- pure-JAX reference -------------------------------

def cnn_reference(params, x):
    def stage(y, w, b):
        y = lax.conv_general_dilated(
            y, w, (1, 1), ((2, 2), (2, 2)),
            dimension_numbers=("NCHW", "OIHW", "NCHW"))
        y = jax.nn.relu(y + b[None, :, None, None])
        return lax.reduce_window(y, -jnp.inf, lax.max,
                                 (1, 1, 2, 2), (1, 1, 2, 2), "VALID")

    y = stage(x, params["conv1_w"], params["conv1_b"])
    y = stage(y, params["conv2_w"], params["conv2_b"])
    y = y.reshape(y.shape[0], -1)
    return y @ params["fc_w"].T + params["fc_b"]


if __name__ == "__main__":
    key = jax.random.PRNGKey(0)
    kp, kx = jax.random.split(key)
    params = init_params(kp)
    prep = prepare_params(params)
    # MNIST-shaped NCHW input (28x28 is required so the flatten is 32*7*7)
    x = jax.random.normal(kx, (2, 1, 28, 28), jnp.float32)

    out = jax.block_until_ready(jax.jit(cnn_forward)(prep, x))
    assert out.shape == (2, 10)

    ref = cnn_reference(params, x)
    np.testing.assert_allclose(np.asarray(out), np.asarray(ref), rtol=2e-2, atol=2e-2)

    print("KERNEL_OK")
</pallas_src>

<mosaic_0001>
module attributes {stable_mosaic.version = 11 : i64} {
  func.func @conv_pool_kernel(%arg0: i32, %arg1: memref<1x4x1x546xbf16, #tpu.memory_space<vmem>>, %arg2: memref<16x25xbf16, #tpu.memory_space<vmem>>, %arg3: memref<16x1xf32, #tpu.memory_space<vmem>>, %arg4: memref<1x16x512xbf16, #tpu.memory_space<vmem>>) attributes {dimension_semantics = [#tpu.dimension_semantics<parallel>], iteration_bounds = array<i64: 1>, scalar_prefetch = 0 : i64, scratch_operands = 0 : i64, tpu.core_type = #tpu.core_type<tc>, window_params = [{transform_indices = @transform_0, window_bounds = array<i64: 1, 4, 1, 546>}, {pipeline_mode = #tpu.pipeline_mode<synchronous>, transform_indices = @transform_1, window_bounds = array<i64: 16, 25>}, {pipeline_mode = #tpu.pipeline_mode<synchronous>, transform_indices = @transform_2, window_bounds = array<i64: 16, 1>}, {transform_indices = @transform_3, window_bounds = array<i64: 1, 16, 512>}]} {
    %c0 = arith.constant 0 : index
    %c0_0 = arith.constant 0 : index
    %c0_1 = arith.constant 0 : index
    %c0_2 = arith.constant 0 : index
    %0 = vector.load %arg1[%c0, %c0_0, %c0_1, %c0_2] : memref<1x4x1x546xbf16, #tpu.memory_space<vmem>>, vector<1x4x1x546xbf16>
    %1 = vector.shape_cast %0 : vector<1x4x1x546xbf16> to vector<4x1x546xbf16>
    %c0_3 = arith.constant 0 : index
    %c0_4 = arith.constant 0 : index
    %2 = vector.load %arg2[%c0_3, %c0_4] : memref<16x25xbf16, #tpu.memory_space<vmem>>, vector<16x25xbf16>
    %3 = vector.extract_strided_slice %1 {offsets = [0, 0, 0], sizes = [1, 1, 512], strides = [1, 1, 1]} : vector<4x1x546xbf16> to vector<1x1x512xbf16>
    %4 = vector.shape_cast %3 : vector<1x1x512xbf16> to vector<1x512xbf16>
    %5 = vector.extract_strided_slice %1 {offsets = [1, 0, 0], sizes = [1, 1, 512], strides = [1, 1, 1]} : vector<4x1x546xbf16> to vector<1x1x512xbf16>
    %6 = vector.shape_cast %5 : vector<1x1x512xbf16> to vector<1x512xbf16>
    %7 = vector.extract_strided_slice %1 {offsets = [0, 0, 1], sizes = [1, 1, 512], strides = [1, 1, 1]} : vector<4x1x546xbf16> to vector<1x1x512xbf16>
    %8 = vector.shape_cast %7 : vector<1x1x512xbf16> to vector<1x512xbf16>
    %9 = vector.extract_strided_slice %1 {offsets = [1, 0, 1], sizes = [1, 1, 512], strides = [1, 1, 1]} : vector<4x1x546xbf16> to vector<1x1x512xbf16>
    %10 = vector.shape_cast %9 : vector<1x1x512xbf16> to vector<1x512xbf16>
    %11 = vector.extract_strided_slice %1 {offsets = [0, 0, 2], sizes = [1, 1, 512], strides = [1, 1, 1]} : vector<4x1x546xbf16> to vector<1x1x512xbf16>
    %12 = vector.shape_cast %11 : vector<1x1x512xbf16> to vector<1x512xbf16>
    %13 = vector.extract_strided_slice %1 {offsets = [1, 0, 2], sizes = [1, 1, 512], strides = [1, 1, 1]} : vector<4x1x546xbf16> to vector<1x1x512xbf16>
    %14 = vector.shape_cast %13 : vector<1x1x512xbf16> to vector<1x512xbf16>
    %15 = vector.extract_strided_slice %1 {offsets = [2, 0, 0], sizes = [1, 1, 512], strides = [1, 1, 1]} : vector<4x1x546xbf16> to vector<1x1x512xbf16>
    %16 = vector.shape_cast %15 : vector<1x1x512xbf16> to vector<1x512xbf16>
    %17 = vector.extract_strided_slice %1 {offsets = [3, 0, 0], sizes = [1, 1, 512], strides = [1, 1, 1]} : vector<4x1x546xbf16> to vector<1x1x512xbf16>
    %18 = vector.shape_cast %17 : vector<1x1x512xbf16> to vector<1x512xbf16>
    %19 = vector.extract_strided_slice %1 {offsets = [2, 0, 1], sizes = [1, 1, 512], strides = [1, 1, 1]} : vector<4x1x546xbf16> to vector<1x1x512xbf16>
    %20 = vector.shape_cast %19 : vector<1x1x512xbf16> to vector<1x512xbf16>
    %21 = vector.extract_strided_slice %1 {offsets = [3, 0, 1], sizes = [1, 1, 512], strides = [1, 1, 1]} : vector<4x1x546xbf16> to vector<1x1x512xbf16>
    %22 = vector.shape_cast %21 : vector<1x1x512xbf16> to vector<1x512xbf16>
    %23 = vector.extract_strided_slice %1 {offsets = [2, 0, 2], sizes = [1, 1, 512], strides = [1, 1, 1]} : vector<4x1x546xbf16> to vector<1x1x512xbf16>
    %24 = vector.shape_cast %23 : vector<1x1x512xbf16> to vector<1x512xbf16>
    %25 = vector.extract_strided_slice %1 {offsets = [3, 0, 2], sizes = [1, 1, 512], strides = [1, 1, 1]} : vector<4x1x546xbf16> to vector<1x1x512xbf16>
    %26 = vector.shape_cast %25 : vector<1x1x512xbf16> to vector<1x512xbf16>
    %27 = vector.extract_strided_slice %1 {offsets = [0, 0, 16], sizes = [1, 1, 512], strides = [1, 1, 1]} : vector<4x1x546xbf16> to vector<1x1x512xbf16>
    %28 = vector.shape_cast %27 : vector<1x1x512xbf16> to vector<1x512xbf16>
    %29 = vector.extract_strided_slice %1 {offsets = [1, 0, 16], sizes = [1, 1, 512], strides = [1, 1, 1]} : vector<4x1x546xbf16> to vector<1x1x512xbf16>
    %30 = vector.shape_cast %29 : vector<1x1x512xbf16> to vector<1x512xbf16>
    %31 = vector.extract_strided_slice %1 {offsets = [0, 0, 17], sizes = [1, 1, 512], strides = [1, 1, 1]} : vector<4x1x546xbf16> to vector<1x1x512xbf16>
    %32 = vector.shape_cast %31 : vector<1x1x512xbf16> to vector<1x512xbf16>
    %33 = vector.extract_strided_slice %1 {offsets = [1, 0, 17], sizes = [1, 1, 512], strides = [1, 1, 1]} : vector<4x1x546xbf16> to vector<1x1x512xbf16>
    %34 = vector.shape_cast %33 : vector<1x1x512xbf16> to vector<1x512xbf16>
    %35 = vector.extract_strided_slice %1 {offsets = [0, 0, 18], sizes = [1, 1, 512], strides = [1, 1, 1]} : vector<4x1x546xbf16> to vector<1x1x512xbf16>
    %36 = vector.shape_cast %35 : vector<1x1x512xbf16> to vector<1x512xbf16>
    %37 = vector.extract_strided_slice %1 {offsets = [1, 0, 18], sizes = [1, 1, 512], strides = [1, 1, 1]} : vector<4x1x546xbf16> to vector<1x1x512xbf16>
    %38 = vector.shape_cast %37 : vector<1x1x512xbf16> to vector<1x512xbf16>
    %39 = vector.extract_strided_slice %1 {offsets = [2, 0, 16], sizes = [1, 1, 512], strides = [1, 1, 1]} : vector<4x1x546xbf16> to vector<1x1x512xbf16>
    %40 = vector.shape_cast %39 : vector<1x1x512xbf16> to vector<1x512xbf16>
    %41 = vector.extract_strided_slice %1 {offsets = [3, 0, 16], sizes = [1, 1, 512], strides = [1, 1, 1]} : vector<4x1x546xbf16> to vector<1x1x512xbf16>
    %42 = vector.shape_cast %41 : vector<1x1x512xbf16> to vector<1x512xbf16>
    %43 = vector.extract_strided_slice %1 {offsets = [2, 0, 17], sizes = [1, 1, 512], strides = [1, 1, 1]} : vector<4x1x546xbf16> to vector<1x1x512xbf16>
    %44 = vector.shape_cast %43 : vector<1x1x512xbf16> to vector<1x512xbf16>
    %45 = vector.extract_strided_slice %1 {offsets = [3, 0, 17], sizes = [1, 1, 512], strides = [1, 1, 1]} : vector<4x1x546xbf16> to vector<1x1x512xbf16>
    %46 = vector.shape_cast %45 : vector<1x1x512xbf16> to vector<1x512xbf16>
    %47 = vector.extract_strided_slice %1 {offsets = [2, 0, 18], sizes = [1, 1, 512], strides = [1, 1, 1]} : vector<4x1x546xbf16> to vector<1x1x512xbf16>
    %48 = vector.shape_cast %47 : vector<1x1x512xbf16> to vector<1x512xbf16>
    %49 = vector.extract_strided_slice %1 {offsets = [3, 0, 18], sizes = [1, 1, 512], strides = [1, 1, 1]} : vector<4x1x546xbf16> to vector<1x1x512xbf16>
    %50 = vector.shape_cast %49 : vector<1x1x512xbf16> to vector<1x512xbf16>
    %51 = vector.extract_strided_slice %1 {offsets = [0, 0, 32], sizes = [1, 1, 512], strides = [1, 1, 1]} : vector<4x1x546xbf16> to vector<1x1x512xbf16>
    %52 = vector.shape_cast %51 : vector<1x1x512xbf16> to vector<1x512xbf16>
    %53 = vector.extract_strided_slice %1 {offsets = [1, 0, 32], sizes = [1, 1, 512], strides = [1, 1, 1]} : vector<4x1x546xbf16> to vector<1x1x512xbf16>
    %54 = vector.shape_cast %53 : vector<1x1x512xbf16> to vector<1x512xbf16>
    %55 = vector.extract_strided_slice %1 {offsets = [0, 0, 33], sizes = [1, 1, 512], strides = [1, 1, 1]} : vector<4x1x546xbf16> to vector<1x1x512xbf16>
    %56 = vector.shape_cast %55 : vector<1x1x512xbf16> to vector<1x512xbf16>
    %57 = vector.extract_strided_slice %1 {offsets = [1, 0, 33], sizes = [1, 1, 512], strides = [1, 1, 1]} : vector<4x1x546xbf16> to vector<1x1x512xbf16>
    %58 = vector.shape_cast %57 : vector<1x1x512xbf16> to vector<1x512xbf16>
    %59 = vector.extract_strided_slice %1 {offsets = [0, 0, 34], sizes = [1, 1, 512], strides = [1, 1, 1]} : vector<4x1x546xbf16> to vector<1x1x512xbf16>
    %60 = vector.shape_cast %59 : vector<1x1x512xbf16> to vector<1x512xbf16>
    %61 = vector.extract_strided_slice %1 {offsets = [1, 0, 34], sizes = [1, 1, 512], strides = [1, 1, 1]} : vector<4x1x546xbf16> to vector<1x1x512xbf16>
    %62 = vector.shape_cast %61 : vector<1x1x512xbf16> to vector<1x512xbf16>
    %63 = vector.extract_strided_slice %1 {offsets = [2, 0, 32], sizes = [1, 1, 512], strides = [1, 1, 1]} : vector<4x1x546xbf16> to vector<1x1x512xbf16>
    %64 = vector.shape_cast %63 : vector<1x1x512xbf16> to vector<1x512xbf16>
    %65 = vector.extract_strided_slice %1 {offsets = [3, 0, 32], sizes = [1, 1, 512], strides = [1, 1, 1]} : vector<4x1x546xbf16> to vector<1x1x512xbf16>
    %66 = vector.shape_cast %65 : vector<1x1x512xbf16> to vector<1x512xbf16>
    %67 = vector.extract_strided_slice %1 {offsets = [2, 0, 33], sizes = [1, 1, 512], strides = [1, 1, 1]} : vector<4x1x546xbf16> to vector<1x1x512xbf16>
    %68 = vector.shape_cast %67 : vector<1x1x512xbf16> to vector<1x512xbf16>
    %69 = vector.extract_strided_slice %1 {offsets = [3, 0, 33], sizes = [1, 1, 512], strides = [1, 1, 1]} : vector<4x1x546xbf16> to vector<1x1x512xbf16>
    %70 = vector.shape_cast %69 : vector<1x1x512xbf16> to vector<1x512xbf16>
    %71 = vector.extract_strided_slice %1 {offsets = [2, 0, 34], sizes = [1, 1, 512], strides = [1, 1, 1]} : vector<4x1x546xbf16> to vector<1x1x512xbf16>
    %72 = vector.shape_cast %71 : vector<1x1x512xbf16> to vector<1x512xbf16>
    %73 = vector.extract_strided_slice %1 {offsets = [3, 0, 34], sizes = [1, 1, 512], strides = [1, 1, 1]} : vector<4x1x546xbf16> to vector<1x1x512xbf16>
    %74 = vector.shape_cast %73 : vector<1x1x512xbf16> to vector<1x512xbf16>
    %75 = tpu.concatenate %4, %6, %8, %10, %12, %16, %18, %20, %22, %24, %28, %30, %32, %34, %36, %40 in 0 : vector<1x512xbf16>, vector<1x512xbf16>, vector<1x512xbf16>, vector<1x512xbf16>, vector<1x512xbf16>, vector<1x512xbf16>, vector<1x512xbf16>, vector<1x512xbf16>, vector<1x512xbf16>, vector<1x512xbf16>, vector<1x512xbf16>, vector<1x512xbf16>, vector<1x512xbf16>, vector<1x512xbf16>, vector<1x512xbf16>, vector<1x512xbf16> -> vector<16x512xbf16>
    %76 = tpu.concatenate %42, %44, %46, %48, %52, %54, %56, %58, %60 in 0 : vector<1x512xbf16>, vector<1x512xbf16>, vector<1x512xbf16>, vector<1x512xbf16>, vector<1x512xbf16>, vector<1x512xbf16>, vector<1x512xbf16>, vector<1x512xbf16>, vector<1x512xbf16> -> vector<9x512xbf16>
    %77 = tpu.concatenate %75, %76 in 0 : vector<16x512xbf16>, vector<9x512xbf16> -> vector<25x512xbf16>
    %cst = arith.constant dense<0.000000e+00> : vector<16x512xf32>
    %78 = tpu.matmul %2, %77, %cst {dimension_numbers = #tpu.dot_dimension_numbers<[1], [0], [0], [1], [0, 0, 1, 1], [], []>} : vector<16x25xbf16>, vector<25x512xbf16>, vector<16x512xf32> -> vector<16x512xf32>
    %79 = tpu.concatenate %6, %8, %10, %12, %14, %18, %20, %22, %24, %26, %30, %32, %34, %36, %38, %42 in 0 : vector<1x512xbf16>, vector<1x512xbf16>, vector<1x512xbf16>, vector<1x512xbf16>, vector<1x512xbf16>, vector<1x512xbf16>, vector<1x512xbf16>, vector<1x512xbf16>, vector<1x512xbf16>, vector<1x512xbf16>, vector<1x512xbf16>, vector<1x512xbf16>, vector<1x512xbf16>, vector<1x512xbf16>, vector<1x512xbf16>, vector<1x512xbf16> -> vector<16x512xbf16>
    %80 = tpu.concatenate %44, %46, %48, %50, %54, %56, %58, %60, %62 in 0 : vector<1x512xbf16>, vector<1x512xbf16>, vector<1x512xbf16>, vector<1x512xbf16>, vector<1x512xbf16>, vector<1x512xbf16>, vector<1x512xbf16>, vector<1x512xbf16>, vector<1x512xbf16> -> vector<9x512xbf16>
    %81 = tpu.concatenate %79, %80 in 0 : vector<16x512xbf16>, vector<9x512xbf16> -> vector<25x512xbf16>
    %cst_5 = arith.constant dense<0.000000e+00> : vector<16x512xf32>
    %82 = tpu.matmul %2, %81, %cst_5 {dimension_numbers = #tpu.dot_dimension_numbers<[1], [0], [0], [1], [0, 0, 1, 1], [], []>} : vector<16x25xbf16>, vector<25x512xbf16>, vector<16x512xf32> -> vector<16x512xf32>
    %83 = arith.maximumf %78, %82 : vector<16x512xf32>
    %84 = tpu.concatenate %16, %18, %20, %22, %24, %28, %30, %32, %34, %36, %40, %42, %44, %46, %48, %52 in 0 : vector<1x512xbf16>, vector<1x512xbf16>, vector<1x512xbf16>, vector<1x512xbf16>, vector<1x512xbf16>, vector<1x512xbf16>, vector<1x512xbf16>, vector<1x512xbf16>, vector<1x512xbf16>, vector<1x512xbf16>, vector<1x512xbf16>, vector<1x512xbf16>, vector<1x512xbf16>, vector<1x512xbf16>, vector<1x512xbf16>, vector<1x512xbf16> -> vector<16x512xbf16>
    %85 = tpu.concatenate %54, %56, %58, %60, %64, %66, %68, %70, %72 in 0 : vector<1x512xbf16>, vector<1x512xbf16>, vector<1x512xbf16>, vector<1x512xbf16>, vector<1x512xbf16>, vector<1x512xbf16>, vector<1x512xbf16>, vector<1x512xbf16>, vector<1x512xbf16> -> vector<9x512xbf16>
    %86 = tpu.concatenate %84, %85 in 0 : vector<16x512xbf16>, vector<9x512xbf16> -> vector<25x512xbf16>
    %cst_6 = arith.constant dense<0.000000e+00> : vector<16x512xf32>
    %87 = tpu.matmul %2, %86, %cst_6 {dimension_numbers = #tpu.dot_dimension_numbers<[1], [0], [0], [1], [0, 0, 1, 1], [], []>} : vector<16x25xbf16>, vector<25x512xbf16>, vector<16x512xf32> -> vector<16x512xf32>
    %88 = arith.maximumf %83, %87 : vector<16x512xf32>
    %89 = tpu.concatenate %18, %20, %22, %24, %26, %30, %32, %34, %36, %38, %42, %44, %46, %48, %50, %54 in 0 : vector<1x512xbf16>, vector<1x512xbf16>, vector<1x512xbf16>, vector<1x512xbf16>, vector<1x512xbf16>, vector<1x512xbf16>, vector<1x512xbf16>, vector<1x512xbf16>, vector<1x512xbf16>, vector<1x512xbf16>, vector<1x512xbf16>, vector<1x512xbf16>, vector<1x512xbf16>, vector<1x512xbf16>, vector<1x512xbf16>, vector<1x512xbf16> -> vector<16x512xbf16>
    %90 = tpu.concatenate %56, %58, %60, %62, %66, %68, %70, %72, %74 in 0 : vector<1x512xbf16>, vector<1x512xbf16>, vector<1x512xbf16>, vector<1x512xbf16>, vector<1x512xbf16>, vector<1x512xbf16>, vector<1x512xbf16>, vector<1x512xbf16>, vector<1x512xbf16> -> vector<9x512xbf16>
    %91 = tpu.concatenate %89, %90 in 0 : vector<16x512xbf16>, vector<9x512xbf16> -> vector<25x512xbf16>
    %cst_7 = arith.constant dense<0.000000e+00> : vector<16x512xf32>
    %92 = tpu.matmul %2, %91, %cst_7 {dimension_numbers = #tpu.dot_dimension_numbers<[1], [0], [0], [1], [0, 0, 1, 1], [], []>} : vector<16x25xbf16>, vector<25x512xbf16>, vector<16x512xf32> -> vector<16x512xf32>
    %93 = arith.maximumf %88, %92 : vector<16x512xf32>
    %c0_8 = arith.constant 0 : index
    %c0_9 = arith.constant 0 : index
    %94 = vector.load %arg3[%c0_8, %c0_9] : memref<16x1xf32, #tpu.memory_space<vmem>>, vector<16x1xf32>
    %95 = vector.broadcast %94 : vector<16x1xf32> to vector<16x512xf32>
    %96 = arith.addf %93, %95 : vector<16x512xf32>
    %cst_10 = arith.constant 0.000000e+00 : f32
    %97 = vector.broadcast %cst_10 : f32 to vector<16x512xf32>
    %98 = arith.maximumf %96, %97 : vector<16x512xf32>
    %99 = arith.truncf %98 : vector<16x512xf32> to vector<16x512xbf16>
    %c0_11 = arith.constant 0 : index
    %c0_12 = arith.constant 0 : index
    %c0_13 = arith.constant 0 : index
    %100 = vector.load %arg4[%c0_11, %c0_12, %c0_13] : memref<1x16x512xbf16, #tpu.memory_space<vmem>>, vector<1x16x512xbf16>
    %101 = vector.shape_cast %100 : vector<1x16x512xbf16> to vector<16x512xbf16>
    %102 = vector.shape_cast %99 : vector<16x512xbf16> to vector<1x16x512xbf16>
    tpu.vector_store %arg4[%c0_11, %c0_12, %c0_13], %102 {strides = array<i32>} : memref<1x16x512xbf16, #tpu.memory_space<vmem>>, vector<1x16x512xbf16>,
    return
  }
  func.func @transform_0(%arg0: i32) -> (i32, i32, i32, i32) {
    %c0_i32 = arith.constant 0 : i32
    %c0_i32_0 = arith.constant 0 : i32
    %c0_i32_1 = arith.constant 0 : i32
    %c0_i32_2 = arith.constant 0 : i32
    return %arg0, %c0_i32, %c0_i32_0, %c0_i32_1 : i32, i32, i32, i32
  }
  func.func @transform_1(%arg0: i32) -> (i32, i32) {
    %c0_i32 = arith.constant 0 : i32
    %c0_i32_0 = arith.constant 0 : i32
    %c0_i32_1 = arith.constant 0 : i32
    return %c0_i32, %c0_i32_0 : i32, i32
  }
  func.func @transform_2(%arg0: i32) -> (i32, i32) {
    %c0_i32 = arith.constant 0 : i32
    %c0_i32_0 = arith.constant 0 : i32
    %c0_i32_1 = arith.constant 0 : i32
    return %c0_i32, %c0_i32_0 : i32, i32
  }
  func.func @transform_3(%arg0: i32) -> (i32, i32, i32) {
    %c0_i32 = arith.constant 0 : i32
    %c0_i32_0 = arith.constant 0 : i32
    %c0_i32_1 = arith.constant 0 : i32
    return %arg0, %c0_i32, %c0_i32_0 : i32, i32, i32
  }
}

module attributes {stable_mosaic.version = 11 : i64} {
  func.func @conv_pool_kernel(%arg0: i32, %arg1: memref<1x4x16x182xbf16, #tpu.memory_space<vmem>>, %arg2: memref<32x400xbf16, #tpu.memory_space<vmem>>, %arg3: memref<32x1xf32, #tpu.memory_space<vmem>>, %arg4: memref<1x32x162xbf16, #tpu.memory_space<vmem>>) attributes {dimension_semantics = [#tpu.dimension_semantics<parallel>], iteration_bounds = array<i64: 1>, scalar_prefetch = 0 : i64, scratch_operands = 0 : i64, tpu.core_type = #tpu.core_type<tc>, window_params = [{transform_indices = @transform_0, window_bounds = array<i64: 1, 4, 16, 182>}, {pipeline_mode = #tpu.pipeline_mode<synchronous>, transform_indices = @transform_1, window_bounds = array<i64: 32, 400>}, {pipeline_mode = #tpu.pipeline_mode<synchronous>, transform_indices = @transform_2, window_bounds = array<i64: 32, 1>}, {transform_indices = @transform_3, window_bounds = array<i64: 1, 32, 162>}]} {
    %c0 = arith.constant 0 : index
    %c0_0 = arith.constant 0 : index
    %c0_1 = arith.constant 0 : index
    %c0_2 = arith.constant 0 : index
    %0 = vector.load %arg1[%c0, %c0_0, %c0_1, %c0_2] : memref<1x4x16x182xbf16, #tpu.memory_space<vmem>>, vector<1x4x16x182xbf16>
    %1 = vector.shape_cast %0 : vector<1x4x16x182xbf16> to vector<4x16x182xbf16>
    %c0_3 = arith.constant 0 : index
    %c0_4 = arith.constant 0 : index
    %2 = vector.load %arg2[%c0_3, %c0_4] : memref<32x400xbf16, #tpu.memory_space<vmem>>, vector<32x400xbf16>
    %3 = vector.extract_strided_slice %1 {offsets = [0, 0, 0], sizes = [1, 16, 162], strides = [1, 1, 1]} : vector<4x16x182xbf16> to vector<1x16x162xbf16>
    %4 = vector.shape_cast %3 : vector<1x16x162xbf16> to vector<16x162xbf16>
    %5 = vector.extract_strided_slice %1 {offsets = [1, 0, 0], sizes = [1, 16, 162], strides = [1, 1, 1]} : vector<4x16x182xbf16> to vector<1x16x162xbf16>
    %6 = vector.shape_cast %5 : vector<1x16x162xbf16> to vector<16x162xbf16>
    %7 = vector.extract_strided_slice %1 {offsets = [0, 0, 1], sizes = [1, 16, 162], strides = [1, 1, 1]} : vector<4x16x182xbf16> to vector<1x16x162xbf16>
    %8 = vector.shape_cast %7 : vector<1x16x162xbf16> to vector<16x162xbf16>
    %9 = vector.extract_strided_slice %1 {offsets = [1, 0, 1], sizes = [1, 16, 162], strides = [1, 1, 1]} : vector<4x16x182xbf16> to vector<1x16x162xbf16>
    %10 = vector.shape_cast %9 : vector<1x16x162xbf16> to vector<16x162xbf16>
    %11 = vector.extract_strided_slice %1 {offsets = [0, 0, 2], sizes = [1, 16, 162], strides = [1, 1, 1]} : vector<4x16x182xbf16> to vector<1x16x162xbf16>
    %12 = vector.shape_cast %11 : vector<1x16x162xbf16> to vector<16x162xbf16>
    %13 = vector.extract_strided_slice %1 {offsets = [1, 0, 2], sizes = [1, 16, 162], strides = [1, 1, 1]} : vector<4x16x182xbf16> to vector<1x16x162xbf16>
    %14 = vector.shape_cast %13 : vector<1x16x162xbf16> to vector<16x162xbf16>
    %15 = vector.extract_strided_slice %1 {offsets = [2, 0, 0], sizes = [1, 16, 162], strides = [1, 1, 1]} : vector<4x16x182xbf16> to vector<1x16x162xbf16>
    %16 = vector.shape_cast %15 : vector<1x16x162xbf16> to vector<16x162xbf16>
    %17 = vector.extract_strided_slice %1 {offsets = [3, 0, 0], sizes = [1, 16, 162], strides = [1, 1, 1]} : vector<4x16x182xbf16> to vector<1x16x162xbf16>
    %18 = vector.shape_cast %17 : vector<1x16x162xbf16> to vector<16x162xbf16>
    %19 = vector.extract_strided_slice %1 {offsets = [2, 0, 1], sizes = [1, 16, 162], strides = [1, 1, 1]} : vector<4x16x182xbf16> to vector<1x16x162xbf16>
    %20 = vector.shape_cast %19 : vector<1x16x162xbf16> to vector<16x162xbf16>
    %21 = vector.extract_strided_slice %1 {offsets = [3, 0, 1], sizes = [1, 16, 162], strides = [1, 1, 1]} : vector<4x16x182xbf16> to vector<1x16x162xbf16>
    %22 = vector.shape_cast %21 : vector<1x16x162xbf16> to vector<16x162xbf16>
    %23 = vector.extract_strided_slice %1 {offsets = [2, 0, 2], sizes = [1, 16, 162], strides = [1, 1, 1]} : vector<4x16x182xbf16> to vector<1x16x162xbf16>
    %24 = vector.shape_cast %23 : vector<1x16x162xbf16> to vector<16x162xbf16>
    %25 = vector.extract_strided_slice %1 {offsets = [3, 0, 2], sizes = [1, 16, 162], strides = [1, 1, 1]} : vector<4x16x182xbf16> to vector<1x16x162xbf16>
    %26 = vector.shape_cast %25 : vector<1x16x162xbf16> to vector<16x162xbf16>
    %27 = vector.extract_strided_slice %1 {offsets = [0, 0, 9], sizes = [1, 16, 162], strides = [1, 1, 1]} : vector<4x16x182xbf16> to vector<1x16x162xbf16>
    %28 = vector.shape_cast %27 : vector<1x16x162xbf16> to vector<16x162xbf16>
    %29 = vector.extract_strided_slice %1 {offsets = [1, 0, 9], sizes = [1, 16, 162], strides = [1, 1, 1]} : vector<4x16x182xbf16> to vector<1x16x162xbf16>
    %30 = vector.shape_cast %29 : vector<1x16x162xbf16> to vector<16x162xbf16>
    %31 = vector.extract_strided_slice %1 {offsets = [0, 0, 10], sizes = [1, 16, 162], strides = [1, 1, 1]} : vector<4x16x182xbf16> to vector<1x16x162xbf16>
    %32 = vector.shape_cast %31 : vector<1x16x162xbf16> to vector<16x162xbf16>
    %33 = vector.extract_strided_slice %1 {offsets = [1, 0, 10], sizes = [1, 16, 162], strides = [1, 1, 1]} : vector<4x16x182xbf16> to vector<1x16x162xbf16>
    %34 = vector.shape_cast %33 : vector<1x16x162xbf16> to vector<16x162xbf16>
    %35 = vector.extract_strided_slice %1 {offsets = [0, 0, 11], sizes = [1, 16, 162], strides = [1, 1, 1]} : vector<4x16x182xbf16> to vector<1x16x162xbf16>
    %36 = vector.shape_cast %35 : vector<1x16x162xbf16> to vector<16x162xbf16>
    %37 = vector.extract_strided_slice %1 {offsets = [1, 0, 11], sizes = [1, 16, 162], strides = [1, 1, 1]} : vector<4x16x182xbf16> to vector<1x16x162xbf16>
    %38 = vector.shape_cast %37 : vector<1x16x162xbf16> to vector<16x162xbf16>
    %39 = vector.extract_strided_slice %1 {offsets = [2, 0, 9], sizes = [1, 16, 162], strides = [1, 1, 1]} : vector<4x16x182xbf16> to vector<1x16x162xbf16>
    %40 = vector.shape_cast %39 : vector<1x16x162xbf16> to vector<16x162xbf16>
    %41 = vector.extract_strided_slice %1 {offsets = [3, 0, 9], sizes = [1, 16, 162], strides = [1, 1, 1]} : vector<4x16x182xbf16> to vector<1x16x162xbf16>
    %42 = vector.shape_cast %41 : vector<1x16x162xbf16> to vector<16x162xbf16>
    %43 = vector.extract_strided_slice %1 {offsets = [2, 0, 10], sizes = [1, 16, 162], strides = [1, 1, 1]} : vector<4x16x182xbf16> to vector<1x16x162xbf16>
    %44 = vector.shape_cast %43 : vector<1x16x162xbf16> to vector<16x162xbf16>
    %45 = vector.extract_strided_slice %1 {offsets = [3, 0, 10], sizes = [1, 16, 162], strides = [1, 1, 1]} : vector<4x16x182xbf16> to vector<1x16x162xbf16>
    %46 = vector.shape_cast %45 : vector<1x16x162xbf16> to vector<16x162xbf16>
    %47 = vector.extract_strided_slice %1 {offsets = [2, 0, 11], sizes = [1, 16, 162], strides = [1, 1, 1]} : vector<4x16x182xbf16> to vector<1x16x162xbf16>
    %48 = vector.shape_cast %47 : vector<1x16x162xbf16> to vector<16x162xbf16>
    %49 = vector.extract_strided_slice %1 {offsets = [3, 0, 11], sizes = [1, 16, 162], strides = [1, 1, 1]} : vector<4x16x182xbf16> to vector<1x16x162xbf16>
    %50 = vector.shape_cast %49 : vector<1x16x162xbf16> to vector<16x162xbf16>
    %51 = vector.extract_strided_slice %1 {offsets = [0, 0, 18], sizes = [1, 16, 162], strides = [1, 1, 1]} : vector<4x16x182xbf16> to vector<1x16x162xbf16>
    %52 = vector.shape_cast %51 : vector<1x16x162xbf16> to vector<16x162xbf16>
    %53 = vector.extract_strided_slice %1 {offsets = [1, 0, 18], sizes = [1, 16, 162], strides = [1, 1, 1]} : vector<4x16x182xbf16> to vector<1x16x162xbf16>
    %54 = vector.shape_cast %53 : vector<1x16x162xbf16> to vector<16x162xbf16>
    %55 = vector.extract_strided_slice %1 {offsets = [0, 0, 19], sizes = [1, 16, 162], strides = [1, 1, 1]} : vector<4x16x182xbf16> to vector<1x16x162xbf16>
    %56 = vector.shape_cast %55 : vector<1x16x162xbf16> to vector<16x162xbf16>
    %57 = vector.extract_strided_slice %1 {offsets = [1, 0, 19], sizes = [1, 16, 162], strides = [1, 1, 1]} : vector<4x16x182xbf16> to vector<1x16x162xbf16>
    %58 = vector.shape_cast %57 : vector<1x16x162xbf16> to vector<16x162xbf16>
    %59 = vector.extract_strided_slice %1 {offsets = [0, 0, 20], sizes = [1, 16, 162], strides = [1, 1, 1]} : vector<4x16x182xbf16> to vector<1x16x162xbf16>
    %60 = vector.shape_cast %59 : vector<1x16x162xbf16> to vector<16x162xbf16>
    %61 = vector.extract_strided_slice %1 {offsets = [1, 0, 20], sizes = [1, 16, 162], strides = [1, 1, 1]} : vector<4x16x182xbf16> to vector<1x16x162xbf16>
    %62 = vector.shape_cast %61 : vector<1x16x162xbf16> to vector<16x162xbf16>
    %63 = vector.extract_strided_slice %1 {offsets = [2, 0, 18], sizes = [1, 16, 162], strides = [1, 1, 1]} : vector<4x16x182xbf16> to vector<1x16x162xbf16>
    %64 = vector.shape_cast %63 : vector<1x16x162xbf16> to vector<16x162xbf16>
    %65 = vector.extract_strided_slice %1 {offsets = [3, 0, 18], sizes = [1, 16, 162], strides = [1, 1, 1]} : vector<4x16x182xbf16> to vector<1x16x162xbf16>
    %66 = vector.shape_cast %65 : vector<1x16x162xbf16> to vector<16x162xbf16>
    %67 = vector.extract_strided_slice %1 {offsets = [2, 0, 19], sizes = [1, 16, 162], strides = [1, 1, 1]} : vector<4x16x182xbf16> to vector<1x16x162xbf16>
    %68 = vector.shape_cast %67 : vector<1x16x162xbf16> to vector<16x162xbf16>
    %69 = vector.extract_strided_slice %1 {offsets = [3, 0, 19], sizes = [1, 16, 162], strides = [1, 1, 1]} : vector<4x16x182xbf16> to vector<1x16x162xbf16>
    %70 = vector.shape_cast %69 : vector<1x16x162xbf16> to vector<16x162xbf16>
    %71 = vector.extract_strided_slice %1 {offsets = [2, 0, 20], sizes = [1, 16, 162], strides = [1, 1, 1]} : vector<4x16x182xbf16> to vector<1x16x162xbf16>
    %72 = vector.shape_cast %71 : vector<1x16x162xbf16> to vector<16x162xbf16>
    %73 = vector.extract_strided_slice %1 {offsets = [3, 0, 20], sizes = [1, 16, 162], strides = [1, 1, 1]} : vector<4x16x182xbf16> to vector<1x16x162xbf16>
    %74 = vector.shape_cast %73 : vector<1x16x162xbf16> to vector<16x162xbf16>
    %75 = tpu.concatenate %4, %6, %8, %10, %12, %16, %18, %20, %22, %24, %28, %30, %32, %34, %36, %40 in 0 : vector<16x162xbf16>, vector<16x162xbf16>, vector<16x162xbf16>, vector<16x162xbf16>, vector<16x162xbf16>, vector<16x162xbf16>, vector<16x162xbf16>, vector<16x162xbf16>, vector<16x162xbf16>, vector<16x162xbf16>, vector<16x162xbf16>, vector<16x162xbf16>, vector<16x162xbf16>, vector<16x162xbf16>, vector<16x162xbf16>, vector<16x162xbf16> -> vector<256x162xbf16>
    %76 = tpu.concatenate %42, %44, %46, %48, %52, %54, %56, %58, %60 in 0 : vector<16x162xbf16>, vector<16x162xbf16>, vector<16x162xbf16>, vector<16x162xbf16>, vector<16x162xbf16>, vector<16x162xbf16>, vector<16x162xbf16>, vector<16x162xbf16>, vector<16x162xbf16> -> vector<144x162xbf16>
    %77 = tpu.concatenate %75, %76 in 0 : vector<256x162xbf16>, vector<144x162xbf16> -> vector<400x162xbf16>
    %cst = arith.constant dense<0.000000e+00> : vector<32x162xf32>
    %78 = tpu.matmul %2, %77, %cst {dimension_numbers = #tpu.dot_dimension_numbers<[1], [0], [0], [1], [0, 0, 1, 1], [], []>} : vector<32x400xbf16>, vector<400x162xbf16>, vector<32x162xf32> -> vector<32x162xf32>
    %79 = tpu.concatenate %6, %8, %10, %12, %14, %18, %20, %22, %24, %26, %30, %32, %34, %36, %38, %42 in 0 : vector<16x162xbf16>, vector<16x162xbf16>, vector<16x162xbf16>, vector<16x162xbf16>, vector<16x162xbf16>, vector<16x162xbf16>, vector<16x162xbf16>, vector<16x162xbf16>, vector<16x162xbf16>, vector<16x162xbf16>, vector<16x162xbf16>, vector<16x162xbf16>, vector<16x162xbf16>, vector<16x162xbf16>, vector<16x162xbf16>, vector<16x162xbf16> -> vector<256x162xbf16>
    %80 = tpu.concatenate %44, %46, %48, %50, %54, %56, %58, %60, %62 in 0 : vector<16x162xbf16>, vector<16x162xbf16>, vector<16x162xbf16>, vector<16x162xbf16>, vector<16x162xbf16>, vector<16x162xbf16>, vector<16x162xbf16>, vector<16x162xbf16>, vector<16x162xbf16> -> vector<144x162xbf16>
    %81 = tpu.concatenate %79, %80 in 0 : vector<256x162xbf16>, vector<144x162xbf16> -> vector<400x162xbf16>
    %cst_5 = arith.constant dense<0.000000e+00> : vector<32x162xf32>
    %82 = tpu.matmul %2, %81, %cst_5 {dimension_numbers = #tpu.dot_dimension_numbers<[1], [0], [0], [1], [0, 0, 1, 1], [], []>} : vector<32x400xbf16>, vector<400x162xbf16>, vector<32x162xf32> -> vector<32x162xf32>
    %83 = arith.maximumf %78, %82 : vector<32x162xf32>
    %84 = tpu.concatenate %16, %18, %20, %22, %24, %28, %30, %32, %34, %36, %40, %42, %44, %46, %48, %52 in 0 : vector<16x162xbf16>, vector<16x162xbf16>, vector<16x162xbf16>, vector<16x162xbf16>, vector<16x162xbf16>, vector<16x162xbf16>, vector<16x162xbf16>, vector<16x162xbf16>, vector<16x162xbf16>, vector<16x162xbf16>, vector<16x162xbf16>, vector<16x162xbf16>, vector<16x162xbf16>, vector<16x162xbf16>, vector<16x162xbf16>, vector<16x162xbf16> -> vector<256x162xbf16>
    %85 = tpu.concatenate %54, %56, %58, %60, %64, %66, %68, %70, %72 in 0 : vector<16x162xbf16>, vector<16x162xbf16>, vector<16x162xbf16>, vector<16x162xbf16>, vector<16x162xbf16>, vector<16x162xbf16>, vector<16x162xbf16>, vector<16x162xbf16>, vector<16x162xbf16> -> vector<144x162xbf16>
    %86 = tpu.concatenate %84, %85 in 0 : vector<256x162xbf16>, vector<144x162xbf16> -> vector<400x162xbf16>
    %cst_6 = arith.constant dense<0.000000e+00> : vector<32x162xf32>
    %87 = tpu.matmul %2, %86, %cst_6 {dimension_numbers = #tpu.dot_dimension_numbers<[1], [0], [0], [1], [0, 0, 1, 1], [], []>} : vector<32x400xbf16>, vector<400x162xbf16>, vector<32x162xf32> -> vector<32x162xf32>
    %88 = arith.maximumf %83, %87 : vector<32x162xf32>
    %89 = tpu.concatenate %18, %20, %22, %24, %26, %30, %32, %34, %36, %38, %42, %44, %46, %48, %50, %54 in 0 : vector<16x162xbf16>, vector<16x162xbf16>, vector<16x162xbf16>, vector<16x162xbf16>, vector<16x162xbf16>, vector<16x162xbf16>, vector<16x162xbf16>, vector<16x162xbf16>, vector<16x162xbf16>, vector<16x162xbf16>, vector<16x162xbf16>, vector<16x162xbf16>, vector<16x162xbf16>, vector<16x162xbf16>, vector<16x162xbf16>, vector<16x162xbf16> -> vector<256x162xbf16>
    %90 = tpu.concatenate %56, %58, %60, %62, %66, %68, %70, %72, %74 in 0 : vector<16x162xbf16>, vector<16x162xbf16>, vector<16x162xbf16>, vector<16x162xbf16>, vector<16x162xbf16>, vector<16x162xbf16>, vector<16x162xbf16>, vector<16x162xbf16>, vector<16x162xbf16> -> vector<144x162xbf16>
    %91 = tpu.concatenate %89, %90 in 0 : vector<256x162xbf16>, vector<144x162xbf16> -> vector<400x162xbf16>
    %cst_7 = arith.constant dense<0.000000e+00> : vector<32x162xf32>
    %92 = tpu.matmul %2, %91, %cst_7 {dimension_numbers = #tpu.dot_dimension_numbers<[1], [0], [0], [1], [0, 0, 1, 1], [], []>} : vector<32x400xbf16>, vector<400x162xbf16>, vector<32x162xf32> -> vector<32x162xf32>
    %93 = arith.maximumf %88, %92 : vector<32x162xf32>
    %c0_8 = arith.constant 0 : index
    %c0_9 = arith.constant 0 : index
    %94 = vector.load %arg3[%c0_8, %c0_9] : memref<32x1xf32, #tpu.memory_space<vmem>>, vector<32x1xf32>
    %95 = vector.broadcast %94 : vector<32x1xf32> to vector<32x162xf32>
    %96 = arith.addf %93, %95 : vector<32x162xf32>
    %cst_10 = arith.constant 0.000000e+00 : f32
    %97 = vector.broadcast %cst_10 : f32 to vector<32x162xf32>
    %98 = arith.maximumf %96, %97 : vector<32x162xf32>
    %99 = arith.truncf %98 : vector<32x162xf32> to vector<32x162xbf16>
    %c0_11 = arith.constant 0 : index
    %c0_12 = arith.constant 0 : index
    %c0_13 = arith.constant 0 : index
    %100 = vector.load %arg4[%c0_11, %c0_12, %c0_13] : memref<1x32x162xbf16, #tpu.memory_space<vmem>>, vector<1x32x162xbf16>
    %101 = vector.shape_cast %100 : vector<1x32x162xbf16> to vector<32x162xbf16>
    %102 = vector.shape_cast %99 : vector<32x162xbf16> to vector<1x32x162xbf16>
    tpu.vector_store %arg4[%c0_11, %c0_12, %c0_13], %102 {strides = array<i32>} : memref<1x32x162xbf16, #tpu.memory_space<vmem>>, vector<1x32x162xbf16>,
    return
  }
  func.func @transform_0(%arg0: i32) -> (i32, i32, i32, i32) {
    %c0_i32 = arith.constant 0 : i32
    %c0_i32_0 = arith.constant 0 : i32
    %c0_i32_1 = arith.constant 0 : i32
    %c0_i32_2 = arith.constant 0 : i32
    return %arg0, %c0_i32, %c0_i32_0, %c0_i32_1 : i32, i32, i32, i32
  }
  func.func @transform_1(%arg0: i32) -> (i32, i32) {
    %c0_i32 = arith.constant 0 : i32
    %c0_i32_0 = arith.constant 0 : i32
    %c0_i32_1 = arith.constant 0 : i32
    return %c0_i32, %c0_i32_0 : i32, i32
  }
  func.func @transform_2(%arg0: i32) -> (i32, i32) {
    %c0_i32 = arith.constant 0 : i32
    %c0_i32_0 = arith.constant 0 : i32
    %c0_i32_1 = arith.constant 0 : i32
    return %c0_i32, %c0_i32_0 : i32, i32
  }
  func.func @transform_3(%arg0: i32) -> (i32, i32, i32) {
    %c0_i32 = arith.constant 0 : i32
    %c0_i32_0 = arith.constant 0 : i32
    %c0_i32_1 = arith.constant 0 : i32
    return %arg0, %c0_i32, %c0_i32_0 : i32, i32, i32
  }
}

module attributes {stable_mosaic.version = 11 : i64} {
  func.func @linear_kernel(%arg0: i32, %arg1: memref<8x1568xbf16, #tpu.memory_space<vmem>>, %arg2: memref<1568x128xbf16, #tpu.memory_space<vmem>>, %arg3: memref<1x128xf32, #tpu.memory_space<vmem>>, %arg4: memref<8x128xf32, #tpu.memory_space<vmem>>) attributes {dimension_semantics = [#tpu.dimension_semantics<parallel>], iteration_bounds = array<i64: 1>, scalar_prefetch = 0 : i64, scratch_operands = 0 : i64, tpu.core_type = #tpu.core_type<tc>, window_params = [{transform_indices = @transform_0, window_bounds = array<i64: 8, 1568>}, {pipeline_mode = #tpu.pipeline_mode<synchronous>, transform_indices = @transform_1, window_bounds = array<i64: 1568, 128>}, {pipeline_mode = #tpu.pipeline_mode<synchronous>, transform_indices = @transform_2, window_bounds = array<i64: 1, 128>}, {transform_indices = @transform_3, window_bounds = array<i64: 8, 128>}]} {
    %c0 = arith.constant 0 : index
    %c0_0 = arith.constant 0 : index
    %0 = vector.load %arg1[%c0, %c0_0] : memref<8x1568xbf16, #tpu.memory_space<vmem>>, vector<8x1568xbf16>
    %c0_1 = arith.constant 0 : index
    %c0_2 = arith.constant 0 : index
    %1 = vector.load %arg2[%c0_1, %c0_2] : memref<1568x128xbf16, #tpu.memory_space<vmem>>, vector<1568x128xbf16>
    %cst = arith.constant dense<0.000000e+00> : vector<8x128xf32>
    %2 = tpu.matmul %0, %1, %cst {dimension_numbers = #tpu.dot_dimension_numbers<[1], [0], [0], [1], [0, 0, 1, 1], [], []>} : vector<8x1568xbf16>, vector<1568x128xbf16>, vector<8x128xf32> -> vector<8x128xf32>
    %c0_3 = arith.constant 0 : index
    %c0_4 = arith.constant 0 : index
    %3 = vector.load %arg3[%c0_3, %c0_4] : memref<1x128xf32, #tpu.memory_space<vmem>>, vector<1x128xf32>
    %4 = vector.broadcast %3 : vector<1x128xf32> to vector<8x128xf32>
    %5 = arith.addf %2, %4 : vector<8x128xf32>
    %c0_5 = arith.constant 0 : index
    %c0_6 = arith.constant 0 : index
    %6 = vector.load %arg4[%c0_5, %c0_6] : memref<8x128xf32, #tpu.memory_space<vmem>>, vector<8x128xf32>
    tpu.vector_store %arg4[%c0_5, %c0_6], %5 {strides = array<i32>} : memref<8x128xf32, #tpu.memory_space<vmem>>, vector<8x128xf32>,
    return
  }
  func.func @transform_0(%arg0: i32) -> (i32, i32) {
    %c0_i32 = arith.constant 0 : i32
    %c0_i32_0 = arith.constant 0 : i32
    return %arg0, %c0_i32 : i32, i32
  }
  func.func @transform_1(%arg0: i32) -> (i32, i32) {
    %c0_i32 = arith.constant 0 : i32
    %c0_i32_0 = arith.constant 0 : i32
    %c0_i32_1 = arith.constant 0 : i32
    return %c0_i32, %c0_i32_0 : i32, i32
  }
  func.func @transform_2(%arg0: i32) -> (i32, i32) {
    %c0_i32 = arith.constant 0 : i32
    %c0_i32_0 = arith.constant 0 : i32
    %c0_i32_1 = arith.constant 0 : i32
    return %c0_i32, %c0_i32_0 : i32, i32
  }
  func.func @transform_3(%arg0: i32) -> (i32, i32) {
    %c0_i32 = arith.constant 0 : i32
    %c0_i32_0 = arith.constant 0 : i32
    return %arg0, %c0_i32 : i32, i32
  }
}

</mosaic_0001>

<bundles_post_ra>
// kernel: cnn_forward.4
= control target key start
LH: loop header
LB: loop body
LE: loop exit
PB: predicated region body
PF: predicated region fallthrough
CT: control target
= control target key end

     0   :  { %s1104_s16 = smov 118   ;;  %s1105_s21 = smov 119   ;;  %vm134_vm0 = vcmask 965632   ;;  %vm119_vm1 = vcmask 973824   ;;  %vm70_vm2 = vcmask 1031168   ;;  %vm55_vm3 = vcmask 1039360   ;;  %s1800_s0 = inlined_call_operand.vmem [shape: bf16[1,4,16,182], index: 0, kind: input, shape index: {}]   ;;  %s1801_s1 = inlined_call_operand.vmem [shape: bf16[32,400], index: 1, kind: input, shape index: {}]   ;;  %s1802_s2 = inlined_call_operand.vmem [shape: f32[32,1], index: 2, kind: input, shape index: {}]   ;;  %s1803_s3 = inlined_call_operand.vmem [shape: bf16[1,32,162], index: 3, kind: output, shape index: {}]  }
   0x1   :  { %v1137_v0 = vld [vmem:[%s1800_s0 + $0x10] ss:$8 sps:$4 sm:$0xff]   ;;  %v1142_v1 = vld [vmem:[%s1800_s0] ss:$8 sps:$4 sm:$0xff]   ;;  %v1149_v2 = vld [vmem:[%s1800_s0 + $0x14] ss:$8 sps:$4 sm:$0xff]  }
   0x2   :  { %138 = vrot.lane.b32.xlu0 %v1137_v0, %s1104_s16  ;;  %130 = vrot.lane.b32.xlu1 %v1142_v1, %s1104_s16  ;;  %v1156_v3 = vld [vmem:[%s1800_s0 + $0x4] ss:$8 sps:$4 sm:$0xff]   ;;  %v1171_v4 = vld [vmem:[%s1800_s0 + $0x20] ss:$8 sps:$4 sm:$0xff]   ;;  %s1106_s26 = smov 126   ;;  %s1107_s4 = smov 127  }
   0x3   :  { %v1178_v5 = vld [vmem:[%s1800_s0 + $0x24] ss:$8 sps:$4 sm:$0xff]   ;;  %v1185_v6 = vld [vmem:[%s1800_s0 + $0x30] ss:$8 sps:$4 sm:$0xff]   ;;  %v1192_v7 = vld [vmem:[%s1800_s0 + $0x34] ss:$8 sps:$4 sm:$0xff]  }
   0x4   :  { %s1108_s5 = smov 117   ;;  %s1109_s0 = smov 120   ;;  %v1288_v30 = vld [vmem:[%s1801_s1 + $0xc] ss:$16 sps:$4 sm:$0xff]   ;;  %vm261_vm4 = vcmask 130048   ;;  %vm149_vm5 = vcmask 957440  }
   0x5   :  { %1052 = vmatprep.mubr.msk.bf16.mxu1 %vm261_vm4, %v1288_v30  ;;  %v1355_v44 = vld [vmem:[%s1801_s1 + $0x4] ss:$16 sps:$4 sm:$0xff]   ;;  %vm399_vm6 = vcmask 982016   ;;  %s1110_s10 = smov 110   ;;  %s1111_s11 = smov 1   ;;  %vm589_vm7 = vcmask 900096  }
   0x6   :  { %140 = vrot.lane.b32.xlu0 %v1149_v2, %s1104_s16  ;;  %132 = vrot.lane.b32.xlu1 %v1156_v3, %s1104_s16  ;;  %s1112_s12 = smov 109   ;;  %vm781_vm8 = vcmask 7168   ;;  %vm819_vm9 = vcmask 891904   ;;  %vm1025_vm10 = vcmask 1043456   ;;  %vm1026_vm11 = vcmask 277508  }
   0x7   :  { %300 = vmatprep.mubr.bf16.mxu0 %v1355_v44  ;;  %vm1776_vm12 = vmor %vm1026_vm11, %vm1025_vm10 }
   0xa   :  { %123 = vrot.lane.b32.xlu0 %v1137_v0, %s1105_s21  ;;  %125 = vrot.lane.b32.xlu1 %v1149_v2, %s1105_s21 }
   0xe   :  { %115 = vrot.lane.b32.xlu0 %v1142_v1, %s1105_s21  ;;  %117 = vrot.lane.b32.xlu1 %v1156_v3, %s1105_s21 }
  0x12   :  { %108 = vrot.lane.b32.xlu0 %v1171_v4, %s1106_s26  ;;  %110 = vrot.lane.b32.xlu1 %v1178_v5, %s1106_s26 }
  0x16   :  { %101 = vrot.lane.b32.xlu0 %v1185_v6, %s1107_s4  ;;  %103 = vrot.lane.b32.xlu1 %v1192_v7, %s1107_s4 }
  0x1a   :  { %94 = vrot.lane.b32.xlu0 %v1171_v4, %s1107_s4  ;;  %96 = vrot.lane.b32.xlu1 %v1178_v5, %s1107_s4 }
  0x1e   :  { %145 = vrot.lane.b32.xlu0 %v1142_v1, %s1108_s5  ;;  %147 = vrot.lane.b32.xlu1 %v1156_v3, %s1108_s5 }
  0x22   :  { %66 = vrot.lane.b32.xlu0 %v1142_v1, %s1106_s26  ;;  %68 = vrot.lane.b32.xlu1 %v1156_v3, %s1106_s26 }
  0x26   :  { %59 = vrot.lane.b32.xlu0 %v1137_v0, %s1107_s4  ;;  %61 = vrot.lane.b32.xlu1 %v1149_v2, %s1107_s4 }
  0x2a   :  { %395 = vrot.lane.b32.xlu0 %v1137_v0, %s1109_s0  ;;  %397 = vrot.lane.b32.xlu1 %v1149_v2, %s1109_s0 }
  0x2e   :  { %51 = vrot.lane.b32.xlu0 %v1142_v1, %s1107_s4  ;;  %53 = vrot.lane.b32.xlu1 %v1156_v3, %s1107_s4 }
  0x32   :  { %160 = vrot.lane.b32.xlu0 %v1185_v6, %s1105_s21  ;;  %162 = vrot.lane.b32.xlu1 %v1192_v7, %s1105_s21 }
  0x74   :  { %v139_v8 = vpop.permute.xlu0 %138  ;;  %v131_v9 = vpop.permute.xlu1 %130 }
  0x78   :  { %v1216_v10 = vpop.permute.xlu0 %140  ;;  %v1218_v11 = vpop.permute.xlu1 %132 }
  0x79   :  { %190 = vrot.lane.b32.xlu1 %v1216_v10, %s1105_s21  ;;  %v1224_v12 = vsel %vm134_vm0, %v139_v8, %v1216_v10  ;;  %v1232_v14 = vsel %vm134_vm0, %v131_v9, %v1218_v11 }
  0x7a   :  { %188 = vrot.lane.b32.xlu0 %v1224_v12, %s1105_s21 }
  0x7c   :  { %v124_v13 = vpop.permute.xlu0 %123  ;;  %v1234_v15 = vpop.permute.xlu1 %125 }
  0x7d   :  { %186 = vrot.lane.b32.xlu1 %v1218_v11, %s1105_s21  ;;  %v1240_v16 = vsel %vm119_vm1, %v124_v13, %v1234_v15 }
  0x7e   :  { %184 = vrot.lane.b32.xlu0 %v1232_v14, %s1105_s21 }
  0x80   :  { %v116_v17 = vpop.permute.xlu0 %115  ;;  %v1244_v18 = vpop.permute.xlu1 %117 }
  0x81   :  { %182 = vrot.lane.b32.xlu1 %v1234_v15, %s1105_s21  ;;  %v1250_v19 = vsel %vm119_vm1, %v116_v17, %v1244_v18 }
  0x82   :  { %180 = vrot.lane.b32.xlu0 %v1240_v16, %s1105_s21 }
  0x84   :  { %v109_v20 = vpop.permute.xlu0 %108  ;;  %v1254_v21 = vpop.permute.xlu1 %110 }
  0x85   :  { %178 = vrot.lane.b32.xlu1 %v1244_v18, %s1105_s21  ;;  %v1260_v22 = vsel %vm70_vm2, %v109_v20, %v1254_v21 }
  0x86   :  { %176 = vrot.lane.b32.xlu0 %v1250_v19, %s1105_s21 }
  0x88   :  { %v102_v23 = vpop.permute.xlu0 %101  ;;  %v1264_v24 = vpop.permute.xlu1 %103 }
  0x89   :  { %174 = vrot.lane.b32.xlu1 %v1254_v21, %s1105_s21  ;;  %v1270_v25 = vsel %vm55_vm3, %v102_v23, %v1264_v24 }
  0x8a   :  { %172 = vrot.lane.b32.xlu0 %v1260_v22, %s1105_s21 }
  0x8c   :  { %v95_v26 = vpop.permute.xlu0 %94  ;;  %v1274_v27 = vpop.permute.xlu1 %96 }
  0x8d   :  { %170 = vrot.lane.b32.xlu1 %v1264_v24, %s1105_s21  ;;  %268 = vmatprep.subr.bf16.mxu0 %v1274_v27  ;;  %v1281_v28 = vsel %vm55_vm3, %v95_v26, %v1274_v27 }
  0x8e   :  { %168 = vrot.lane.b32.xlu0 %v1270_v25, %s1105_s21  ;;  %269 = vmatpush1.bf16.msra.mxu0 %v1281_v28 }
  0x8f   :  { %270 = vmatprep.subr.bf16.mxu0 %v1192_v7 }
  0x90   :  { %v146_v29 = vpop.permute.xlu0 %145  ;;  %v1292_v31 = vpop.permute.xlu1 %147 }
  0x91   :  { %166 = vrot.lane.b32.xlu1 %v1274_v27, %s1105_s21  ;;  %v1308_v34 = vsel %vm149_vm5, %v146_v29, %v1292_v31 }
  0x92   :  { %164 = vrot.lane.b32.xlu0 %v1281_v28, %s1105_s21  ;;  %271 = vmatpush1.bf16.msra.mxu0 %v1185_v6 }
  0x93   :  { %272 = vmatprep.subr.bf16.mxu0 %v1178_v5 }
  0x94   :  { %v67_v32 = vpop.permute.xlu0 %66  ;;  %v1302_v33 = vpop.permute.xlu1 %68 }
  0x95   :  { %155 = vrot.lane.b32.xlu1 %v1178_v5, %s1105_s21  ;;  %v1314_v35 = vsel %vm70_vm2, %v67_v32, %v1302_v33 }
  0x96   :  { %153 = vrot.lane.b32.xlu0 %v1171_v4, %s1105_s21  ;;  %273 = vmatpush1.bf16.msra.mxu0 %v1171_v4 }
  0x97   :  { %274 = vmatprep.subr.bf16.mxu0 %v1302_v33 }
  0x98   :  { %v60_v36 = vpop.permute.xlu0 %59  ;;  %v1318_v37 = vpop.permute.xlu1 %61 }
  0x99   :  { %194 = vrot.lane.b32.xlu1 %v1292_v31, %s1105_s21  ;;  %v1325_v38 = vsel %vm55_vm3, %v60_v36, %v1318_v37 }
  0x9a   :  { %192 = vrot.lane.b32.xlu0 %v1308_v34, %s1105_s21  ;;  %275 = vmatpush1.bf16.msra.mxu0 %v1314_v35 }
  0x9b   :  { %276 = vmatprep.subr.bf16.mxu0 %v1318_v37 }
  0x9c   :  { %v396_v39 = vpop.permute.xlu0 %395  ;;  %v398_v40 = vpop.permute.xlu1 %397 }
  0x9d   :  { %376 = vrot.lane.b32.xlu1 %v1149_v2, %s1106_s26  ;;  %v400_v45 = vsel %vm399_vm6, %v396_v39, %v398_v40 }
  0x9e   :  { %374 = vrot.lane.b32.xlu0 %v1137_v0, %s1106_s26  ;;  %277 = vmatpush1.bf16.msra.mxu0 %v1325_v38 }
  0xa0   :  { %v52_v41 = vpop.permute.xlu0 %51  ;;  %v1335_v42 = vpop.permute.xlu1 %53 }
  0xa1   :  { %431 = vrot.lane.b32.xlu1 %v1218_v11, %s1104_s16  ;;  %v1341_v43 = vsel %vm55_vm3, %v52_v41, %v1335_v42  ;;  %278 = vmatprep.subr.bf16.mxu0 %v1335_v42  ;;  %v1483_v41 = vld [vmem:[%s1801_s1 + $0x8] ss:$16 sps:$4 sm:$0xff]  }
  0xa2   :  { %388 = vrot.lane.b32.xlu0 %v1137_v0, %s1108_s5  ;;  %279 = vmatpush1.bf16.msra.mxu0 %v1341_v43 }
  0xa3   :  { %280 = vmatprep.subr.bf16.mxu0 %v1149_v2 }
  0xa4   :  { %v1417_v46 = vpop.permute.xlu1 %162  ;;  %v161_v47 = vpop.permute.xlu0 %160 }
  0xa5   :  { %427 = vrot.lane.b32.xlu1 %v1234_v15, %s1104_s16  ;;  %v1466_v29 = vsel %vm119_vm1, %v161_v47, %v1417_v46 }
  0xa6   :  { %405 = vrot.lane.b32.xlu0 %v1185_v6, %s1104_s16  ;;  %281 = vmatpush1.bf16.msra.mxu0 %v1137_v0 }
  0xa7   :  { %282 = vmatprep.subr.bf16.mxu0 %v1156_v3 }
  0xa9   :  { %390 = vrot.lane.b32.xlu1 %v1149_v2, %s1108_s5 }
  0xaa   :  { %429 = vrot.lane.b32.xlu0 %v1232_v14, %s1104_s16  ;;  %283 = vmatpush1.bf16.msra.mxu0 %v1142_v1 }
  0xad   :  { %423 = vrot.lane.b32.xlu1 %v1244_v18, %s1104_s16 }
  0xae   :  { %425 = vrot.lane.b32.xlu0 %v1240_v16, %s1104_s16 }
  0xb1   :  { %419 = vrot.lane.b32.xlu1 %v398_v40, %s1104_s16 }
  0xb2   :  { %421 = vrot.lane.b32.xlu0 %v1250_v19, %s1104_s16 }
  0xb5   :  { %415 = vrot.lane.b32.xlu1 %v1264_v24, %s1104_s16 }
  0xb6   :  { %417 = vrot.lane.b32.xlu0 %v400_v45, %s1104_s16 }
  0xb9   :  { %411 = vrot.lane.b32.xlu1 %v1274_v27, %s1104_s16 }
  0xba   :  { %413 = vrot.lane.b32.xlu0 %v1270_v25, %s1104_s16 }
  0xbd   :  { %407 = vrot.lane.b32.xlu1 %v1192_v7, %s1104_s16 }
  0xbe   :  { %409 = vrot.lane.b32.xlu0 %v1281_v28, %s1104_s16 }
  0xc1   :  { %383 = vrot.lane.b32.xlu1 %v1192_v7, %s1106_s26 }
  0xc2   :  { %381 = vrot.lane.b32.xlu0 %v1185_v6, %s1106_s26 }
  0xc5   :  { %403 = vrot.lane.b32.xlu1 %v1178_v5, %s1104_s16 }
  0xc6   :  { %401 = vrot.lane.b32.xlu0 %v1171_v4, %s1104_s16 }
  0xc9   :  { %435 = vrot.lane.b32.xlu1 %v1216_v10, %s1104_s16 }
  0xca   :  { %433 = vrot.lane.b32.xlu0 %v1224_v12, %s1104_s16 }
  0xcd   :  { %623 = vrot.lane.b32.xlu1 %v1264_v24, %s1110_s10 }
  0xce   :  { %621 = vrot.lane.b32.xlu0 %v1270_v25, %s1110_s10 }
  0xd1   :  { %619 = vrot.lane.b32.xlu1 %v1274_v27, %s1110_s10 }
  0xd2   :  { %617 = vrot.lane.b32.xlu0 %v1281_v28, %s1110_s10 }
  0xd5   :  { %615 = vrot.lane.b32.xlu1 %v1192_v7, %s1110_s10 }
  0xd6   :  { %613 = vrot.lane.b32.xlu0 %v1185_v6, %s1110_s10 }
  0xd9   :  { %611 = vrot.lane.b32.xlu1 %v1178_v5, %s1110_s10 }
  0xda   :  { %609 = vrot.lane.b32.xlu0 %v1171_v4, %s1110_s10 }
  0xdd   :  { %607 = vrot.lane.b32.xlu1 %v1302_v33, %s1110_s10 }
  0xde   :  { %605 = vrot.lane.b32.xlu0 %v1314_v35, %s1110_s10 }
  0xe1   :  { %779 = vrot.lane.b32.xlu1 %v1192_v7, %s1111_s11 }
  0xe2   :  { %777 = vrot.lane.b32.xlu0 %v1185_v6, %s1111_s11 }
  0xe5   :  { %603 = vrot.lane.b32.xlu1 %v1318_v37, %s1110_s10 }
  0xe6   :  { %601 = vrot.lane.b32.xlu0 %v1325_v38, %s1110_s10 }
  0xe9   :  { %599 = vrot.lane.b32.xlu1 %v1335_v42, %s1110_s10 }
  0xea   :  { %597 = vrot.lane.b32.xlu0 %v1341_v43, %s1110_s10 }
  0xeb   :  { %v191_v48 = vpop.permute.xlu1 %190 }
  0xec   :  { %v189_v49 = vpop.permute.xlu0 %188  ;;  %321 = vmatprep.subr.bf16.mxu1 %v191_v48 }
  0xed   :  { %595 = vrot.lane.b32.xlu1 %v1149_v2, %s1110_s10  ;;  %v203_v50 = vsel %vm119_vm1, %v189_v49, %v191_v48  ;;  %v1491_v48 = vld [vmem:[%s1801_s1 + $0x2c] ss:$16 sps:$4 sm:$0xff]  }
  0xee   :  { %593 = vrot.lane.b32.xlu0 %v1137_v0, %s1110_s10  ;;  %322 = vmatpush1.bf16.msra.mxu1 %v203_v50 }
  0xef   :  { %v187_v51 = vpop.permute.xlu1 %186 }
  0xf0   :  { %v185_v52 = vpop.permute.xlu0 %184  ;;  %323 = vmatprep.subr.bf16.mxu1 %v187_v51 }
  0xf1   :  { %587 = vrot.lane.b32.xlu1 %v1156_v3, %s1110_s10  ;;  %v202_v53 = vsel %vm119_vm1, %v185_v52, %v187_v51  ;;  %v1505_v51 = vld [vmem:[%s1801_s1 + $0x28] ss:$16 sps:$4 sm:$0xff]  }
  0xf2   :  { %585 = vrot.lane.b32.xlu0 %v1142_v1, %s1110_s10  ;;  %324 = vmatpush1.bf16.msra.mxu1 %v202_v53 }
  0xf3   :  { %v183_v54 = vpop.permute.xlu1 %182 }
  0xf4   :  { %v181_v55 = vpop.permute.xlu0 %180  ;;  %325 = vmatprep.subr.bf16.mxu1 %v183_v54 }
  0xf5   :  { %627 = vrot.lane.b32.xlu1 %v1254_v21, %s1110_s10  ;;  %v201_v56 = vsel %vm119_vm1, %v181_v55, %v183_v54 }
  0xf6   :  { %625 = vrot.lane.b32.xlu0 %v1260_v22, %s1110_s10  ;;  %326 = vmatpush1.bf16.msra.mxu1 %v201_v56 }
  0xf7   :  { %v179_v57 = vpop.permute.xlu1 %178 }
  0xf8   :  { %v177_v58 = vpop.permute.xlu0 %176  ;;  %327 = vmatprep.subr.bf16.mxu1 %v179_v57 }
  0xf9   :  { %580 = vrot.lane.b32.xlu1 %v1178_v5, %s1108_s5  ;;  %v200_v59 = vsel %vm119_vm1, %v177_v58, %v179_v57 }
  0xfa   :  { %578 = vrot.lane.b32.xlu0 %v1171_v4, %s1108_s5  ;;  %328 = vmatpush1.bf16.msra.mxu1 %v200_v59 }
  0xfb   :  { %v175_v60 = vpop.permute.xlu1 %174 }
  0xfc   :  { %v173_v61 = vpop.permute.xlu0 %172  ;;  %329 = vmatprep.subr.bf16.mxu1 %v175_v60 }
  0xfd   :  { %813 = vrot.lane.b32.xlu1 %v1274_v27, %s1112_s12  ;;  %v199_v62 = vsel %vm119_vm1, %v173_v61, %v175_v60  ;;  %v1531_v61 = vld [vmem:[%s1801_s1] ss:$16 sps:$4 sm:$0xff]  }
  0xfe   :  { %811 = vrot.lane.b32.xlu0 %v1281_v28, %s1112_s12  ;;  %330 = vmatpush1.bf16.msra.mxu1 %v199_v62  ;;  %v1539_v62 = vld [vmem:[%s1801_s1 + $0x24] ss:$16 sps:$4 sm:$0xff]  }
  0xff   :  { %v171_v63 = vpop.permute.xlu1 %170 }
 0x100   :  { %v169_v8 = vpop.permute.xlu0 %168  ;;  %331 = vmatprep.subr.bf16.mxu1 %v171_v63 }
 0x101   :  { %v198_v9 = vsel %vm119_vm1, %v169_v8, %v171_v63  ;;  %809 = vrot.lane.b32.xlu1 %v1192_v7, %s1112_s12 }
 0x102   :  { %332 = vmatpush1.bf16.msra.mxu1 %v198_v9  ;;  %807 = vrot.lane.b32.xlu0 %v1185_v6, %s1112_s12 }
 0x103   :  { %v167_v13 = vpop.permute.xlu1 %166 }
 0x104   :  { %v165_v17 = vpop.permute.xlu0 %164  ;;  %333 = vmatprep.subr.bf16.mxu1 %v167_v13 }
 0x105   :  { %v197_v20 = vsel %vm119_vm1, %v165_v17, %v167_v13  ;;  %772 = vrot.lane.b32.xlu1 %v1192_v7, %s1108_s5  ;;  %v1550_v17 = vld [vmem:[%s1801_s1 + $0x20] ss:$16 sps:$4 sm:$0xff]  }
 0x106   :  { %334 = vmatpush1.bf16.msra.mxu1 %v197_v20  ;;  %770 = vrot.lane.b32.xlu0 %v1185_v6, %s1108_s5 }
 0x107   :  { %335 = vmatprep.subr.bf16.mxu1 %v1417_v46  ;;  %v1461_v23 = vpop.permute.xlu1 %155 }
 0x108   :  { %v154_v26 = vpop.permute.xlu0 %153  ;;  %284 = vmatprep.subr.bf16.mxu0 %v1461_v23 }
 0x109   :  { %v1470_v32 = vsel %vm119_vm1, %v154_v26, %v1461_v23  ;;  %805 = vrot.lane.b32.xlu1 %v1178_v5, %s1112_s12 }
 0x10a   :  { %285 = vmatpush2.bf16.msra.mxu0 %v1470_v32  ;;  %336 = vmatpush1.bf16.msra.mxu1 %v1466_v29 }
 0x10b   :  { %286 = vmatprep.subr.bf16.mxu0 %v1292_v31  ;;  %v195_v36 = vpop.permute.xlu1 %194  ;;  %803 = vrot.lane.b32.xlu0 %v1171_v4, %s1112_s12 }
 0x10c   :  { %v193_v39 = vpop.permute.xlu0 %192  ;;  %351 = vmatprep.subr.bf16.mxu1 %v195_v36 }
 0x10d   :  { %v204_v40 = vsel %vm119_vm1, %v193_v39, %v195_v36 }
 0x10e   :  { %287 = vmatpush2.bf16.msra.mxu0 %v1308_v34  ;;  %352 = vmatpush2.bf16.msra.mxu1 %v204_v40 }
 0x10f   :  { %288 = vmatprep.subr.bf16.mxu0 %v1216_v10  ;;  %464 = vmatprep.subr.bf16.mxu1 %v1264_v24  ;;  %v377_v45 = vpop.permute.xlu1 %376 }
 0x110   :  { %v375_v47 = vpop.permute.xlu0 %374 }
 0x111   :  { %354 = vmatmul.mubr.bf16.vlgmr.msra.gmra.mxu1 %v1483_v41  ;;  %v378_v56 = vsel %vm70_vm2, %v375_v47, %v377_v45 }
 0x112   :  { %289 = vmatpush2.bf16.msra.mxu0 %v1224_v12  ;;  %465 = vmatpush1.bf16.msra.mxu1 %v1270_v25 }
 0x113   :  { %290 = vmatprep.subr.bf16.mxu0 %v1218_v11  ;;  %466 = vmatprep.subr.bf16.mxu1 %v1274_v27  ;;  %v432_v49 = vpop.permute.xlu1 %431 }
 0x114   :  { %v1498_v50 = vpop.permute.xlu0 %388  ;;  %1053 = vmatprep.mubr.msk.bf16.mxu1 %vm261_vm4, %v1491_v48 }
 0x116   :  { %291 = vmatpush2.bf16.msra.mxu0 %v1232_v14  ;;  %467 = vmatpush1.bf16.msra.mxu1 %v1281_v28 }
 0x117   :  { %292 = vmatprep.subr.bf16.mxu0 %v1234_v15  ;;  %v428_v52 = vpop.permute.xlu1 %427  ;;  %468 = vmatprep.subr.bf16.mxu1 %v1192_v7 }
 0x118   :  { %v1511_v53 = vpop.permute.xlu0 %405 }
 0x119   :  { %364 = vmatmul.mubr.bf16.gmra.mxu1 %v1505_v51 }
 0x11a   :  { %293 = vmatpush2.bf16.msra.mxu0 %v1240_v16  ;;  %469 = vmatpush1.bf16.msra.mxu1 %v1185_v6 }
 0x11b   :  { %294 = vmatprep.subr.bf16.mxu0 %v1244_v18  ;;  %470 = vmatprep.subr.bf16.mxu1 %v377_v45  ;;  %v1517_v54 = vpop.permute.xlu1 %390 }
 0x11c   :  { %v430_v55 = vpop.permute.xlu0 %429  ;;  %496 = vmatprep.mubr.bf16.mxu1 %v1355_v44  ;;  %v1568_v47 = vsel %vm149_vm5, %v1498_v50, %v1517_v54 }
 0x11d   :  { %v444_v63 = vsel %vm134_vm0, %v430_v55, %v432_v49 }
 0x11e   :  { %295 = vmatpush2.bf16.msra.mxu0 %v1250_v19  ;;  %471 = vmatpush1.bf16.msra.mxu1 %v378_v56 }
 0x11f   :  { %296 = vmatprep.subr.bf16.mxu0 %v1254_v21  ;;  %472 = vmatprep.subr.bf16.mxu1 %v1302_v33  ;;  %v424_v57 = vpop.permute.xlu1 %423 }
 0x120   :  { %v426_v58 = vpop.permute.xlu0 %425 }
 0x121   :  { %v443_v13 = vsel %vm134_vm0, %v426_v58, %v428_v52 }
 0x122   :  { %297 = vmatpush2.bf16.msra.mxu0 %v1260_v22  ;;  %473 = vmatpush1.bf16.msra.mxu1 %v1314_v35 }
 0x123   :  { %298 = vmatprep.subr.bf16.mxu0 %v1264_v24  ;;  %474 = vmatprep.subr.bf16.mxu1 %v1318_v37  ;;  %v420_v59 = vpop.permute.xlu1 %419 }
 0x124   :  { %v422_v60 = vpop.permute.xlu0 %421 }
 0x125   :  { %v442_v36 = vsel %vm134_vm0, %v422_v60, %v424_v57 }
 0x126   :  { %299 = vmatpush2.bf16.msra.mxu0 %v1270_v25  ;;  %475 = vmatpush1.bf16.msra.mxu1 %v1325_v38 }
 0x127   :  { %476 = vmatprep.subr.bf16.mxu1 %v1335_v42  ;;  %517 = vmatprep.subr.bf16.mxu0 %v432_v49  ;;  %v416_v33 = vpop.permute.xlu1 %415 }
 0x128   :  { %v418_v35 = vpop.permute.xlu0 %417 }
 0x129   :  { %301 = vmatmul.mubr.bf16.vlgmr.msra.gmra.mxu0 %v1531_v61  ;;  %v441_v45 = vsel %vm134_vm0, %v418_v35, %v420_v59 }
 0x12a   :  { %477 = vmatpush1.bf16.msra.mxu1 %v1341_v43  ;;  %518 = vmatpush1.bf16.msra.mxu0 %v444_v63 }
 0x12b   :  { %519 = vmatprep.subr.bf16.mxu0 %v428_v52  ;;  %v412_v8 = vpop.permute.xlu1 %411  ;;  %478 = vmatprep.subr.bf16.mxu1 %v1149_v2 }
 0x12c   :  { %v414_v9 = vpop.permute.xlu0 %413  ;;  %310 = vmatprep.mubr.bf16.mxu0 %v1539_v62 }
 0x12d   :  { %v440_v55 = vsel %vm134_vm0, %v414_v9, %v416_v33 }
 0x12e   :  { %479 = vmatpush1.bf16.msra.mxu1 %v1137_v0  ;;  %520 = vmatpush1.bf16.msra.mxu0 %v443_v13 }
 0x12f   :  { %480 = vmatprep.subr.bf16.mxu1 %v1417_v46  ;;  %521 = vmatprep.subr.bf16.mxu0 %v424_v57  ;;  %v1554_v20 = vpop.permute.xlu1 %407 }
 0x130   :  { %v410_v26 = vpop.permute.xlu0 %409  ;;  %v1584_v60 = vsel %vm134_vm0, %v1511_v53, %v1554_v20 }
 0x131   :  { %311 = vmatmul.mubr.bf16.gmra.mxu0 %v1550_v17  ;;  %v439_v57 = vsel %vm134_vm0, %v410_v26, %v412_v8 }
 0x132   :  { %481 = vmatpush2.bf16.msra.mxu1 %v1466_v29  ;;  %522 = vmatpush1.bf16.msra.mxu0 %v442_v36 }
 0x133   :  { %482 = vmatprep.subr.bf16.mxu1 %v1517_v54  ;;  %523 = vmatprep.subr.bf16.mxu0 %v420_v59  ;;  %v1560_v39 = vpop.permute.xlu1 %383 }
 0x134   :  { %v382_v40 = vpop.permute.xlu0 %381  ;;  %1054 = vmatprep.mubr.msk.bf16.mxu0 %vm261_vm4, %v1288_v30 }
 0x135   :  { %v1599_v9 = vsel %vm70_vm2, %v382_v40, %v1560_v39 }
 0x136   :  { %483 = vmatpush2.bf16.msra.mxu1 %v1568_v47  ;;  %524 = vmatpush1.bf16.msra.mxu0 %v441_v45 }
 0x137   :  { %484 = vmatprep.subr.bf16.mxu1 %v1292_v31  ;;  %525 = vmatprep.subr.bf16.mxu0 %v416_v33  ;;  %v1572_v49 = vpop.permute.xlu1 %403 }
 0x138   :  { %v402_v52 = vpop.permute.xlu0 %401 }
 0x139   :  { %v1592_v63 = vsel %vm134_vm0, %v402_v52, %v1572_v49 }
 0x13a   :  { %485 = vmatpush2.bf16.msra.mxu1 %v1308_v34  ;;  %526 = vmatpush1.bf16.msra.mxu0 %v440_v55 }
 0x13b   :  { %486 = vmatprep.subr.bf16.mxu1 %v1216_v10  ;;  %527 = vmatprep.subr.bf16.mxu0 %v412_v8  ;;  %v436_v56 = vpop.permute.xlu1 %435 }
 0x13c   :  { %v434_v50 = vpop.permute.xlu0 %433 }
 0x13d   :  { %v445_v13 = vsel %vm134_vm0, %v434_v50, %v436_v56 }
 0x13e   :  { %487 = vmatpush2.bf16.msra.mxu1 %v1224_v12  ;;  %528 = vmatpush1.bf16.msra.mxu0 %v439_v57 }
 0x13f   :  { %488 = vmatprep.subr.bf16.mxu1 %v1218_v11  ;;  %529 = vmatprep.subr.bf16.mxu0 %v1554_v20  ;;  %v624_v58 = vpop.permute.xlu1 %623 }
 0x140   :  { %v622_v59 = vpop.permute.xlu0 %621 }
 0x141   :  { %v636_v52 = vsel %vm589_vm7, %v622_v59, %v624_v58 }
 0x142   :  { %489 = vmatpush2.bf16.msra.mxu1 %v1232_v14  ;;  %530 = vmatpush1.bf16.msra.mxu0 %v1584_v60 }
 0x143   :  { %490 = vmatprep.subr.bf16.mxu1 %v1234_v15  ;;  %531 = vmatprep.subr.bf16.mxu0 %v1572_v49  ;;  %v620_v33 = vpop.permute.xlu1 %619 }
 0x144   :  { %v618_v35 = vpop.permute.xlu0 %617 }
 0x145   :  { %v635_v50 = vsel %vm589_vm7, %v618_v35, %v620_v33 }
 0x146   :  { %491 = vmatpush2.bf16.msra.mxu1 %v1240_v16  ;;  %532 = vmatpush1.bf16.msra.mxu0 %v1592_v63 }
 0x147   :  { %492 = vmatprep.subr.bf16.mxu1 %v1560_v39  ;;  %547 = vmatprep.subr.bf16.mxu0 %v436_v56  ;;  %v616_v53 = vpop.permute.xlu1 %615 }
 0x148   :  { %v614_v8 = vpop.permute.xlu0 %613 }
 0x149   :  { %v634_v59 = vsel %vm589_vm7, %v614_v8, %v616_v53 }
 0x14a   :  { %493 = vmatpush2.bf16.msra.mxu1 %v1599_v9  ;;  %548 = vmatpush2.bf16.msra.mxu0 %v445_v13 }
 0x14b   :  { %494 = vmatprep.subr.bf16.mxu1 %v1254_v21  ;;  %656 = vmatprep.subr.bf16.mxu0 %v1218_v11  ;;  %v612_v26 = vpop.permute.xlu1 %611 }
 0x14c   :  { %v610_v36 = vpop.permute.xlu0 %609 }
 0x14d   :  { %550 = vmatmul.mubr.bf16.vlgmr.msra.gmra.mxu0 %v1483_v41  ;;  %v633_v35 = vsel %vm589_vm7, %v610_v36, %v612_v26 }
 0x14e   :  { %495 = vmatpush2.bf16.msra.mxu1 %v1260_v22  ;;  %657 = vmatpush1.bf16.msra.mxu0 %v1232_v14 }
 0x14f   :  { %658 = vmatprep.subr.bf16.mxu0 %v1234_v15  ;;  %709 = vmatprep.subr.bf16.mxu1 %v624_v58  ;;  %v608_v40 = vpop.permute.xlu1 %607 }
 0x150   :  { %v606_v45 = vpop.permute.xlu0 %605  ;;  %1055 = vmatprep.mubr.msk.bf16.mxu0 %vm261_vm4, %v1491_v48 }
 0x151   :  { %497 = vmatmul.mubr.bf16.vlgmr.msra.gmra.mxu1 %v1531_v61 }
 0x152   :  { %659 = vmatpush1.bf16.msra.mxu0 %v1240_v16  ;;  %710 = vmatpush1.bf16.msra.mxu1 %v636_v52 }
 0x153   :  { %660 = vmatprep.subr.bf16.mxu0 %v1244_v18  ;;  %711 = vmatprep.subr.bf16.mxu1 %v620_v33  ;;  %v780_v55 = vpop.permute.xlu1 %779 }
 0x154   :  { %v778_v56 = vpop.permute.xlu0 %777  ;;  %506 = vmatprep.mubr.bf16.mxu1 %v1539_v62 }
 0x155   :  { %v782_v57 = vsel %vm781_vm8, %v778_v56, %v780_v55  ;;  %799 = vrot.lane.b32.xlu0 %v778_v56, %s1112_s12  ;;  %560 = vmatmul.mubr.bf16.gmra.mxu0 %v1505_v51 }
 0x156   :  { %661 = vmatpush1.bf16.msra.mxu0 %v1250_v19  ;;  %712 = vmatpush1.bf16.msra.mxu1 %v635_v50 }
 0x157   :  { %801 = vrot.lane.b32.xlu1 %v782_v57, %s1112_s12  ;;  %662 = vmatprep.subr.bf16.mxu0 %v1254_v21  ;;  %v604_v18 = vpop.permute.xlu1 %603 }
 0x158   :  { %713 = vmatprep.subr.bf16.mxu1 %v616_v53  ;;  %v602_v58 = vpop.permute.xlu0 %601  ;;  %688 = vmatprep.mubr.bf16.mxu0 %v1355_v44  ;;  %v632_v53 = vsel %vm589_vm7, %v606_v45, %v608_v40 }
 0x159   :  { %795 = vrot.lane.b32.xlu0 %v1325_v38, %s1112_s12  ;;  %507 = vmatmul.mubr.bf16.gmra.mxu1 %v1550_v17  ;;  %v631_v8 = vsel %vm589_vm7, %v602_v58, %v604_v18 }
 0x15a   :  { %663 = vmatpush1.bf16.msra.mxu0 %v1260_v22  ;;  %714 = vmatpush1.bf16.msra.mxu1 %v634_v59 }
 0x15b   :  { %797 = vrot.lane.b32.xlu1 %v1318_v37, %s1112_s12  ;;  %664 = vmatprep.subr.bf16.mxu0 %v1264_v24  ;;  %v600_v19 = vpop.permute.xlu1 %599 }
 0x15c   :  { %715 = vmatprep.subr.bf16.mxu1 %v612_v26  ;;  %v598_v33 = vpop.permute.xlu0 %597  ;;  %1056 = vmatprep.mubr.msk.bf16.mxu1 %vm261_vm4, %v1288_v30 }
 0x15d   :  { %791 = vrot.lane.b32.xlu0 %v1341_v43, %s1112_s12 }
 0x15e   :  { %665 = vmatpush1.bf16.msra.mxu0 %v1270_v25  ;;  %716 = vmatpush1.bf16.msra.mxu1 %v633_v35 }
 0x15f   :  { %793 = vrot.lane.b32.xlu1 %v1335_v42, %s1112_s12  ;;  %666 = vmatprep.subr.bf16.mxu0 %v1274_v27  ;;  %v1640_v37 = vpop.permute.xlu1 %595 }
 0x160   :  { %717 = vmatprep.subr.bf16.mxu1 %v608_v40  ;;  %v594_v38 = vpop.permute.xlu0 %593 }
 0x161   :  { %787 = vrot.lane.b32.xlu0 %v1137_v0, %s1112_s12 }
 0x162   :  { %667 = vmatpush1.bf16.msra.mxu0 %v1281_v28  ;;  %718 = vmatpush1.bf16.msra.mxu1 %v632_v53 }
 0x163   :  { %789 = vrot.lane.b32.xlu1 %v1149_v2, %s1112_s12  ;;  %719 = vmatprep.subr.bf16.mxu1 %v604_v18  ;;  %v588_v43 = vpop.permute.xlu1 %587  ;;  %v630_v2 = vsel %vm589_vm7, %v598_v33, %v600_v19 }
 0x164   :  { %v586_v42 = vpop.permute.xlu0 %585  ;;  %668 = vmatprep.subr.bf16.mxu0 %v1192_v7 }
 0x165   :  { %783 = vrot.lane.b32.xlu0 %v1142_v1, %s1112_s12  ;;  %v1662_v1 = vsel %vm589_vm7, %v594_v38, %v1640_v37  ;;  %v590_v26 = vsel %vm589_vm7, %v586_v42, %v588_v43 }
 0x166   :  { %669 = vmatpush1.bf16.msra.mxu0 %v1185_v6  ;;  %720 = vmatpush1.bf16.msra.mxu1 %v631_v8 }
 0x167   :  { %785 = vrot.lane.b32.xlu1 %v1156_v3, %s1112_s12  ;;  %721 = vmatprep.subr.bf16.mxu1 %v600_v19  ;;  %v628_v0 = vpop.permute.xlu1 %627 }
 0x168   :  { %v626_v13 = vpop.permute.xlu0 %625  ;;  %670 = vmatprep.subr.bf16.mxu0 %v1178_v5 }
 0x169   :  { %815 = vrot.lane.b32.xlu0 %v1270_v25, %s1112_s12  ;;  %v637_v36 = vsel %vm589_vm7, %v626_v13, %v628_v0 }
 0x16a   :  { %671 = vmatpush1.bf16.msra.mxu0 %v1171_v4  ;;  %722 = vmatpush1.bf16.msra.mxu1 %v630_v2 }
 0x16b   :  { %817 = vrot.lane.b32.xlu1 %v1264_v24, %s1112_s12  ;;  %672 = vmatprep.subr.bf16.mxu0 %v588_v43  ;;  %v1668_v3 = vpop.permute.xlu1 %580 }
 0x16c   :  { %723 = vmatprep.subr.bf16.mxu1 %v1640_v37  ;;  %v579_v5 = vpop.permute.xlu0 %578 }
 0x16d   :  { %v1673_v4 = vsel %vm149_vm5, %v579_v5, %v1668_v3 }
 0x16e   :  { %673 = vmatpush2.bf16.msra.mxu0 %v590_v26  ;;  %724 = vmatpush1.bf16.msra.mxu1 %v1662_v1 }
 0x16f   :  { %739 = vmatprep.subr.bf16.mxu1 %v628_v0  ;;  %674 = vmatprep.subr.bf16.mxu0 %v1668_v3 }
 0x170   :  { %v812_v40 = vpop.permute.xlu0 %811 }
 0x172   :  { %675 = vmatpush2.bf16.msra.mxu0 %v1673_v4  ;;  %740 = vmatpush2.bf16.msra.mxu1 %v637_v36 }
 0x173   :  { %676 = vmatprep.subr.bf16.mxu0 %v1554_v20  ;;  %847 = vmatprep.subr.bf16.mxu1 %v1216_v10 }
 0x175   :  { %742 = vmatmul.mubr.bf16.vlgmr.msra.gmra.mxu1 %v1483_v41 }
 0x176   :  { %677 = vmatpush2.bf16.msra.mxu0 %v1584_v60  ;;  %848 = vmatpush1.bf16.msra.mxu1 %v1224_v12 }
 0x177   :  { %678 = vmatprep.subr.bf16.mxu0 %v1572_v49  ;;  %849 = vmatprep.subr.bf16.mxu1 %v1218_v11  ;;  %v814_v11 = vpop.permute.xlu1 %813 }
 0x178   :  { %1057 = vmatprep.mubr.msk.bf16.mxu1 %vm261_vm4, %v1491_v48 }
 0x17a   :  { %679 = vmatpush2.bf16.msra.mxu0 %v1592_v63  ;;  %850 = vmatpush1.bf16.msra.mxu1 %v1232_v14  ;;  %v808_v14 = vpop.permute.xlu0 %807 }
 0x17b   :  { %680 = vmatprep.subr.bf16.mxu0 %v1417_v46  ;;  %851 = vmatprep.subr.bf16.mxu1 %v1234_v15  ;;  %v810_v15 = vpop.permute.xlu1 %809 }
 0x17d   :  { %752 = vmatmul.mubr.bf16.gmra.mxu1 %v1505_v51 }
 0x17e   :  { %681 = vmatpush2.bf16.msra.mxu0 %v1466_v29  ;;  %852 = vmatpush1.bf16.msra.mxu1 %v1240_v16  ;;  %v771_v16 = vpop.permute.xlu0 %770 }
 0x17f   :  { %682 = vmatprep.subr.bf16.mxu0 %v1461_v23  ;;  %853 = vmatprep.subr.bf16.mxu1 %v1560_v39 }
 0x180   :  { %879 = vmatprep.mubr.bf16.mxu1 %v1355_v44  ;;  %v827_v44 = vsel %vm819_vm9, %v812_v40, %v814_v11 }
 0x182   :  { %683 = vmatpush2.bf16.msra.mxu0 %v1470_v32  ;;  %854 = vmatpush1.bf16.msra.mxu1 %v1599_v9 }
 0x183   :  { %684 = vmatprep.subr.bf16.mxu0 %v1292_v31  ;;  %855 = vmatprep.subr.bf16.mxu1 %v1254_v21  ;;  %v773_v21 = vpop.permute.xlu1 %772 }
 0x186   :  { %685 = vmatpush2.bf16.msra.mxu0 %v1308_v34  ;;  %856 = vmatpush1.bf16.msra.mxu1 %v1260_v22 }
 0x187   :  { %686 = vmatprep.subr.bf16.mxu0 %v1216_v10  ;;  %857 = vmatprep.subr.bf16.mxu1 %v1264_v24  ;;  %v826_v10 = vsel %vm819_vm9, %v808_v14, %v810_v15  ;;  %v806_v22 = vpop.permute.xlu1 %805 }
 0x18a   :  { %687 = vmatpush2.bf16.msra.mxu0 %v1224_v12  ;;  %858 = vmatpush1.bf16.msra.mxu1 %v1270_v25  ;;  %v804_v12 = vpop.permute.xlu0 %803  ;;  %v961_v25 = vld [vmem:[%s1802_s2] sm:$0xff] }
 0x18b   :  { %859 = vmatprep.subr.bf16.mxu1 %v1274_v27  ;;  %900 = vmatprep.subr.bf16.mxu0 %v814_v11  ;;  %v825_v24 = vsel %vm819_vm9, %v804_v12, %v806_v22  ;;  %v962_v27 = vld [vmem:[%s1802_s2 + $0x8] sm:$0xff] }
 0x18d   :  { %689 = vmatmul.mubr.bf16.vlgmr.msra.gmra.mxu0 %v1531_v61 }
 0x18e   :  { %860 = vmatpush1.bf16.msra.mxu1 %v1281_v28  ;;  %901 = vmatpush1.bf16.msra.mxu0 %v827_v44  ;;  %v963_v28 = vld [vmem:[%s1802_s2 + $0x10] sm:$0xff] }
 0x18f   :  { %861 = vmatprep.subr.bf16.mxu1 %v1192_v7  ;;  %698 = vmatprep.mubr.bf16.mxu0 %v1539_v62  ;;  %v774_v7 = vsel %vm149_vm5, %v771_v16, %v773_v21 }
 0x190   :  { %902 = vmatprep.subr.bf16.mxu0 %v810_v15 }
 0x192   :  { %862 = vmatpush1.bf16.msra.mxu1 %v1185_v6  ;;  %903 = vmatpush1.bf16.msra.mxu0 %v826_v10  ;;  %v1113_v6 = vmov 0  }
 0x193   :  { %863 = vmatprep.subr.bf16.mxu1 %v1640_v37  ;;  %904 = vmatprep.subr.bf16.mxu0 %v806_v22 }
 0x194   :  { %1078 = vset.pattern.permute.xlu0 %v1113_v6  ;;  %1079 = vset.pattern.permute.xlu1 %v1113_v6 }
 0x195   :  { %699 = vmatmul.mubr.bf16.gmra.mxu0 %v1550_v17  ;;  %967 = vperm.xlu0 %1078, %v961_v25  }
 0x196   :  { %864 = vmatpush2.bf16.msra.mxu1 %v1662_v1  ;;  %905 = vmatpush1.bf16.msra.mxu0 %v825_v24 }
 0x197   :  { %865 = vmatprep.subr.bf16.mxu1 %v773_v21  ;;  %1058 = vmatprep.mubr.msk.bf16.mxu0 %vm261_vm4, %v1288_v30  ;;  %v964_v30 = vld [vmem:[%s1802_s2 + $0x18] sm:$0xff] }
 0x198   :  { %972 = vperm.xlu1 %1079, %v962_v27  }
 0x199   :  { %982 = vperm.xlu0 %1078, %v964_v30  }
 0x19a   :  { %866 = vmatpush2.bf16.msra.mxu1 %v774_v7 }
 0x19b   :  { %867 = vmatprep.subr.bf16.mxu1 %v1668_v3 }
 0x19c   :  { %977 = vperm.xlu1 %1079, %v963_v28  }
 0x19e   :  { %868 = vmatpush2.bf16.msra.mxu1 %v1673_v4 }
 0x19f   :  { %869 = vmatprep.subr.bf16.mxu1 %v1554_v20 }
 0x1a2   :  { %870 = vmatpush2.bf16.msra.mxu1 %v1584_v60 }
 0x1a3   :  { %871 = vmatprep.subr.bf16.mxu1 %v1572_v49 }
 0x1a6   :  { %872 = vmatpush2.bf16.msra.mxu1 %v1592_v63 }
 0x1a7   :  { %873 = vmatprep.subr.bf16.mxu1 %v1417_v46 }
 0x1aa   :  { %874 = vmatpush2.bf16.msra.mxu1 %v1466_v29 }
 0x1ab   :  { %875 = vmatprep.subr.bf16.mxu1 %v1517_v54 }
 0x1ae   :  { %876 = vmatpush2.bf16.msra.mxu1 %v1568_v47 }
 0x1af   :  { %877 = vmatprep.subr.bf16.mxu1 %v1292_v31 }
 0x1b2   :  { %878 = vmatpush2.bf16.msra.mxu1 %v1308_v34 }
 0x1b5   :  { %880 = vmatmul.mubr.bf16.vlgmr.msra.gmra.mxu1 %v1531_v61 }
 0x1b6   :  { %889 = vmatprep.mubr.bf16.mxu1 %v1539_v62 }
 0x1bd   :  { %890 = vmatmul.mubr.bf16.gmra.mxu1 %v1550_v17 }
 0x1c7   :  { %v800_v23 = vpop.permute.xlu0 %799 }
 0x1c9   :  { %v802_v32 = vpop.permute.xlu1 %801 }
 0x1ca   :  { %v824_v46 = vsel %vm819_vm9, %v800_v23, %v802_v32  ;;  %906 = vmatprep.subr.bf16.mxu0 %v802_v32 }
 0x1cb   :  { %907 = vmatpush1.bf16.msra.mxu0 %v824_v46  ;;  %v796_v29 = vpop.permute.xlu0 %795 }
 0x1cd   :  { %v798_v54 = vpop.permute.xlu1 %797 }
 0x1ce   :  { %v823_v20 = vsel %vm819_vm9, %v796_v29, %v798_v54  ;;  %908 = vmatprep.subr.bf16.mxu0 %v798_v54 }
 0x1cf   :  { %909 = vmatpush1.bf16.msra.mxu0 %v823_v20  ;;  %v792_v31 = vpop.permute.xlu0 %791 }
 0x1d1   :  { %v794_v34 = vpop.permute.xlu1 %793  ;;  %v355_v52 = vpop.f32.mrf.mxu1 }
 0x1d2   :  { %v822_v61 = vsel %vm819_vm9, %v792_v31, %v794_v34  ;;  %910 = vmatprep.subr.bf16.mxu0 %v794_v34 }
 0x1d3   :  { %911 = vmatpush1.bf16.msra.mxu0 %v822_v61  ;;  %v788_v62 = vpop.permute.xlu0 %787  ;;  %v357_v55 = vpop.f32.mrf.mxu1 }
 0x1d5   :  { %v790_v17 = vpop.permute.xlu1 %789  ;;  %v359_v56 = vpop.f32.mrf.mxu1 }
 0x1d6   :  { %v821_v39 = vsel %vm819_vm9, %v788_v62, %v790_v17  ;;  %912 = vmatprep.subr.bf16.mxu0 %v790_v17 }
 0x1d7   :  { %913 = vmatpush1.bf16.msra.mxu0 %v821_v39  ;;  %v784_v47 = vpop.permute.xlu0 %783  ;;  %v361_v50 = vpop.f32.mrf.mxu1 }
 0x1d9   :  { %v786_v49 = vpop.permute.xlu1 %785  ;;  %v365_v18 = vpop.f32.mrf.mxu1 }
 0x1da   :  { %v820_v60 = vsel %vm819_vm9, %v784_v47, %v786_v49  ;;  %914 = vmatprep.subr.bf16.mxu0 %v786_v49 }
 0x1db   :  { %915 = vmatpush1.bf16.msra.mxu0 %v820_v60  ;;  %v816_v63 = vpop.permute.xlu0 %815  ;;  %v1759_v59 = vpop.f32.mrf.mxu1 }
 0x1dc   :  { %1804 = vst [vmem:[#allocation2_spill] sm:$0xff] %v1759_v59 }
 0x1dd   :  { %v818_v9 = vpop.permute.xlu1 %817  ;;  %v1761_v33 = vpop.f32.mrf.mxu1 }
 0x1de   :  { %v828_v45 = vsel %vm819_vm9, %v816_v63, %v818_v9  ;;  %930 = vmatprep.subr.bf16.mxu0 %v818_v9  ;;  %1805 = vst [vmem:[#allocation3_spill] sm:$0xff] %v1761_v33 }
 0x1df   :  { %931 = vmatpush2.bf16.msra.mxu0 %v828_v45  ;;  %v371_v37 = vpop.f32.mrf.mxu1 }
 0x1e2   :  { %933 = vmatmul.mubr.bf16.vlgmr.msra.gmra.mxu0 %v1483_v41 }
 0x1e3   :  { %1059 = vmatprep.mubr.msk.bf16.mxu0 %vm261_vm4, %v1491_v48 }
 0x1e9   :  { %v302_v57 = vpop.f32.mrf.mxu0 }
 0x1ea   :  { %943 = vmatmul.mubr.bf16.gmra.mxu0 %v1505_v51  ;;  %v356_v20 = vadd.f32 %v355_v52, %v302_v57  ;;  %v1809_v52 = vld [vmem:[#allocation2_spill] sm:$0xff] }
 0x1eb   :  { %v304_v58 = vpop.f32.mrf.mxu0 }
 0x1ec   :  { %v358_v61 = vadd.f32 %v357_v55, %v304_v58 }
 0x1ed   :  { %v306_v19 = vpop.f32.mrf.mxu0 }
 0x1ee   :  { %v360_v39 = vadd.f32 %v359_v56, %v306_v19 }
 0x1ef   :  { %v308_v35 = vpop.f32.mrf.mxu0 }
 0x1f0   :  { %v362_v63 = vadd.f32 %v361_v50, %v308_v35 }
 0x1f1   :  { %v312_v41 = vpop.f32.mrf.mxu0 }
 0x1f2   :  { %v366_v9 = vadd.f32 %v365_v18, %v312_v41 }
 0x1f3   :  { %v314_v53 = vpop.f32.mrf.mxu0 }
 0x1f4   :  { %v368_v57 = vadd.f32 %v1809_v52, %v314_v53 }
 0x1f5   :  { %v316_v43 = vpop.f32.mrf.mxu0 }
 0x1f7   :  { %v318_v42 = vpop.f32.mrf.mxu0 }
 0x1f8   :  { %v372_v58 = vadd.f32 %v371_v37, %v318_v42 }
 0x20d   :  { %v551_v0 = vpop.f32.mrf.mxu0 }
 0x20f   :  { %v553_v2 = vpop.f32.mrf.mxu0 }
 0x211   :  { %v498_v38 = vpop.f32.mrf.mxu1  ;;  %v555_v26 = vpop.f32.mrf.mxu0 }
 0x212   :  { %v552_v54 = vadd.f32 %v551_v0, %v498_v38  ;;  %v968_v38 = vpop.permute.xlu0 %967 }
 0x213   :  { %v500_v48 = vpop.f32.mrf.mxu1  ;;  %v557_v5 = vpop.f32.mrf.mxu0 }
 0x214   :  { %v554_v31 = vadd.f32 %v553_v2, %v500_v48  ;;  %v570_v47 = vmax.f32 %v356_v20, %v552_v54  ;;  %v1810_v48 = vld [vmem:[#allocation3_spill] sm:$0xff]  ;;  %v973_v53 = vpop.permute.xlu1 %972 }
 0x215   :  { %v502_v51 = vpop.f32.mrf.mxu1  ;;  %v561_v36 = vpop.f32.mrf.mxu0  ;;  %v370_v55 = vadd.f32 %v1810_v48, %v316_v43 }
 0x216   :  { %v556_v49 = vadd.f32 %v555_v26, %v502_v51 }
 0x217   :  { %v504_v8 = vpop.f32.mrf.mxu1  ;;  %v563_v40 = vpop.f32.mrf.mxu0 }
 0x218   :  { %v558_v45 = vadd.f32 %v557_v5, %v504_v8  ;;  %v572_v51 = vmax.f32 %v360_v39, %v556_v49 }
 0x219   :  { %v508_v13 = vpop.f32.mrf.mxu1  ;;  %v565_v15 = vpop.f32.mrf.mxu0 }
 0x21a   :  { %v573_v35 = vmax.f32 %v362_v63, %v558_v45 }
 0x21b   :  { %v510_v1 = vpop.f32.mrf.mxu1  ;;  %v1765_v21 = vpop.f32.mrf.mxu0 }
 0x21c   :  { %1807 = vst [vmem:[#allocation5_spill] sm:$0xff] %v1765_v21  ;;  %v564_v8 = vadd.f32 %v563_v40, %v510_v1 }
 0x21d   :  { %v512_v3 = vpop.f32.mrf.mxu1 }
 0x21f   :  { %v1763_v4 = vpop.f32.mrf.mxu1 }
 0x220   :  { %1806 = vst [vmem:[#allocation4_spill] sm:$0xff] %v1763_v4  ;;  %v571_v4 = vmax.f32 %v358_v61, %v554_v31  ;;  %v978_v61 = vpop.permute.xlu1 %977 }
 0x223   :  { %v1812_v1 = vld [vmem:[#allocation5_spill] sm:$0xff] }
 0x235   :  { %v743_v11 = vpop.f32.mrf.mxu1 }
 0x237   :  { %v745_v14 = vpop.f32.mrf.mxu1 }
 0x239   :  { %v747_v16 = vpop.f32.mrf.mxu1 }
 0x23b   :  { %v749_v44 = vpop.f32.mrf.mxu1 }
 0x23d   :  { %v753_v12 = vpop.f32.mrf.mxu1 }
 0x23f   :  { %v755_v24 = vpop.f32.mrf.mxu1 }
 0x241   :  { %v757_v6 = vpop.f32.mrf.mxu1 }
 0x243   :  { %v1767_v27 = vpop.f32.mrf.mxu1 }
 0x244   :  { %1808 = vst [vmem:[#allocation6_spill] sm:$0xff] %v1767_v27  ;;  %v562_v27 = vadd.f32 %v561_v36, %v508_v13  ;;  %v566_v13 = vadd.f32 %v565_v15, %v512_v3 }
 0x246   :  { %v574_v41 = vmax.f32 %v366_v9, %v562_v27 }
 0x24d   :  { %v690_v10 = vpop.f32.mrf.mxu0 }
 0x24e   :  { %v744_v34 = vadd.f32 %v743_v11, %v690_v10 }
 0x24f   :  { %v692_v22 = vpop.f32.mrf.mxu0 }
 0x250   :  { %v746_v60 = vadd.f32 %v745_v14, %v692_v22  ;;  %v762_v33 = vmax.f32 %v570_v47, %v744_v34  ;;  %v575_v22 = vmax.f32 %v368_v57, %v564_v8 }
 0x251   :  { %v694_v7 = vpop.f32.mrf.mxu0 }
 0x252   :  { %v748_v59 = vadd.f32 %v747_v16, %v694_v7  ;;  %v763_v26 = vmax.f32 %v571_v4, %v746_v60  ;;  %v1811_v7 = vld [vmem:[#allocation4_spill] sm:$0xff] }
 0x253   :  { %v696_v25 = vpop.f32.mrf.mxu0  ;;  %v568_v3 = vadd.f32 %v1812_v1, %v1811_v7 }
 0x254   :  { %v750_v2 = vadd.f32 %v749_v44, %v696_v25  ;;  %v764_v36 = vmax.f32 %v572_v51, %v748_v59 }
 0x255   :  { %v700_v28 = vpop.f32.mrf.mxu0 }
 0x256   :  { %v754_v43 = vadd.f32 %v753_v12, %v700_v28  ;;  %v576_v12 = vmax.f32 %v370_v55, %v566_v13 }
 0x257   :  { %v702_v23 = vpop.f32.mrf.mxu0 }
 0x258   :  { %v756_v44 = vadd.f32 %v755_v24, %v702_v23  ;;  %v766_v28 = vmax.f32 %v574_v41, %v754_v43 }
 0x259   :  { %v704_v46 = vpop.f32.mrf.mxu0 }
 0x25a   :  { %v758_v40 = vadd.f32 %v757_v6, %v704_v46  ;;  %v767_v31 = vmax.f32 %v575_v22, %v756_v44 }
 0x25b   :  { %v706_v62 = vpop.f32.mrf.mxu0 }
 0x25c   :  { %v768_v39 = vmax.f32 %v576_v12, %v758_v40 }
 0x275   :  { %v881_v30 = vpop.f32.mrf.mxu1 }
 0x277   :  { %v883_v32 = vpop.f32.mrf.mxu1 }
 0x279   :  { %v885_v29 = vpop.f32.mrf.mxu1 }
 0x27b   :  { %v887_v17 = vpop.f32.mrf.mxu1 }
 0x27d   :  { %v891_v56 = vpop.f32.mrf.mxu1 }
 0x27f   :  { %v893_v37 = vpop.f32.mrf.mxu1 }
 0x281   :  { %v895_v23 = vpop.f32.mrf.mxu1 }
 0x2a2   :  { %v934_v21 = vpop.f32.mrf.mxu0 }
 0x2a3   :  { %v935_v0 = vadd.f32 %v934_v21, %v881_v30  ;;  %v765_v21 = vmax.f32 %v573_v35, %v750_v2  ;;  %v983_v2 = vpop.permute.xlu0 %982 }
 0x2a4   :  { %v936_v19 = vpop.f32.mrf.mxu0 }
 0x2a5   :  { %v953_v50 = vmax.f32 %v762_v33, %v935_v0  ;;  %v937_v18 = vadd.f32 %v936_v19, %v883_v32  ;;  %v897_v0 = vpop.f32.mrf.mxu1 }
 0x2a6   :  { %v938_v5 = vpop.f32.mrf.mxu0 }
 0x2a7   :  { %v954_v11 = vmax.f32 %v763_v26, %v937_v18  ;;  %v985_v14 = vadd.f32 %v968_v38, %v953_v50  ;;  %v939_v16 = vadd.f32 %v938_v5, %v885_v29  ;;  %v1813_v29 = vld [vmem:[#allocation6_spill] sm:$0xff] }
 0x2a8   :  { %v940_v42 = vpop.f32.mrf.mxu0  ;;  %v760_v54 = vadd.f32 %v1813_v29, %v706_v62 }
 0x2a9   :  { %v986_v4 = vadd.f32 %v968_v38, %v954_v11  ;;  %v955_v33 = vmax.f32 %v764_v36, %v939_v16  ;;  %v941_v10 = vadd.f32 %v940_v42, %v887_v17  ;;  %v993_v59 = vmax.f32 %v985_v14, 0.0 }
 0x2aa   :  { %v944_v15 = vpop.f32.mrf.mxu0  ;;  %v577_v17 = vmax.f32 %v372_v58, %v568_v3 }
 0x2ab   :  { %v994_v25 = vmax.f32 %v986_v4, 0.0  ;;  %v956_v27 = vmax.f32 %v765_v21, %v941_v10  ;;  %v945_v30 = vadd.f32 %v944_v15, %v891_v56  ;;  %v987_v32 = vadd.f32 %v973_v53, %v955_v33 }
 0x2ac   :  { %v946_v20 = vpop.f32.mrf.mxu0  ;;  %v769_v45 = vmax.f32 %v577_v17, %v760_v54 }
 0x2ad   :  { %v1064_v6 = vpack.c.bf16 %v994_v25, %v993_v59  ;;  %v988_v46 = vadd.f32 %v973_v53, %v956_v27  ;;  %v947_v34 = vadd.f32 %v946_v20, %v893_v37  ;;  %v957_v49 = vmax.f32 %v766_v28, %v945_v30 }
 0x2ae   :  { %v948_v47 = vpop.f32.mrf.mxu0  ;;  %v995_v62 = vmax.f32 %v987_v32, 0.0 }
 0x2af   :  { %1028 = vst.msk [vmem:[%s1803_s3] sm:$0xff] %vm1776_vm12, %v1064_v6  ;;  %v996_v60 = vmax.f32 %v988_v46, 0.0  ;;  %v949_v63 = vadd.f32 %v948_v47, %v895_v23  ;;  %v958_v9 = vmax.f32 %v767_v31, %v947_v34  ;;  %v989_v38 = vadd.f32 %v978_v61, %v957_v49 }
 0x2b0   :  { %v950_v52 = vpop.f32.mrf.mxu0 }
 0x2b1   :  { %v1065_v57 = vpack.c.bf16 %v996_v60, %v995_v62  ;;  %v990_v48 = vadd.f32 %v978_v61, %v958_v9  ;;  %v959_v55 = vmax.f32 %v768_v39, %v949_v63  ;;  %v951_v58 = vadd.f32 %v950_v52, %v897_v0 }
 0x2b2   :  { %v997_v56 = vmax.f32 %v989_v38, 0.0 }
 0x2b3   :  { %1029 = vst.msk [vmem:[%s1803_s3 + $0x8] sm:$0xff] %vm1776_vm12, %v1065_v57  ;;  %v998_v19 = vmax.f32 %v990_v48, 0.0  ;;  %v991_v51 = vadd.f32 %v983_v2, %v959_v55  ;;  %v960_v26 = vmax.f32 %v769_v45, %v951_v58 }
 0x2b5   :  { %v1066_v50 = vpack.c.bf16 %v998_v19, %v997_v56  ;;  %v992_v18 = vadd.f32 %v983_v2, %v960_v26  ;;  %v999_v35 = vmax.f32 %v991_v51, 0.0 }
 0x2b7   :  { %1030 = vst.msk [vmem:[%s1803_s3 + $0x10] sm:$0xff] %vm1776_vm12, %v1066_v50  ;;  %v1000_v41 = vmax.f32 %v992_v18, 0.0 }
 0x2b9   :  { %v1067_v8 = vpack.c.bf16 %v1000_v41, %v999_v35 }
 0x2bb   :  { %1031 = vst.msk [vmem:[%s1803_s3 + $0x18] sm:$0xff] %vm1776_vm12, %v1067_v8 }

// kernel: cnn_forward.3
= control target key start
LH: loop header
LB: loop body
LE: loop exit
PB: predicated region body
PF: predicated region fallthrough
CT: control target
= control target key end

     0   :  { %v25_v0 = vlaneseq  ;;  %v3381_v3 = vmov 1966171168   ;;  %s3382_s18 = smov 127   ;;  %s3383_s19 = smov 126   ;;  %vm6284_vm0 = vcmask 1040384   ;;  %vm6271_vm3 = vcmask 1041408   ;;  %s6163_s0 = inlined_call_operand.vmem [shape: bf16[1,4,1,546], index: 0, kind: input, shape index: {}]   ;;  %s6164_s1 = inlined_call_operand.vmem [shape: bf16[16,25], index: 1, kind: input, shape index: {}]   ;;  %s6165_s2 = inlined_call_operand.vmem [shape: f32[16,1], index: 2, kind: input, shape index: {}]   ;;  %s6166_s3 = inlined_call_operand.vmem [shape: bf16[1,16,512], index: 3, kind: output, shape index: {}]  }
   0x1   :  { %v15_v1 = vld [vmem:[%s6163_s0] sm:$0x1f]  ;;  %v3419_v2 = vld [vmem:[%s6163_s0 + $0x5] sm:$0x1f]  ;;  %v23_v4 = vunpack.c.l.s4 %v3381_v3  ;;  %v3426_v9 = vld [vmem:[%s6163_s0 + $0xa] sm:$0x1f] }
   0x2   :  { %v26_v5 = vshrl.u32 %v25_v0, 7  ;;  %v91_v7 = vcombine.low %v15_v1, %v15_v1  ;;  %v131_v8 = vcombine.high %v3419_v2, %v3419_v2  ;;  %v297_v30 = vcombine.high %v3426_v9, %v3426_v9  ;;  %v3568_v57 = vld [vmem:[%s6163_s0 + $0xf] sm:$0x1f]  ;;  %s3384_s0 = smov 112   ;;  %s3385_s22 = smov 111  }
   0x3   :  { %v24_v6 = vunpack.c.0.s8 %v23_v4  ;;  %v172_v41 = vcombine.high %v15_v1, %v15_v1  ;;  %s3386_s23 = smov 110   ;;  %vm530_vm1 = vsmask.f32 256  ;;  %vm554_vm4 = vsmask.f32 1280  ;;  %s3387_s24 = smov 113  }
   0x4   :  { %vm3802_vm2 = vmand %vm6284_vm0, %vm530_vm1  ;;  %vm6287_vm6 = vcmask 1039360   ;;  %vm6285_vm7 = vcmask 1031168   ;;  %vm6277_vm8 = vcmask 1042432   ;;  %vm578_vm9 = vsmask.f32 2304  ;;  %s3389_s25 = smov 1  }
   0x5   :  { %v3428_v10 = vsub.s32 %v24_v6, %v26_v5  ;;  %vm3824_vm5 = vmand %vm6271_vm3, %vm554_vm4  ;;  %vm6330_vm10 = vcmask 916480   ;;  %vm6329_vm11 = vcmask 908288   ;;  %vm6300_vm12 = vcmask 1043456   ;;  %s3391_s28 = smov 96   ;;  %s3392_s29 = smov 95  }
   0x6   :  { %vm602_vm13 = vsmask.f32 3328  ;;  %vm6326_vm14 = vcmask 900096   ;;  %vm4058_vm15 = vmand %vm6277_vm8, %vm578_vm9  ;;  %vm6328_vm4 = vcmask 1044480   ;;  %vm626_vm9 = vsmask.f32 4352 }
   0x7   :  { %6375 = vst [vmem:[#allocation2_spill] sm:$0xff] %v3428_v10  ;;  %v3432_v11 = vrot.slane %v3419_v2, %v3428_v10  ;;  %v3435_v12 = vrot.slane %v91_v7, %v3428_v10  ;;  %v3438_v13 = vrot.slane %v131_v8, %v3428_v10  ;;  %v3442_v14 = vrot.slane %v3426_v9, %v3428_v10  ;;  %vm4081_vm1 = vmand %vm6300_vm12, %vm602_vm13 }
   0x8   :  { %v3445_v15 = vrot.slane %v15_v1, %v3428_v10  ;;  %v3526_v40 = vrot.slane %v297_v30, %v3428_v10  ;;  %v3552_v52 = vrot.slane %v172_v41, %v3428_v10  ;;  %v3585_v62 = vrot.slane %v3568_v57, %v3428_v10 }
   0x9   :  { %6376 = vst [vmem:[#allocation3_spill] sm:$0xff] %v3442_v14  ;;  %v58_v16 = vcombine.high %v3432_v11, %v3432_v11  ;;  %v3451_v17 = vrot.slane %v3432_v11, %v3428_v10  ;;  %v3455_v18 = vrot.slane %v3435_v12, %v3428_v10  ;;  %v3459_v19 = vrot.slane %v3438_v13, %v3428_v10 }
   0xa   :  { %v3463_v20 = vrot.slane %v3442_v14, %v3428_v10  ;;  %v3467_v21 = vrot.slane %v3445_v15, %v3428_v10  ;;  %v99_v23 = vcombine.high %v3435_v12, %v3435_v12  ;;  %v220_v29 = vcombine.high %v3442_v14, %v3442_v14  ;;  %6387 = vst [vmem:[#allocation14_spill] sm:$0xff] %v3526_v40 }
   0xb   :  { %6377 = vst [vmem:[#allocation4_spill] sm:$0xff] %v3459_v19  ;;  %v3470_v22 = vrot.slane %v58_v16, %v3428_v10  ;;  %116 = vrot.lane.b32.xlu0 %v3455_v18, %s3382_s18  ;;  %v3477_v24 = vshll.u32 %v3459_v19, 16  ;;  %v3483_v25 = vcombine.high %v3455_v18, %v3455_v18  ;;  %v3493_v28 = vcombine.high %v3451_v17, %v3451_v17 }
   0xc   :  { %6378 = vst [vmem:[#allocation5_spill] sm:$0xff] %v3467_v21  ;;  %199 = vrot.lane.b32.xlu1 %v3467_v21, %s3383_s19  ;;  %v3486_v26 = vshll.u32 %v3463_v20, 16  ;;  %v3489_v27 = vrot.slane %v99_v23, %v3428_v10  ;;  %v180_v33 = vcombine.low %v3445_v15, %v3445_v15  ;;  %v3509_v34 = vshll.u32 %v3451_v17, 16  ;;  %6396 = vst [vmem:[#allocation23_spill] sm:$0xff] %v3585_v62 }
   0xd   :  { %6379 = vst [vmem:[#allocation6_spill] sm:$0xff] %v3470_v22  ;;  %6380 = vst [vmem:[#allocation7_spill] sm:$0xff] %v3477_v24  ;;  %v3501_v31 = vcombine.high %v3470_v22, %v3470_v22  ;;  %v153_v32 = vrot.slane %v3477_v24, 7  ;;  %v3512_v35 = vshll.u32 %v3493_v28, 16  ;;  %v3520_v38 = vshll.u32 %v3470_v22, 16 }
   0xe   :  { %6381 = vst [vmem:[#allocation8_spill] sm:$0xff] %v3486_v26  ;;  %6383 = vst [vmem:[#allocation10_spill] sm:$0xff] %v3509_v34  ;;  %v115_v36 = vcombine.high %v3489_v27, %v3489_v27  ;;  %v312_v37 = vrot.slane %v3486_v26, 5  ;;  %v3529_v42 = vrot.slane %v220_v29, %v3428_v10  ;;  %v3534_v43 = vrot.slane %v180_v33, %v3428_v10 }
   0xf   :  { %6382 = vst [vmem:[#allocation9_spill] sm:$0xff] %v3501_v31  ;;  %124 = vrot.lane.b32.xlu0 %v3467_v21, %s3382_s18  ;;  %6384 = vst [vmem:[#allocation11_spill] sm:$0xff] %v3512_v35  ;;  %v3523_v39 = vshll.u32 %v3501_v31, 16  ;;  %v148_v44 = vrot.slane %v3512_v35, 7  ;;  %v146_v47 = vrot.slane %v3509_v34, 7  ;;  %v147_v48 = vrot.slane %v3520_v38, 7 }
  0x10   :  { %120 = vrot.lane.b32.xlu1 %v3483_v25, %s3382_s18  ;;  %6385 = vst [vmem:[#allocation12_spill] sm:$0xff] %v3520_v38  ;;  %6388 = vst [vmem:[#allocation15_spill] sm:$0xff] %v3529_v42  ;;  %v3019_v46 = vpack.i.bf16 %v312_v37, %v153_v32  ;;  %v3543_v49 = vcombine.high %v3463_v20, %v3463_v20  ;;  %v3547_v50 = vrot.slane %v3526_v40, %v3428_v10  ;;  %vm6327_vm13 = vcmask 1045504  }
  0x11   :  { %6386 = vst [vmem:[#allocation13_spill] sm:$0xff] %v3523_v39  ;;  %v149_v45 = vrot.slane %v3523_v39, 7  ;;  %v3556_v53 = vcombine.high %v3529_v42, %v3529_v42  ;;  %v3024_v54 = vpack.i.bf16 %v147_v48, %v146_v47  ;;  %v3560_v55 = vshll.u32 %v3529_v42, 16 }
  0x12   :  { %6389 = vst [vmem:[#allocation16_spill] sm:$0xff] %v3543_v49  ;;  %6390 = vst [vmem:[#allocation17_spill] sm:$0xff] %v3547_v50  ;;  %v3563_v56 = vshll.u32 %v3543_v49, 16  ;;  %v3573_v58 = vcombine.high %v3534_v43, %v3534_v43  ;;  %v181_v59 = vcombine.low %v3552_v52, %v3552_v52  ;;  %v3581_v61 = vshll.u32 %v3547_v50, 16 }
  0x13   :  { %118 = vrot.lane.b32.xlu0 %v3489_v27, %s3382_s18  ;;  %v3029_v51 = vpack.i.bf16 %v149_v45, %v148_v44  ;;  %6391 = vst [vmem:[#allocation18_spill] sm:$0xff] %v3556_v53  ;;  %6392 = vst [vmem:[#allocation19_spill] sm:$0xff] %v3560_v55  ;;  %v3578_v60 = vshll.u32 %v3556_v53, 16  ;;  %v3590_v63 = vcombine.high %v3467_v21, %v3467_v21  ;;  %v313_v0 = vrot.slane %v3560_v55, 5 }
  0x14   :  { %122 = vrot.lane.b32.xlu1 %v115_v36, %s3382_s18  ;;  %6393 = vst [vmem:[#allocation20_spill] sm:$0xff] %v3563_v56  ;;  %6395 = vst [vmem:[#allocation22_spill] sm:$0xff] %v3581_v61  ;;  %v314_v1 = vrot.slane %v3563_v56, 5  ;;  %v3597_v3 = vrot.slane %v181_v59, %v3428_v10  ;;  %v319_v5 = vrot.slane %v3581_v61, 5  ;;  %v346_v6 = vcombine.high %v3585_v62, %v3585_v62 }
  0x15   :  { %6394 = vst [vmem:[#allocation21_spill] sm:$0xff] %v3578_v60  ;;  %v315_v4 = vrot.slane %v3578_v60, 5  ;;  %v3607_v8 = vrot.slane %v3585_v62, %v3428_v10  ;;  %v338_v16 = vcombine.high %v3568_v57, %v3568_v57  ;;  %v378_v37 = vrot.slane %v3486_v26, 4 }
  0x16   :  { %v3034_v7 = vpack.i.bf16 %v314_v1, %v313_v0  ;;  %v3614_v29 = vrot.slane %v346_v6, %v3428_v10  ;;  %v379_v41 = vrot.slane %v3560_v55, 4  ;;  %v380_v45 = vrot.slane %v3563_v56, 4 }
  0x17   :  { %197 = vrot.lane.b32.xlu0 %v3534_v43, %s3383_s19  ;;  %6397 = vst [vmem:[#allocation24_spill] sm:$0xff] %v3607_v8  ;;  %v3039_v23 = vpack.i.bf16 %v319_v5, %v315_v4  ;;  %v3619_v30 = vcombine.low %v3607_v8, %v3607_v8  ;;  %v3622_v32 = vrot.slane %v338_v16, %v3428_v10  ;;  %v382_v48 = vrot.slane %v3581_v61, 4 }
  0x18   :  { %3020 = vrot.lane.b32.xlu1 %v3019_v46, %s3382_s18  ;;  %v363_v33 = vcombine.low %v3614_v29, %v3614_v29  ;;  %v381_v46 = vrot.slane %v3578_v60, 4  ;;  %v3044_v47 = vpack.i.bf16 %v379_v41, %v378_v37  ;;  %v401_v0 = vcombine.low %v3455_v18, %v3455_v18 }
  0x19   :  { %6398 = vst [vmem:[#allocation25_spill] sm:$0xff] %v3619_v30  ;;  %6399 = vst [vmem:[#allocation26_spill] sm:$0xff] %v3622_v32  ;;  %v3631_v36 = vrot.slane %v3622_v32, %v3428_v10  ;;  %v403_v1 = vcombine.low %v3489_v27, %v3489_v27  ;;  %v419_v4 = vrot.slane %v3509_v34, 3  ;;  %v420_v5 = vrot.slane %v3520_v38, 3 }
  0x1a   :  { %v3662_v6 = vcombine.low %v3467_v21, %v3467_v21  ;;  %v422_v16 = vrot.slane %v3523_v39, 3  ;;  %v506_v37 = vrot.slane %v3486_v26, 1 }
  0x1b   :  { %3030 = vrot.lane.b32.xlu0 %v3029_v51, %s3382_s18  ;;  %v362_v44 = vcombine.low %v3631_v36, %v3631_v36  ;;  %v751_v51 = vrot.slane %v3486_v26, 7 }
  0x1c   :  { %3025 = vrot.lane.b32.xlu1 %v3024_v54, %s3382_s18  ;;  %v3049_v54 = vpack.i.bf16 %v381_v46, %v380_v45  ;;  %v442_v45 = vcombine.low %v3534_v43, %v3534_v43  ;;  %v460_v46 = vrot.slane %v3520_v38, 2 }
  0x1d   :  { %v3054_v59 = vpack.i.bf16 %v751_v51, %v382_v48  ;;  %v461_v48 = vrot.slane %v3512_v35, 2  ;;  %v462_v51 = vrot.slane %v3523_v39, 2 }
  0x1f   :  { %201 = vrot.lane.b32.xlu0 %v3573_v58, %s3383_s19 }
  0x20   :  { %203 = vrot.lane.b32.xlu1 %v3590_v63, %s3383_s19 }
  0x23   :  { %205 = vrot.lane.b32.xlu0 %v3597_v3, %s3383_s19 }
  0x24   :  { %3035 = vrot.lane.b32.xlu1 %v3034_v7, %s3382_s18  ;;  %v421_v7 = vrot.slane %v3512_v35, 3 }
  0x26   :  { %v3064_v41 = vpack.i.bf16 %v422_v16, %v421_v7 }
  0x27   :  { %3040 = vrot.lane.b32.xlu0 %v3039_v23, %s3382_s18  ;;  %v3059_v23 = vpack.i.bf16 %v420_v5, %v419_v4  ;;  %v826_v4 = vrot.slane %v3509_v34, 5  ;;  %v3079_v5 = vpack.i.bf16 %v462_v51, %v461_v48  ;;  %v3104_v48 = vpack.i.bf16 %v3578_v60, %v3563_v56 }
  0x28   :  { %364 = vrot.lane.b32.xlu1 %v3619_v30, %s3382_s18 }
  0x2b   :  { %366 = vrot.lane.b32.xlu0 %v363_v33, %s3382_s18  ;;  %v423_v33 = vrot.slane %v3477_v24, 3 }
  0x2c   :  { %368 = vrot.lane.b32.xlu1 %v3607_v8, %s3382_s18 }
  0x2f   :  { %370 = vrot.lane.b32.xlu0 %v3614_v29, %s3382_s18 }
  0x30   :  { %372 = vrot.lane.b32.xlu1 %v362_v44, %s3382_s18  ;;  %v3069_v44 = vpack.i.bf16 %v506_v37, %v423_v33  ;;  %v508_v33 = vrot.slane %v3563_v56, 1  ;;  %v509_v37 = vrot.slane %v3578_v60, 1 }
  0x33   :  { %3045 = vrot.lane.b32.xlu0 %v3044_v47, %s3383_s19  ;;  %v443_v47 = vcombine.low %v3597_v3, %v3597_v3 }
  0x34   :  { %3050 = vrot.lane.b32.xlu1 %v3049_v54, %s3383_s19  ;;  %v482_v54 = vcombine.low %v3435_v12, %v3435_v12 }
  0x36   :  { %v3696_v7 = vrot.slane %v482_v54, %v3428_v10 }
  0x37   :  { %3055 = vrot.lane.b32.xlu0 %v3054_v59, %s3383_s19 }
  0x38   :  { %404 = vrot.lane.b32.xlu1 %v401_v0, %s3384_s0  ;;  %v490_v12 = vcombine.low %v3696_v7, %v3696_v7 }
  0x3b   :  { %406 = vrot.lane.b32.xlu0 %v403_v1, %s3384_s0  ;;  %v463_v1 = vrot.slane %v3477_v24, 2 }
  0x3c   :  { %408 = vrot.lane.b32.xlu1 %v3455_v18, %s3384_s0 }
  0x3d   :  { %v3084_v16 = vpack.i.bf16 %v826_v4, %v463_v1  ;;  %v752_v4 = vrot.slane %v3560_v55, 7 }
  0x3f   :  { %410 = vrot.lane.b32.xlu0 %v3489_v27, %s3384_s0  ;;  %v459_v27 = vrot.slane %v3509_v34, 2 }
  0x40   :  { %412 = vrot.lane.b32.xlu1 %v3662_v6, %s3384_s0 }
  0x41   :  { %v3074_v59 = vpack.i.bf16 %v460_v46, %v459_v27  ;;  %v3099_v46 = vpack.i.bf16 %v3560_v55, %v3486_v26 }
  0x43   :  { %3060 = vrot.lane.b32.xlu0 %v3059_v23, %s3384_s0  ;;  %v507_v23 = vrot.slane %v3560_v55, 1 }
  0x44   :  { %3065 = vrot.lane.b32.xlu1 %v3064_v41, %s3384_s0  ;;  %v510_v41 = vrot.slane %v3581_v61, 1 }
  0x46   :  { %v3094_v27 = vpack.i.bf16 %v510_v41, %v509_v37  ;;  %v29_v41 = vcombine.high %v3445_v15, %v3445_v15  ;;  %v791_v15 = vrot.slane %v3512_v35, 6 }
  0x47   :  { %3070 = vrot.lane.b32.xlu0 %v3069_v44, %s3384_s0  ;;  %v3089_v44 = vpack.i.bf16 %v508_v33, %v507_v23  ;;  %v755_v23 = vrot.slane %v3581_v61, 7 }
  0x48   :  { %444 = vrot.lane.b32.xlu1 %v442_v45, %s3385_s22 }
  0x4b   :  { %446 = vrot.lane.b32.xlu0 %v3662_v6, %s3385_s22 }
  0x4c   :  { %448 = vrot.lane.b32.xlu1 %v3534_v43, %s3385_s22 }
  0x4f   :  { %450 = vrot.lane.b32.xlu0 %v3467_v21, %s3385_s22 }
  0x50   :  { %452 = vrot.lane.b32.xlu1 %v443_v47, %s3385_s22  ;;  %v3720_v47 = vshll.u32 %v3467_v21, 16 }
  0x52   :  { %6400 = vst [vmem:[#allocation27_spill] sm:$0xff] %v3720_v47 }
  0x53   :  { %3075 = vrot.lane.b32.xlu0 %v3074_v59, %s3385_s22 }
  0x54   :  { %3080 = vrot.lane.b32.xlu1 %v3079_v5, %s3385_s22  ;;  %v753_v5 = vrot.slane %v3563_v56, 7 }
  0x56   :  { %v3114_v33 = vpack.i.bf16 %v753_v5, %v752_v4  ;;  %v793_v4 = vrot.slane %v3477_v24, 6 }
  0x57   :  { %3085 = vrot.lane.b32.xlu0 %v3084_v16, %s3385_s22 }
  0x58   :  { %491 = vrot.lane.b32.xlu1 %v490_v12, %s3386_s23  ;;  %v754_v12 = vrot.slane %v3578_v60, 7 }
  0x5a   :  { %v3119_v37 = vpack.i.bf16 %v755_v23, %v754_v12 }
  0x5b   :  { %493 = vrot.lane.b32.xlu0 %v401_v0, %s3386_s23  ;;  %v258_v0 = vcombine.low %v3568_v57, %v3568_v57  ;;  %v3109_v57 = vpack.i.bf16 %v3720_v47, %v3581_v61 }
  0x5c   :  { %495 = vrot.lane.b32.xlu1 %v3696_v7, %s3386_s23 }
  0x5d   :  { %v3726_v51 = vrot.slane %v258_v0, %v3428_v10  ;;  %v790_v0 = vrot.slane %v3520_v38, 6 }
  0x5f   :  { %497 = vrot.lane.b32.xlu0 %v3455_v18, %s3386_s23  ;;  %6401 = vst [vmem:[#allocation28_spill] sm:$0xff] %v3726_v51  ;;  %v3736_v54 = vrot.slane %v3726_v51, %v3428_v10 }
  0x60   :  { %499 = vrot.lane.b32.xlu1 %v442_v45, %s3386_s23  ;;  %v730_v45 = vcombine.high %v3726_v51, %v3726_v51 }
  0x61   :  { %6402 = vst [vmem:[#allocation29_spill] sm:$0xff] %v3736_v54  ;;  %v3746_v1 = vcombine.high %v3736_v54, %v3736_v54 }
  0x62   :  { %v3740_v59 = vrot.slane %v730_v45, %v3428_v10 }
  0x63   :  { %3090 = vrot.lane.b32.xlu0 %v3089_v44, %s3384_s0  ;;  %6404 = vst [vmem:[#allocation31_spill] sm:$0xff] %v3746_v1  ;;  %v3764_v44 = vrot.slane %v29_v41, %v3428_v10 }
  0x64   :  { %3095 = vrot.lane.b32.xlu1 %v3094_v27, %s3384_s0  ;;  %6403 = vst [vmem:[#allocation30_spill] sm:$0xff] %v3740_v59  ;;  %v738_v16 = vcombine.high %v3740_v59, %v3740_v59  ;;  %v789_v27 = vrot.slane %v3509_v34, 6 }
  0x65   :  { %6405 = vst [vmem:[#allocation32_spill] sm:$0xff] %v3764_v44  ;;  %v3958_v56 = vcombine.high %v3764_v44, %v3764_v44 }
  0x66   :  { %v3124_v45 = vpack.i.bf16 %v790_v0, %v789_v27  ;;  %v827_v27 = vrot.slane %v3520_v38, 5  ;;  %v828_v0 = vrot.slane %v3512_v35, 5 }
  0x67   :  { %3100 = vrot.lane.b32.xlu0 %v3099_v46, %s3382_s18  ;;  %v3773_v46 = vshll.u32 %v3764_v44, 16 }
  0x68   :  { %3105 = vrot.lane.b32.xlu1 %v3104_v48, %s3382_s18  ;;  %v792_v48 = vrot.slane %v3523_v39, 6  ;;  %v3139_v30 = vpack.i.bf16 %v828_v0, %v827_v27  ;;  %v858_v27 = vcombine.low %v3764_v44, %v3764_v44 }
  0x69   :  { %6406 = vst [vmem:[#allocation33_spill] sm:$0xff] %v3773_v46  ;;  %v1697_v5 = vrot.slane %v3773_v46, 6 }
  0x6b   :  { %3110 = vrot.lane.b32.xlu0 %v3109_v57, %s3382_s18  ;;  %v3134_v23 = vpack.i.bf16 %v1697_v5, %v793_v4  ;;  %v829_v5 = vrot.slane %v3523_v39, 5 }
  0x6c   :  { %739 = vrot.lane.b32.xlu1 %v3736_v54, %s3382_s18 }
  0x6f   :  { %741 = vrot.lane.b32.xlu0 %v3740_v59, %s3382_s18 }
  0x70   :  { %743 = vrot.lane.b32.xlu1 %v3746_v1, %s3382_s18 }
  0x73   :  { %745 = vrot.lane.b32.xlu0 %v738_v16, %s3382_s18 }
  0x74   :  { %3115 = vrot.lane.b32.xlu1 %v3114_v33, %s3383_s19  ;;  %v3797_v33 = vrot.slane %v3552_v52, %v3428_v10  ;;  %v813_v52 = vcombine.high %v3696_v7, %v3696_v7 }
  0x77   :  { %3120 = vrot.lane.b32.xlu0 %v3119_v37, %s3383_s19 }
  0x78   :  { %775 = vrot.lane.b32.xlu1 %v3534_v43, %s3384_s0 }
  0x7b   :  { %777 = vrot.lane.b32.xlu0 %v3467_v21, %s3384_s0 }
  0x7c   :  { %779 = vrot.lane.b32.xlu1 %v3573_v58, %s3384_s0  ;;  %v3129_v58 = vpack.i.bf16 %v792_v48, %v791_v15  ;;  %v2745_v15 = vsel %vm3802_vm2, %v3797_v33, %v3477_v24 }
  0x7d   :  { %v3779_v57 = vpop.permute.xlu0 %116 }
  0x7e   :  { %6407 = vst [vmem:[#allocation34_spill] sm:$0xff] %v3779_v57  ;;  %v3781_v43 = vpop.permute.xlu1 %199 }
  0x7f   :  { %6408 = vst [vmem:[#allocation35_spill] sm:$0xff] %v3781_v43  ;;  %781 = vrot.lane.b32.xlu0 %v3590_v63, %s3384_s0 }
  0x80   :  { %783 = vrot.lane.b32.xlu1 %v3597_v3, %s3384_s0 }
  0x81   :  { %v3789_v16 = vpop.permute.xlu0 %124 }
  0x82   :  { %6409 = vst [vmem:[#allocation36_spill] sm:$0xff] %v3789_v16  ;;  %v3791_v12 = vpop.permute.xlu1 %120 }
  0x83   :  { %3125 = vrot.lane.b32.xlu0 %v3124_v45, %s3384_s0 }
  0x84   :  { %3130 = vrot.lane.b32.xlu1 %v3129_v58, %s3384_s0  ;;  %v830_v58 = vrot.slane %v3477_v24, 5 }
  0x85   :  { %v3799_v37 = vpop.permute.xlu0 %118 }
  0x86   :  { %6410 = vst [vmem:[#allocation37_spill] sm:$0xff] %v3799_v37  ;;  %v3806_v41 = vpop.permute.xlu1 %122 }
  0x87   :  { %3135 = vrot.lane.b32.xlu0 %v3134_v23, %s3384_s0  ;;  %v2748_v23 = vsel %vm6284_vm0, %v2745_v15, %v3789_v16 }
  0x88   :  { %814 = vrot.lane.b32.xlu1 %v3696_v7, %s3385_s22 }
  0x89   :  { %v3819_v48 = vpop.permute.xlu0 %197 }
  0x8a   :  { %6413 = vst [vmem:[#allocation38_spill] sm:$0xff] %v3819_v48  ;;  %v3821_v45 = vpop.permute.xlu1 %3020 }
  0x8b   :  { %6414 = vst [vmem:[#allocation39_spill] sm:$0xff] %v3821_v45  ;;  %v6174_v7 = vunpack.i.l.bf16 %v3821_v45  ;;  %816 = vrot.lane.b32.xlu0 %v3455_v18, %s3385_s22  ;;  %v3144_v18 = vpack.i.bf16 %v830_v58, %v829_v5 }
  0x8c   :  { %818 = vrot.lane.b32.xlu1 %v813_v52, %s3385_s22 }
  0x8d   :  { %v3836_v61 = vpop.permute.xlu0 %3030  ;;  %v3842_v59 = vsel %vm3824_vm5, %v2748_v23, %v6174_v7 }
  0x8e   :  { %6417 = vst [vmem:[#allocation40_spill] sm:$0xff] %v3842_v59  ;;  %v3844_v40 = vpop.permute.xlu1 %3025 }
  0x8f   :  { %820 = vrot.lane.b32.xlu0 %v3483_v25, %s3385_s22  ;;  %v857_v25 = vcombine.low %v3797_v33, %v3797_v33 }
  0x90   :  { %3140 = vrot.lane.b32.xlu1 %v3139_v30, %s3385_s22 }
  0x91   :  { %v3849_v15 = vpop.permute.xlu0 %201 }
  0x92   :  { %6418 = vst [vmem:[#allocation41_spill] sm:$0xff] %v3849_v15  ;;  %v3851_v52 = vpop.permute.xlu1 %203 }
  0x93   :  { %6419 = vst [vmem:[#allocation42_spill] sm:$0xff] %v3851_v52  ;;  %3145 = vrot.lane.b32.xlu0 %v3144_v18, %s3385_s22 }
  0x94   :  { %859 = vrot.lane.b32.xlu1 %v3662_v6, %s3386_s23 }
  0x95   :  { %v3858_v0 = vpop.permute.xlu0 %205 }
  0x96   :  { %6420 = vst [vmem:[#allocation43_spill] sm:$0xff] %v3858_v0  ;;  %v3860_v23 = vpop.permute.xlu1 %3035  ;;  %v3954_v0 = vshll.u32 %v3590_v63, 16 }
  0x97   :  { %6421 = vst [vmem:[#allocation44_spill] sm:$0xff] %v3860_v23  ;;  %861 = vrot.lane.b32.xlu0 %v858_v27, %s3386_s23 }
  0x98   :  { %863 = vrot.lane.b32.xlu1 %v3467_v21, %s3386_s23 }
  0x99   :  { %v3867_v30 = vpop.permute.xlu0 %3040 }
  0x9a   :  { %6422 = vst [vmem:[#allocation45_spill] sm:$0xff] %v3867_v30  ;;  %v3869_v5 = vpop.permute.xlu1 %364 }
  0x9b   :  { %6423 = vst [vmem:[#allocation46_spill] sm:$0xff] %v3869_v5  ;;  %865 = vrot.lane.b32.xlu0 %v3764_v44, %s3386_s23 }
  0x9c   :  { %867 = vrot.lane.b32.xlu1 %v857_v25, %s3386_s23 }
  0x9d   :  { %v3874_v6 = vpop.permute.xlu0 %366 }
  0x9e   :  { %6424 = vst [vmem:[#allocation47_spill] sm:$0xff] %v3874_v6  ;;  %v3876_v58 = vpop.permute.xlu1 %368 }
  0xa1   :  { %v3878_v18 = vpop.permute.xlu0 %370 }
  0xa2   :  { %6425 = vst [vmem:[#allocation48_spill] sm:$0xff] %v3878_v18  ;;  %v3880_v27 = vpop.permute.xlu1 %372 }
  0xa3   :  { %6426 = vst [vmem:[#allocation49_spill] sm:$0xff] %v3880_v27 }
  0xa5   :  { %v3882_v7 = vpop.permute.xlu0 %3045 }
  0xa6   :  { %6427 = vst [vmem:[#allocation50_spill] sm:$0xff] %v3882_v7  ;;  %v3884_v59 = vpop.permute.xlu1 %3050 }
  0xa7   :  { %6428 = vst [vmem:[#allocation51_spill] sm:$0xff] %v3884_v59 }
  0xa9   :  { %v3886_v24 = vpop.permute.xlu0 %3055 }
  0xaa   :  { %6429 = vst [vmem:[#allocation52_spill] sm:$0xff] %v3886_v24  ;;  %v3888_v53 = vpop.permute.xlu1 %404 }
  0xab   :  { %6430 = vst [vmem:[#allocation53_spill] sm:$0xff] %v3888_v53 }
  0xad   :  { %v3890_v49 = vpop.permute.xlu0 %406 }
  0xae   :  { %6431 = vst [vmem:[#allocation54_spill] sm:$0xff] %v3890_v49  ;;  %v3892_v31 = vpop.permute.xlu1 %408 }
  0xaf   :  { %6432 = vst [vmem:[#allocation55_spill] sm:$0xff] %v3892_v31 }
  0xb1   :  { %v3894_v25 = vpop.permute.xlu0 %410 }
  0xb2   :  { %6433 = vst [vmem:[#allocation56_spill] sm:$0xff] %v3894_v25  ;;  %v3896_v32 = vpop.permute.xlu1 %412 }
  0xb3   :  { %6434 = vst [vmem:[#allocation57_spill] sm:$0xff] %v3896_v32 }
  0xb5   :  { %v3898_v62 = vpop.permute.xlu0 %3060 }
  0xb6   :  { %6435 = vst [vmem:[#allocation58_spill] sm:$0xff] %v3898_v62  ;;  %v3900_v50 = vpop.permute.xlu1 %3065 }
  0xb7   :  { %6436 = vst [vmem:[#allocation59_spill] sm:$0xff] %v3900_v50 }
  0xb9   :  { %v3902_v27 = vpop.permute.xlu0 %3070 }
  0xba   :  { %6437 = vst [vmem:[#allocation60_spill] sm:$0xff] %v3902_v27  ;;  %v3904_v42 = vpop.permute.xlu1 %444 }
  0xbb   :  { %6438 = vst [vmem:[#allocation61_spill] sm:$0xff] %v3904_v42 }
  0xbd   :  { %v3906_v18 = vpop.permute.xlu0 %446 }
  0xbe   :  { %6439 = vst [vmem:[#allocation62_spill] sm:$0xff] %v3906_v18  ;;  %v3908_v59 = vpop.permute.xlu1 %448 }
  0xc1   :  { %v3910_v53 = vpop.permute.xlu0 %450 }
  0xc2   :  { %6440 = vst [vmem:[#allocation63_spill] sm:$0xff] %v3910_v53  ;;  %v3912_v49 = vpop.permute.xlu1 %452 }
  0xc3   :  { %6441 = vst [vmem:[#allocation64_spill] sm:$0xff] %v3912_v49 }
  0xc5   :  { %v3914_v31 = vpop.permute.xlu0 %3075 }
  0xc6   :  { %6442 = vst [vmem:[#allocation65_spill] sm:$0xff] %v3914_v31  ;;  %v3916_v25 = vpop.permute.xlu1 %3080 }
  0xc7   :  { %6443 = vst [vmem:[#allocation66_spill] sm:$0xff] %v3916_v25 }
  0xc9   :  { %v3918_v32 = vpop.permute.xlu0 %3085 }
  0xca   :  { %6444 = vst [vmem:[#allocation67_spill] sm:$0xff] %v3918_v32  ;;  %v3920_v62 = vpop.permute.xlu1 %491 }
  0xcb   :  { %6445 = vst [vmem:[#allocation68_spill] sm:$0xff] %v3920_v62 }
  0xcd   :  { %v3922_v50 = vpop.permute.xlu0 %493 }
  0xce   :  { %6446 = vst [vmem:[#allocation69_spill] sm:$0xff] %v3922_v50  ;;  %v3924_v27 = vpop.permute.xlu1 %495 }
  0xcf   :  { %6447 = vst [vmem:[#allocation70_spill] sm:$0xff] %v3924_v27 }
  0xd1   :  { %v3926_v42 = vpop.permute.xlu0 %497 }
  0xd2   :  { %6448 = vst [vmem:[#allocation71_spill] sm:$0xff] %v3926_v42  ;;  %v3928_v18 = vpop.permute.xlu1 %499 }
  0xd3   :  { %6449 = vst [vmem:[#allocation72_spill] sm:$0xff] %v3928_v18 }
  0xd5   :  { %v3930_v5 = vpop.permute.xlu0 %3090 }
  0xd6   :  { %6450 = vst [vmem:[#allocation73_spill] sm:$0xff] %v3930_v5  ;;  %v3932_v53 = vpop.permute.xlu1 %3095 }
  0xd7   :  { %6451 = vst [vmem:[#allocation74_spill] sm:$0xff] %v3932_v53 }
  0xd9   :  { %v3101_v49 = vpop.permute.xlu0 %3100 }
  0xda   :  { %v3106_v31 = vpop.permute.xlu1 %3105  ;;  %v3103_v23 = vunpack.i.h.bf16 %v3101_v49  ;;  %v3102_v14 = vunpack.i.l.bf16 %v3101_v49 }
  0xdb   :  { %v3107_v19 = vunpack.i.l.bf16 %v3106_v31  ;;  %v3108_v60 = vunpack.i.h.bf16 %v3106_v31  ;;  %v3966_v31 = vcombine.high %v3607_v8, %v3607_v8 }
  0xdc   :  { %v721_v22 = vsel %vm6287_vm6, %v3102_v14, %v3103_v23  ;;  %v3058_v14 = vunpack.i.h.bf16 %v3886_v24 }
  0xdd   :  { %v3934_v6 = vpop.permute.xlu0 %3110  ;;  %v722_v49 = vsel %vm6287_vm6, %v3103_v23, %v3107_v19  ;;  %6453 = vst [vmem:[#allocation76_spill] sm:$0xff] %v3966_v31  ;;  %v723_v43 = vsel %vm6287_vm6, %v3107_v19, %v3108_v60  ;;  %v3088_v23 = vunpack.i.h.bf16 %v3918_v32  ;;  %v873_v32 = vsel %vm3802_vm2, %v3607_v8, %v721_v22 }
  0xde   :  { %6452 = vst [vmem:[#allocation75_spill] sm:$0xff] %v3934_v6  ;;  %v740_v25 = vpop.permute.xlu1 %739  ;;  %v3112_v48 = vunpack.i.l.bf16 %v3934_v6  ;;  %v3970_v6 = vcombine.high %v3614_v29, %v3614_v29  ;;  %v874_v24 = vsel %vm3802_vm2, %v3614_v29, %v722_v49 }
  0xe0   :  { %v724_v15 = vsel %vm6287_vm6, %v3108_v60, %v3112_v48  ;;  %v877_v51 = vsel %vm3802_vm2, %v3631_v36, %v3112_v48  ;;  %v875_v48 = vsel %vm3802_vm2, %v3966_v31, %v723_v43 }
  0xe1   :  { %v742_v7 = vpop.permute.xlu0 %741  ;;  %v896_v57 = vsel %vm6284_vm0, %v877_v51, %v3876_v58 }
  0xe2   :  { %v744_v1 = vpop.permute.xlu1 %743  ;;  %v747_v19 = vsel %vm6287_vm6, %v740_v25, %v742_v7 }
  0xe3   :  { %v748_v60 = vsel %vm6287_vm6, %v742_v7, %v744_v1  ;;  %v876_v7 = vsel %vm3802_vm2, %v3970_v6, %v724_v15  ;;  %v880_v49 = vsel %vm6284_vm0, %v873_v32, %v747_v19 }
  0xe4   :  { %v884_v34 = vsel %vm6284_vm0, %v874_v24, %v748_v60 }
  0xe5   :  { %v746_v62 = vpop.permute.xlu0 %745 }
  0xe6   :  { %v3116_v54 = vpop.permute.xlu1 %3115  ;;  %v749_v25 = vsel %vm6287_vm6, %v744_v1, %v746_v62  ;;  %v750_v38 = vsel %vm6287_vm6, %v746_v62, %v3876_v58 }
  0xe7   :  { %v3118_v45 = vunpack.i.h.bf16 %v3116_v54  ;;  %v3117_v39 = vunpack.i.l.bf16 %v3116_v54  ;;  %v892_v32 = vsel %vm6284_vm0, %v876_v7, %v750_v38 }
  0xe9   :  { %v3936_v50 = vpop.permute.xlu0 %3120  ;;  %v766_v22 = vsel %vm6285_vm7, %v3058_v14, %v3117_v39  ;;  %v767_v21 = vsel %vm6285_vm7, %v3117_v39, %v3118_v45  ;;  %v888_v39 = vsel %vm6284_vm0, %v875_v48, %v749_v25 }
  0xea   :  { %v3938_v27 = vpop.permute.xlu1 %775  ;;  %v3122_v16 = vunpack.i.l.bf16 %v3936_v50  ;;  %v3123_v54 = vunpack.i.h.bf16 %v3936_v50  ;;  %v4013_v24 = vsel %vm3824_vm5, %v880_v49, %v766_v22  ;;  %v4017_v51 = vsel %vm3824_vm5, %v884_v34, %v767_v21 }
  0xeb   :  { %6454 = vst [vmem:[#allocation77_spill] sm:$0xff] %v4013_v24  ;;  %6455 = vst [vmem:[#allocation78_spill] sm:$0xff] %v4017_v51 }
  0xec   :  { %v768_v43 = vsel %vm6285_vm7, %v3118_v45, %v3122_v16  ;;  %v769_v15 = vsel %vm6285_vm7, %v3122_v16, %v3123_v54  ;;  %v902_v38 = vsel %vm3824_vm5, %v896_v57, %v3123_v54 }
  0xed   :  { %v3940_v42 = vpop.permute.xlu0 %777  ;;  %v4032_v21 = vsel %vm3824_vm5, %v888_v39, %v768_v43  ;;  %v4036_v34 = vsel %vm3824_vm5, %v892_v32, %v769_v15 }
  0xee   :  { %v3942_v18 = vpop.permute.xlu1 %779  ;;  %v785_v45 = vsel %vm6330_vm10, %v3938_v27, %v3940_v42  ;;  %6456 = vst [vmem:[#allocation79_spill] sm:$0xff] %v4032_v21  ;;  %6457 = vst [vmem:[#allocation80_spill] sm:$0xff] %v4036_v34 }
  0xef   :  { %v905_v7 = vsel %vm6271_vm3, %v4013_v24, %v785_v45  ;;  %v6517_v24 = vld [vmem:[#allocation44_spill] sm:$0xff] }
  0xf1   :  { %v3944_v5 = vpop.permute.xlu0 %781 }
  0xf2   :  { %v3946_v53 = vpop.permute.xlu1 %783  ;;  %v787_v60 = vsel %vm6330_vm10, %v3942_v18, %v3944_v5 }
  0xf3   :  { %v913_v15 = vsel %vm6271_vm3, %v4032_v21, %v787_v60  ;;  %v6490_v21 = vld [vmem:[#allocation12_spill] sm:$0xff] }
  0xf5   :  { %v3948_v30 = vpop.permute.xlu0 %3125 }
  0xf6   :  { %v3950_v26 = vpop.permute.xlu1 %3130  ;;  %v3128_v1 = vunpack.i.h.bf16 %v3948_v30  ;;  %v3127_v62 = vunpack.i.l.bf16 %v3948_v30  ;;  %v786_v30 = vsel %vm6330_vm10, %v3940_v42, %v3942_v18 }
  0xf7   :  { %v3132_v14 = vunpack.i.l.bf16 %v3950_v26  ;;  %v3133_v42 = vunpack.i.h.bf16 %v3950_v26  ;;  %v909_v25 = vsel %vm6271_vm3, %v4017_v51, %v786_v30 }
  0xf8   :  { %v4039_v48 = vsel %vm6330_vm10, %v3127_v62, %v3128_v1 }
  0xf9   :  { %v3960_v55 = vpop.permute.xlu0 %3135  ;;  %6458 = vst [vmem:[#allocation81_spill] sm:$0xff] %v4039_v48  ;;  %v4043_v57 = vsel %vm6330_vm10, %v3128_v1, %v3132_v14  ;;  %v788_v1 = vsel %vm6330_vm10, %v3944_v5, %v3946_v53 }
  0xfa   :  { %v815_v52 = vpop.permute.xlu1 %814  ;;  %6459 = vst [vmem:[#allocation82_spill] sm:$0xff] %v4043_v57  ;;  %v3137_v54 = vunpack.i.l.bf16 %v3960_v55  ;;  %v924_v39 = vsel %vm4058_vm15, %v909_v25, %v4043_v57  ;;  %v3038_v57 = vunpack.i.h.bf16 %v6517_v24 }
  0xfc   :  { %v4089_v45 = vsel %vm6330_vm10, %v3133_v42, %v3137_v54 }
  0xfd   :  { %v817_v44 = vpop.permute.xlu0 %816  ;;  %6469 = vst [vmem:[#allocation88_spill] sm:$0xff] %v4089_v45 }
  0xfe   :  { %v819_v50 = vpop.permute.xlu1 %818  ;;  %v4051_v22 = vsel %vm6329_vm11, %v815_v52, %v817_v44 }
  0xff   :  { %6460 = vst [vmem:[#allocation83_spill] sm:$0xff] %v4051_v22  ;;  %v4054_v49 = vsel %vm6329_vm11, %v817_v44, %v819_v50  ;;  %v923_v44 = vsel %vm4058_vm15, %v905_v7, %v4039_v48  ;;  %v6494_v48 = vld [vmem:[#allocation13_spill] sm:$0xff] }
 0x100   :  { %6461 = vst [vmem:[#allocation84_spill] sm:$0xff] %v4054_v49  ;;  %v930_v30 = vsel %vm6277_vm8, %v923_v44, %v4051_v22  ;;  %v934_v60 = vsel %vm6277_vm8, %v924_v39, %v4054_v49  ;;  %v6509_v49 = vld [vmem:[#allocation21_spill] sm:$0xff] }
 0x101   :  { %v821_v37 = vpop.permute.xlu0 %820 }
 0x102   :  { %v3141_v16 = vpop.permute.xlu1 %3140  ;;  %v4100_v7 = vsel %vm6329_vm11, %v821_v37, %v3908_v59 }
 0x103   :  { %v3142_v19 = vunpack.i.l.bf16 %v3141_v16  ;;  %v3143_v27 = vunpack.i.h.bf16 %v3141_v16  ;;  %6471 = vst [vmem:[#allocation90_spill] sm:$0xff] %v4100_v7 }
 0x105   :  { %v3146_v18 = vpop.permute.xlu0 %3145  ;;  %v4068_v52 = vsel %vm6329_vm11, %v3088_v23, %v3142_v19  ;;  %v4077_v16 = vsel %vm6329_vm11, %v3142_v19, %v3143_v27  ;;  %v4086_v23 = vsel %vm6330_vm10, %v3132_v14, %v3133_v42 }
 0x106   :  { %v860_v43 = vpop.permute.xlu1 %859  ;;  %v3147_v62 = vunpack.i.l.bf16 %v3146_v18  ;;  %6464 = vst [vmem:[#allocation85_spill] sm:$0xff] %v4068_v52  ;;  %v3148_v32 = vunpack.i.h.bf16 %v3146_v18  ;;  %6465 = vst [vmem:[#allocation86_spill] sm:$0xff] %v4077_v16  ;;  %v4096_v18 = vsel %vm6329_vm11, %v819_v50, %v821_v37  ;;  %v948_v42 = vsel %vm4081_vm1, %v930_v30, %v4068_v52 }
 0x107   :  { %6468 = vst [vmem:[#allocation87_spill] sm:$0xff] %v4086_v23  ;;  %6470 = vst [vmem:[#allocation89_spill] sm:$0xff] %v4096_v18  ;;  %v949_v50 = vsel %vm4081_vm1, %v934_v60, %v4077_v16  ;;  %v925_v30 = vsel %vm4058_vm15, %v913_v15, %v4086_v23  ;;  %v6487_v23 = vld [vmem:[#allocation34_spill] sm:$0xff]  ;;  %v6492_v16 = vld [vmem:[#allocation28_spill] sm:$0xff] }
 0x108   :  { %v4117_v37 = vsel %vm6329_vm11, %v3143_v27, %v3147_v62  ;;  %v4128_v60 = vsel %vm6329_vm11, %v3147_v62, %v3148_v32 }
 0x109   :  { %v862_v19 = vpop.permute.xlu0 %861  ;;  %6474 = vst [vmem:[#allocation93_spill] sm:$0xff] %v4117_v37  ;;  %6475 = vst [vmem:[#allocation94_spill] sm:$0xff] %v4128_v60 }
 0x10a   :  { %v864_v25 = vpop.permute.xlu1 %863  ;;  %v4103_v14 = vsel %vm6326_vm14, %v860_v43, %v862_v19  ;;  %v917_v43 = vsel %vm6271_vm3, %v4036_v34, %v788_v1  ;;  %v938_v1 = vsel %vm6277_vm8, %v925_v30, %v4096_v18  ;;  %v6489_v34 = vld [vmem:[#allocation5_spill] sm:$0xff] }
 0x10b   :  { %6472 = vst [vmem:[#allocation91_spill] sm:$0xff] %v4103_v14  ;;  %v4109_v44 = vsel %vm6326_vm14, %v862_v19, %v864_v25  ;;  %v955_v39 = vsel %vm6300_vm12, %v948_v42, %v4103_v14  ;;  %v921_v42 = vsel %vm6271_vm3, %v902_v38, %v3946_v53  ;;  %v926_v27 = vsel %vm4058_vm15, %v917_v43, %v4089_v45  ;;  %v6491_v14 = vld [vmem:[#allocation32_spill] sm:$0xff] }
 0x10c   :  { %6473 = vst [vmem:[#allocation92_spill] sm:$0xff] %v4109_v44  ;;  %v958_v19 = vsel %vm6300_vm12, %v949_v50, %v4109_v44  ;;  %973 = vrot.lane.b32.xlu0 %v955_v39, %s3384_s0  ;;  %v1133_v50 = vcombine.low %v3419_v2, %v3419_v2  ;;  %v927_v62 = vsel %vm4058_vm15, %v921_v42, %v3137_v54 }
 0x10d   :  { %975 = vrot.lane.b32.xlu1 %v958_v19, %s3384_s0  ;;  %v866_v15 = vpop.permute.xlu0 %865  ;;  %v942_v39 = vsel %vm6277_vm8, %v926_v27, %v4100_v7  ;;  %v950_v43 = vsel %vm4081_vm1, %v938_v1, %v4117_v37  ;;  %v4159_v19 = vshll.u32 %v3797_v33, 16  ;;  %v3149_v27 = vpack.i.bf16 %v3954_v0, %v3773_v46 }
 0x10e   :  { %v868_v53 = vpop.permute.xlu1 %867  ;;  %v4145_v38 = vsel %vm6326_vm14, %v864_v25, %v866_v15  ;;  %v951_v2 = vsel %vm4081_vm1, %v942_v39, %v4128_v60  ;;  %v4162_v25 = vshll.u32 %v3958_v56, 16  ;;  %v946_v1 = vsel %vm6277_vm8, %v927_v62, %v3908_v59 }
 0x10f   :  { %6476 = vst [vmem:[#allocation95_spill] sm:$0xff] %v4145_v38  ;;  %v4151_v30 = vsel %vm6326_vm14, %v866_v15, %v868_v53  ;;  %v961_v54 = vsel %vm6300_vm12, %v950_v43, %v4145_v38  ;;  %6478 = vst [vmem:[#allocation97_spill] sm:$0xff] %v4159_v19  ;;  %v4173_v15 = vrot.slane %v1133_v50, %v3428_v10 }
 0x110   :  { %6477 = vst [vmem:[#allocation96_spill] sm:$0xff] %v4151_v30  ;;  %v964_v42 = vsel %vm6300_vm12, %v951_v2, %v4151_v30  ;;  %977 = vrot.lane.b32.xlu0 %v961_v54, %s3384_s0  ;;  %v952_v33 = vsel %vm4081_vm1, %v946_v1, %v3148_v32  ;;  %v3154_v43 = vpack.i.bf16 %v4159_v19, %v4162_v25  ;;  %v1174_v1 = vrot.slane %v3954_v0, 7 }
 0x111   :  { %979 = vrot.lane.b32.xlu1 %v964_v42, %s3384_s0  ;;  %v967_v39 = vsel %vm6300_vm12, %v952_v33, %v868_v53  ;;  %v1141_v2 = vcombine.high %v4173_v15, %v4173_v15  ;;  %v4186_v62 = vrot.slane %v4173_v15, %v3428_v10  ;;  %v4199_v53 = vshll.u32 %v3614_v29, 16 }
 0x112   :  { %v1172_v42 = vrot.slane %v3720_v47, 7  ;;  %v1175_v33 = vrot.slane %v4162_v25, 7  ;;  %v1195_v30 = vcombine.low %v3432_v11, %v3432_v11  ;;  %v1246_v60 = vcombine.low %v3426_v9, %v3426_v9 }
 0x113   :  { %6479 = vst [vmem:[#allocation98_spill] sm:$0xff] %v4186_v62  ;;  %v4190_v32 = vrot.slane %v1141_v2, %v3428_v10  ;;  %v4196_v50 = vcombine.high %v4186_v62, %v4186_v62  ;;  %v129_v45 = vsel %vm6287_vm6, %v3791_v12, %v3806_v41  ;;  %v533_v52 = vsel %vm3802_vm2, %v6491_v14, %v6490_v21 }
 0x114   :  { %981 = vrot.lane.b32.xlu0 %v967_v39, %s3384_s0  ;;  %v1176_v39 = vrot.slane %v4159_v19, 7  ;;  %v3164_v2 = vpack.i.bf16 %v1175_v33, %v1174_v1  ;;  %v4254_v33 = vshll.u32 %v3966_v31, 16  ;;  %v535_v14 = vsel %vm3802_vm2, %v3958_v56, %v6494_v48  ;;  %v6500_v56 = vld [vmem:[#allocation35_spill] sm:$0xff] }
 0x115   :  { %3150 = vrot.lane.b32.xlu1 %v3149_v27, %s3382_s18  ;;  %v1157_v54 = vcombine.high %v4190_v32, %v4190_v32  ;;  %v1173_v27 = vrot.slane %v3773_v46, 7  ;;  %v6718_v3 = vrot.slane %v4199_v53, 6 }
 0x117   :  { %v3159_v29 = vpack.i.bf16 %v1173_v27, %v1172_v42  ;;  %v1253_v42 = vrot.slane %v1246_v60, %v3428_v10  ;;  %v1196_v27 = vcombine.low %v3438_v13, %v3438_v13 }
 0x118   :  { %3155 = vrot.lane.b32.xlu0 %v3154_v43, %s3382_s18  ;;  %v1337_v43 = vrot.slane %v4199_v53, 4 }
 0x119   :  { %1158 = vrot.lane.b32.xlu1 %v4186_v62, %s3382_s18  ;;  %v1254_v9 = vcombine.low %v1253_v42, %v1253_v42  ;;  %v4247_v13 = vrot.slane %v1253_v42, %v3428_v10 }
 0x11a   :  { %v3169_v38 = vpack.i.bf16 %v1337_v43, %v1176_v39  ;;  %v4264_v43 = vshll.u32 %v3631_v36, 16 }
 0x11b   :  { %v4242_v60 = vrot.slane %v1254_v9, %v3428_v10  ;;  %6483 = vst [vmem:[#allocation102_spill] sm:$0xff] %v4247_v13  ;;  %v1659_v9 = vrot.slane %v4254_v33, 7 }
 0x11c   :  { %1160 = vrot.lane.b32.xlu0 %v4190_v32, %s3382_s18 }
 0x11d   :  { %1162 = vrot.lane.b32.xlu1 %v4196_v50, %s3382_s18  ;;  %6482 = vst [vmem:[#allocation101_spill] sm:$0xff] %v4242_v60  ;;  %v1277_v1 = vcombine.high %v4242_v60, %v4242_v60 }
 0x120   :  { %1164 = vrot.lane.b32.xlu0 %v1157_v54, %s3382_s18  ;;  %v4223_v54 = vrot.slane %v1195_v30, %v3428_v10  ;;  %v4237_v30 = vrot.slane %v1196_v27, %v3428_v10  ;;  %v1658_v27 = vrot.slane %v4199_v53, 7 }
 0x121   :  { %1166 = vrot.lane.b32.xlu1 %v3451_v17, %s3382_s18 }
 0x122   :  { %6480 = vst [vmem:[#allocation99_spill] sm:$0xff] %v4223_v54  ;;  %v1211_v11 = vcombine.high %v4223_v54, %v4223_v54  ;;  %6481 = vst [vmem:[#allocation100_spill] sm:$0xff] %v4237_v30 }
 0x124   :  { %3160 = vrot.lane.b32.xlu0 %v3159_v29, %s3383_s19  ;;  %v1278_v29 = vcombine.high %v4247_v13, %v4247_v13 }
 0x125   :  { %3165 = vrot.lane.b32.xlu1 %v3164_v2, %s3383_s19  ;;  %v4267_v2 = vshll.u32 %v3970_v6, 16  ;;  %v1661_v6 = vrot.slane %v4264_v43, 7 }
 0x127   :  { %v1660_v36 = vrot.slane %v4267_v2, 7 }
 0x128   :  { %3170 = vrot.lane.b32.xlu0 %v3169_v38, %s3383_s19  ;;  %v1638_v38 = vcombine.high %v1253_v42, %v1253_v42 }
 0x129   :  { %1212 = vrot.lane.b32.xlu1 %v4223_v54, %s3383_s19  ;;  %v3179_v7 = vpack.i.bf16 %v1661_v6, %v1660_v36  ;;  %v1700_v36 = vrot.slane %v4159_v19, 6 }
 0x12a   :  { %v4261_v39 = vrot.slane %v1638_v38, %v3428_v10  ;;  %v4276_v38 = vshll.u32 %v3607_v8, 16 }
 0x12c   :  { %1214 = vrot.lane.b32.xlu0 %v3451_v17, %s3383_s19  ;;  %6484 = vst [vmem:[#allocation103_spill] sm:$0xff] %v4261_v39  ;;  %v1646_v42 = vcombine.high %v4261_v39, %v4261_v39  ;;  %v1657_v37 = vrot.slane %v4276_v38, 7 }
 0x12d   :  { %1216 = vrot.lane.b32.xlu1 %v1211_v11, %s3383_s19 }
 0x130   :  { %1218 = vrot.lane.b32.xlu0 %v3493_v28, %s3383_s19 }
 0x131   :  { %1220 = vrot.lane.b32.xlu1 %v4237_v30, %s3383_s19 }
 0x134   :  { %1279 = vrot.lane.b32.xlu0 %v4242_v60, %s3382_s18 }
 0x135   :  { %1281 = vrot.lane.b32.xlu1 %v4247_v13, %s3382_s18 }
 0x138   :  { %1283 = vrot.lane.b32.xlu0 %v1277_v1, %s3382_s18  ;;  %v3174_v1 = vpack.i.bf16 %v1659_v9, %v1658_v27  ;;  %v1699_v27 = vrot.slane %v4162_v25, 6  ;;  %v1696_v9 = vrot.slane %v3720_v47, 6 }
 0x139   :  { %1285 = vrot.lane.b32.xlu1 %v1278_v29, %s3382_s18  ;;  %v1294_v29 = vrot.slane %v4199_v53, 5 }
 0x13b   :  { %v3184_v18 = vpack.i.bf16 %v1294_v29, %v1657_v37  ;;  %v1438_v37 = vcombine.low %v4173_v15, %v4173_v15  ;;  %v1734_v15 = vrot.slane %v3773_v46, 5  ;;  %v1736_v29 = vrot.slane %v4162_v25, 5 }
 0x13c   :  { %1647 = vrot.lane.b32.xlu0 %v4261_v39, %s3382_s18 }
 0x13d   :  { %1649 = vrot.lane.b32.xlu1 %v1646_v42, %s3382_s18  ;;  %v1698_v42 = vrot.slane %v3954_v0, 6 }
 0x140   :  { %1651 = vrot.lane.b32.xlu0 %v3463_v20, %s3382_s18 }
 0x141   :  { %3175 = vrot.lane.b32.xlu1 %v3174_v1, %s3382_s18  ;;  %v1735_v1 = vrot.slane %v3954_v0, 5 }
 0x144   :  { %3180 = vrot.lane.b32.xlu0 %v3179_v7, %s3382_s18  ;;  %v3194_v7 = vpack.i.bf16 %v1696_v9, %v1700_v36  ;;  %v3028_v9 = vunpack.i.h.bf16 %v3844_v40  ;;  %v3027_v36 = vunpack.i.l.bf16 %v3844_v40  ;;  %v534_v40 = vsel %vm3802_vm2, %v3590_v63, %v3512_v35  ;;  %v6569_v35 = vld [vmem:[#allocation70_spill] sm:$0xff] }
 0x145   :  { %3185 = vrot.lane.b32.xlu1 %v3184_v18, %s3382_s18  ;;  %v3189_v18 = vpack.i.bf16 %v1699_v27, %v1698_v42  ;;  %v1737_v42 = vrot.slane %v4159_v19, 5  ;;  %v3033_v27 = vunpack.i.h.bf16 %v3836_v61 }
 0x146   :  { %v164_v63 = vsel %vm6287_vm6, %v3027_v36, %v3028_v9  ;;  %v547_v36 = vsel %vm6284_vm0, %v534_v40, %v129_v45 }
 0x148   :  { %1683 = vrot.lane.b32.xlu0 %v3451_v17, %s3387_s24 }
 0x149   :  { %1685 = vrot.lane.b32.xlu1 %v1211_v11, %s3387_s24  ;;  %v4301_v11 = vrot.slane %v1438_v37, %v3428_v10  ;;  %v3032_v37 = vunpack.i.l.bf16 %v3836_v61  ;;  %v6486_v61 = vld [vmem:[#allocation37_spill] sm:$0xff] }
 0x14b   :  { %6485 = vst [vmem:[#allocation104_spill] sm:$0xff] %v4301_v11  ;;  %v1720_v6 = vcombine.high %v4301_v11, %v4301_v11  ;;  %v166_v44 = vsel %vm6287_vm6, %v3032_v37, %v3033_v27 }
 0x14c   :  { %1687 = vrot.lane.b32.xlu0 %v3493_v28, %s3387_s24 }
 0x14d   :  { %1689 = vrot.lane.b32.xlu1 %v4237_v30, %s3387_s24 }
 0x150   :  { %1681 = vrot.lane.b32.xlu0 %v4223_v54, %s3387_s24 }
 0x151   :  { %3190 = vrot.lane.b32.xlu1 %v3189_v18, %s3384_s0  ;;  %v3199_v18 = vpack.i.bf16 %v1735_v1, %v1734_v15  ;;  %v127_v15 = vsel %vm6287_vm6, %v6487_v23, %v6486_v61  ;;  %v6488_v1 = vld [vmem:[#allocation10_spill] sm:$0xff]  ;;  %v165_v23 = vsel %vm6287_vm6, %v3028_v9, %v3032_v37  ;;  %v6496_v37 = vld [vmem:[#allocation39_spill] sm:$0xff] }
 0x154   :  { %3195 = vrot.lane.b32.xlu0 %v3194_v7, %s3384_s0  ;;  %v1377_v7 = vrot.slane %v3773_v46, 3  ;;  %v6577_v46 = vmov 0 }
 0x155   :  { %1366 = vrot.lane.b32.xlu1 %v4186_v62, %s3384_s0  ;;  %v6583_v62 = vld [vmem:[#allocation71_spill] sm:$0xff] }
 0x158   :  { %1723 = vrot.lane.b32.xlu0 %v1720_v6, %s3384_s0  ;;  %v1733_v6 = vrot.slane %v3720_v47, 5  ;;  %v6582_v47 = vld [vmem:[#allocation72_spill] sm:$0xff] }
 0x159   :  { %1725 = vrot.lane.b32.xlu1 %v4196_v50, %s3384_s0  ;;  %v3204_v50 = vpack.i.bf16 %v1737_v42, %v1736_v29  ;;  %v532_v29 = vsel %vm3802_vm2, %v6489_v34, %v6488_v1  ;;  %v128_v42 = vsel %vm6287_vm6, %v6486_v61, %v3791_v12  ;;  %v273_v34 = vcombine.low %v6492_v16, %v6492_v16  ;;  %v6493_v12 = vld [vmem:[#allocation36_spill] sm:$0xff] }
 0x15a   :  { %v3209_v22 = vpack.i.bf16 %v1377_v7, %v1733_v6  ;;  %v130_v61 = vsel %vm6287_vm6, %v3806_v41, %v6493_v12  ;;  %v543_v9 = vsel %vm6284_vm0, %v533_v52, %v128_v42  ;;  %v4373_v41 = vsel %vm3824_vm5, %v547_v36, %v166_v44  ;;  %v6499_v6 = vld [vmem:[#allocation41_spill] sm:$0xff]  ;;  %v6502_v52 = vld [vmem:[#allocation42_spill] sm:$0xff]  ;;  %v6504_v44 = vld [vmem:[#allocation19_spill] sm:$0xff] }
 0x15b   :  { %6498 = vst [vmem:[#allocation34_spill] sm:$0xff] %v4373_v41  ;;  %v209_v45 = vsel %vm6285_vm7, %v6500_v56, %v6499_v6  ;;  %v4380_v40 = vsel %vm3824_vm5, %v543_v9, %v165_v23  ;;  %v6506_v36 = vld [vmem:[#allocation43_spill] sm:$0xff]  ;;  %v4395_v23 = vrot.slane %v273_v34, %v3428_v10  ;;  %v551_v9 = vsel %vm6284_vm0, %v535_v14, %v130_v61  ;;  %v6510_v42 = vld [vmem:[#allocation8_spill] sm:$0xff] }
 0x15c   :  { %1727 = vrot.lane.b32.xlu0 %v4223_v54, %s3384_s0  ;;  %6501 = vst [vmem:[#allocation5_spill] sm:$0xff] %v4380_v40  ;;  %v6512_v14 = vld [vmem:[#allocation4_spill] sm:$0xff]  ;;  %v6518_v51 = vrot.slane %v6510_v42, 6  ;;  %v6522_v42 = vld [vmem:[#allocation29_spill] sm:$0xff] }
 0x15d   :  { %1721 = vrot.lane.b32.xlu1 %v4301_v11, %s3384_s0  ;;  %6507 = vst [vmem:[#allocation32_spill] sm:$0xff] %v4395_v23 }
 0x160   :  { %3200 = vrot.lane.b32.xlu0 %v3199_v18, %s3385_s22  ;;  %v539_v18 = vsel %vm6284_vm0, %v532_v29, %v127_v15  ;;  %v210_v15 = vsel %vm6285_vm7, %v6499_v6, %v6502_v52  ;;  %vm674_vm0 = vsmask.f32 6400 }
 0x161   :  { %3205 = vrot.lane.b32.xlu1 %v3204_v50, %s3385_s22  ;;  %v4366_v16 = vsel %vm3824_vm5, %v539_v18, %v164_v63  ;;  %v6497_v50 = vunpack.i.l.bf16 %v6496_v37  ;;  %v6505_v63 = vld [vmem:[#allocation20_spill] sm:$0xff]  ;;  %v211_v18 = vsel %vm6285_vm7, %v6502_v52, %v6506_v36  ;;  %v567_v52 = vsel %vm6271_vm3, %v4380_v40, %v209_v45  ;;  %v6513_v36 = vld [vmem:[#allocation3_spill] sm:$0xff] }
 0x162   :  { %6495 = vst [vmem:[#allocation37_spill] sm:$0xff] %v4366_v16  ;;  %v571_v34 = vsel %vm6271_vm3, %v4373_v41, %v210_v15  ;;  %v4423_v45 = vcombine.high %v4395_v23, %v4395_v23  ;;  %v1295_v15 = vrot.slane %v4254_v33, 5  ;;  %v3037_v40 = vunpack.i.l.bf16 %v6517_v24 }
 0x163   :  { %v167_v7 = vsel %vm6287_vm6, %v3033_v27, %v6497_v50  ;;  %v6503_v27 = vld [vmem:[#allocation6_spill] sm:$0xff] }
 0x164   :  { %1407 = vrot.lane.b32.xlu0 %v3451_v17, %s3385_s22  ;;  %v1758_v29 = vcombine.low %v6503_v27, %v6503_v27  ;;  %v6508_v50 = vld [vmem:[#allocation38_spill] sm:$0xff]  ;;  %6514 = vst [vmem:[#allocation36_spill] sm:$0xff] %v4423_v45 }
 0x165   :  { %3210 = vrot.lane.b32.xlu1 %v3209_v22, %s3385_s22  ;;  %v208_v6 = vsel %vm6285_vm7, %v6508_v50, %v6500_v56  ;;  %v4412_v22 = vsel %vm3824_vm5, %v551_v9, %v167_v7  ;;  %v1757_v56 = vcombine.low %v6512_v14, %v6512_v14  ;;  %v1255_v50 = vcombine.low %v6513_v36, %v6513_v36 }
 0x166   :  { %v563_v12 = vsel %vm6271_vm3, %v4366_v16, %v208_v6  ;;  %6511 = vst [vmem:[#allocation28_spill] sm:$0xff] %v4412_v22  ;;  %v575_v61 = vsel %vm6271_vm3, %v4412_v22, %v211_v18  ;;  %v4429_v7 = vcombine.low %v3451_v17, %v3451_v17  ;;  %v6515_v18 = vrot.slane %v6504_v44, 6 }
 0x167   :  { %v6516_v6 = vrot.slane %v6505_v63, 6  ;;  %v580_v16 = vsel %vm4058_vm15, %v563_v12, %v6518_v51  ;;  %v6519_v22 = vrot.slane %v6509_v49, 6  ;;  %v1300_v51 = vrot.slane %v4264_v43, 5  ;;  %v6524_v49 = vld [vmem:[#allocation50_spill] sm:$0xff] }
 0x168   :  { %1759 = vrot.lane.b32.xlu0 %v1758_v29, %s3385_s22  ;;  %v1296_v29 = vrot.slane %v4267_v2, 5  ;;  %v581_v9 = vsel %vm4058_vm15, %v567_v52, %v6515_v18  ;;  %v6520_v52 = vld [vmem:[#allocation45_spill] sm:$0xff]  ;;  %v3023_v12 = vunpack.i.h.bf16 %v6496_v37  ;;  %v587_v24 = vsel %vm6277_vm8, %v580_v16, %v4395_v23 }
 0x169   :  { %1761 = vrot.lane.b32.xlu1 %v6503_v27, %s3385_s22  ;;  %v582_v36 = vsel %vm4058_vm15, %v571_v34, %v6516_v6  ;;  %v583_v41 = vsel %vm4058_vm15, %v575_v61, %v6519_v22  ;;  %v3042_v63 = vunpack.i.l.bf16 %v6520_v52  ;;  %v4455_v34 = vrot.slane %v1255_v50, %v3428_v10 }
 0x16a   :  { %v1293_v6 = vrot.slane %v4276_v38, 5  ;;  %v591_v22 = vsel %vm6277_vm8, %v581_v9, %v6522_v42  ;;  %vm650_vm3 = vsmask.f32 5376  ;;  %v3214_v61 = vpack.i.bf16 %v1296_v29, %v1295_v15  ;;  %v6530_v29 = vld [vmem:[#allocation47_spill] sm:$0xff] }
 0x16b   :  { %6521 = vst [vmem:[#allocation39_spill] sm:$0xff] %v4455_v34  ;;  %v595_v18 = vsel %vm6277_vm8, %v582_v36, %v4423_v45  ;;  %v3048_v37 = vunpack.i.h.bf16 %v6524_v49  ;;  %v3047_v1 = vunpack.i.l.bf16 %v6524_v49  ;;  %v4473_v9 = vsel %vm6287_vm6, %v3023_v12, %v3037_v40  ;;  %v6531_v36 = vld [vmem:[#allocation46_spill] sm:$0xff]  ;;  %v6538_v42 = vld [vmem:[#allocation15_spill] sm:$0xff] }
 0x16c   :  { %1763 = vrot.lane.b32.xlu0 %v1757_v56, %s3385_s22  ;;  %v6523_v56 = vld [vmem:[#allocation31_spill] sm:$0xff]  ;;  %6525 = vst [vmem:[#allocation41_spill] sm:$0xff] %v4473_v9  ;;  %v4476_v16 = vsel %vm6287_vm6, %v3037_v40, %v3038_v57  ;;  %v4479_v23 = vsel %vm6287_vm6, %v3038_v57, %v3042_v63  ;;  %v6528_v15 = vunpack.i.h.bf16 %v6520_v52  ;;  %v4494_v49 = vsel %vm6287_vm6, %v6530_v29, %v3876_v58  ;;  %v6535_v52 = vld [vmem:[#allocation48_spill] sm:$0xff] }
 0x16d   :  { %1403 = vrot.lane.b32.xlu1 %v4429_v7, %s3385_s22  ;;  %v599_v50 = vsel %vm6277_vm8, %v583_v41, %v6523_v56  ;;  %6526 = vst [vmem:[#allocation35_spill] sm:$0xff] %v4476_v16  ;;  %6527 = vst [vmem:[#allocation42_spill] sm:$0xff] %v4479_v23  ;;  %v4489_v56 = vsel %vm6287_vm6, %v6531_v36, %v6530_v29  ;;  %v6534_v40 = vld [vmem:[#allocation51_spill] sm:$0xff]  ;;  %v3219_v57 = vpack.i.bf16 %v1293_v6, %v1300_v51  ;;  %v6537_v36 = vld [vmem:[#allocation52_spill] sm:$0xff] }
 0x16e   :  { %v4484_v41 = vsel %vm6287_vm6, %v3042_v63, %v6528_v15  ;;  %6532 = vst [vmem:[#allocation43_spill] sm:$0xff] %v4489_v56  ;;  %6533 = vst [vmem:[#allocation38_spill] sm:$0xff] %v4494_v49  ;;  %v3052_v12 = vunpack.i.l.bf16 %v6534_v40  ;;  %v4502_v63 = vsel %vm6287_vm6, %v3876_v58, %v6535_v52  ;;  %v3053_v15 = vunpack.i.h.bf16 %v6534_v40  ;;  %v6539_v51 = vld [vmem:[#allocation49_spill] sm:$0xff] }
 0x16f   :  { %6529 = vst [vmem:[#allocation6_spill] sm:$0xff] %v4484_v41  ;;  %6536 = vst [vmem:[#allocation3_spill] sm:$0xff] %v4502_v63  ;;  %v3057_v45 = vunpack.i.l.bf16 %v6537_v36  ;;  %v1321_v29 = vcombine.low %v6538_v42, %v6538_v42  ;;  %v605_v48 = vsel %vm4081_vm1, %v591_v22, %v4476_v16  ;;  %v604_v6 = vsel %vm4081_vm1, %v587_v24, %v4473_v9 }
 0x170   :  { %1287 = vrot.lane.b32.xlu0 %v4455_v34, %s3382_s18  ;;  %v4518_v58 = vsel %vm6287_vm6, %v6535_v52, %v6539_v51  ;;  %v393_v40 = vsel %vm6285_vm7, %v3047_v1, %v3048_v37  ;;  %vm4523_vm8 = vmand %vm6328_vm4, %vm626_vm9  ;;  %v611_v22 = vsel %vm6300_vm12, %v604_v6, %v4489_v56  ;;  %v606_v24 = vsel %vm4081_vm1, %v595_v18, %v4479_v23  ;;  %v6544_v51 = vld [vmem:[#allocation58_spill] sm:$0xff] }
 0x171   :  { %3215 = vrot.lane.b32.xlu1 %v3214_v61, %s3382_s18  ;;  %6540 = vst [vmem:[#allocation44_spill] sm:$0xff] %v4518_v58  ;;  %v6541_v61 = vmov 0  ;;  %v607_v52 = vsel %vm4081_vm1, %v599_v50, %v4484_v41  ;;  %v615_v1 = vsel %vm6300_vm12, %v605_v48, %v4494_v49  ;;  %v619_v36 = vsel %vm6300_vm12, %v606_v24, %v4502_v63  ;;  %v6545_v24 = vld [vmem:[#allocation54_spill] sm:$0xff]  ;;  %v6547_v63 = vld [vmem:[#allocation55_spill] sm:$0xff] }
 0x172   :  { %v6542_v61 = vsel %vm4523_vm8, 4294967295, %v6541_v61  ;;  %v394_v9 = vsel %vm6285_vm7, %v3048_v37, %v3052_v12  ;;  %v3063_v16 = vunpack.i.h.bf16 %v6544_v51  ;;  %v3062_v6 = vunpack.i.l.bf16 %v6544_v51  ;;  %v6546_v37 = vld [vmem:[#allocation53_spill] sm:$0xff]  ;;  %v6548_v51 = vld [vmem:[#allocation59_spill] sm:$0xff] }
 0x173   :  { %6543 = vst [vmem:[#allocation50_spill] sm:$0xff] %v6542_v61  ;;  %v623_v18 = vsel %vm6300_vm12, %v607_v52, %v4518_v58  ;;  %v395_v56 = vsel %vm6285_vm7, %v3052_v12, %v3053_v15  ;;  %v396_v50 = vsel %vm6285_vm7, %v3053_v15, %v3057_v45  ;;  %v628_v48 = vsel %vm4523_vm8, %v611_v22, %v393_v40  ;;  %v6549_v12 = vld [vmem:[#allocation56_spill] sm:$0xff]  ;;  %vm4572_vm7 = vmand %vm6327_vm13, %vm650_vm3 }
 0x174   :  { %3220 = vrot.lane.b32.xlu0 %v3219_v57, %s3382_s18  ;;  %v415_v41 = vsel %vm6330_vm10, %v6546_v37, %v6545_v24  ;;  %v416_v57 = vsel %vm6330_vm10, %v6545_v24, %v6547_v63  ;;  %v3068_v49 = vunpack.i.h.bf16 %v6548_v51  ;;  %v3067_v52 = vunpack.i.l.bf16 %v6548_v51  ;;  %v6551_v22 = vld [vmem:[#allocation60_spill] sm:$0xff] }
 0x175   :  { %1324 = vrot.lane.b32.xlu1 %v1321_v29, %s3383_s19  ;;  %v629_v45 = vsel %vm4523_vm8, %v615_v1, %v394_v9  ;;  %v417_v15 = vsel %vm6330_vm10, %v6547_v63, %v6549_v12  ;;  %v6550_v29 = vld [vmem:[#allocation57_spill] sm:$0xff]  ;;  %v3072_v37 = vunpack.i.l.bf16 %v6551_v22  ;;  %vm6325_vm9 = vcmask 1046528  }
 0x176   :  { %v418_v40 = vsel %vm6330_vm10, %v6549_v12, %v6550_v29  ;;  %v630_v24 = vsel %vm4523_vm8, %v619_v36, %v395_v56  ;;  %v434_v51 = vsel %vm6330_vm10, %v3062_v6, %v3063_v16  ;;  %v6552_v9 = vmov 0  ;;  %v6555_v63 = vld [vmem:[#allocation17_spill] sm:$0xff]  ;;  %v6556_v12 = vld [vmem:[#allocation23_spill] sm:$0xff] }
 0x177   :  { %v6553_v9 = vsel %vm4572_vm7, 4294967295, %v6552_v9  ;;  %v1320_v1 = vcombine.low %v6555_v63, %v6555_v63  ;;  %v2446_v29 = vcombine.low %v6556_v12, %v6556_v12  ;;  %v635_v58 = vsel %vm6328_vm4, %v628_v48, %v415_v41 }
 0x178   :  { %6554 = vst [vmem:[#allocation47_spill] sm:$0xff] %v6553_v9  ;;  %1326 = vrot.lane.b32.xlu0 %v3463_v20, %s3383_s19  ;;  %v639_v56 = vsel %vm6328_vm4, %v629_v45, %v416_v57  ;;  %v631_v36 = vsel %vm4523_vm8, %v623_v18, %v396_v50  ;;  %v4590_v6 = vcombine.low %v3463_v20, %v3463_v20  ;;  %vm697_vm3 = vcmask 1047552   ;;  %v6558_v50 = vld [vmem:[#allocation62_spill] sm:$0xff]  ;;  %v6559_v57 = vld [vmem:[#allocation61_spill] sm:$0xff] }
 0x179   :  { %1328 = vrot.lane.b32.xlu1 %v6538_v42, %s3383_s19  ;;  %vm698_vm6 = vsmask.f32 7424  ;;  %v4593_v23 = vsel %vm6328_vm4, %v630_v24, %v417_v15  ;;  %v647_v12 = vsel %vm6328_vm4, %v631_v36, %v418_v40  ;;  %v435_v41 = vsel %vm6330_vm10, %v3063_v16, %v3067_v52  ;;  %v6560_v24 = vld [vmem:[#allocation65_spill] sm:$0xff]  ;;  %v6563_v36 = vld [vmem:[#allocation63_spill] sm:$0xff] }
 0x17a   :  { %6557 = vst [vmem:[#allocation46_spill] sm:$0xff] %v4590_v6  ;;  %v4598_v48 = vsel %vm6330_vm10, %v3067_v52, %v3068_v49  ;;  %v437_v18 = vsel %vm6330_vm10, %v3068_v49, %v3072_v37  ;;  %v455_v45 = vsel %vm6329_vm11, %v6559_v57, %v6558_v50  ;;  %v652_v61 = vsel %vm4572_vm7, %v635_v58, %v434_v51  ;;  %v6562_v37 = vld [vmem:[#allocation64_spill] sm:$0xff]  ;;  %v6564_v51 = vld [vmem:[#allocation66_spill] sm:$0xff] }
 0x17b   :  { %v456_v15 = vsel %vm6329_vm11, %v6558_v50, %v3908_v59  ;;  %v3078_v40 = vunpack.i.h.bf16 %v6560_v24  ;;  %v3077_v16 = vunpack.i.l.bf16 %v6560_v24  ;;  %v4613_v52 = vrot.slane %v2446_v29, %v3428_v10 }
 0x17c   :  { %1330 = vrot.lane.b32.xlu0 %v1320_v1, %s3383_s19  ;;  %v653_v49 = vsel %vm4572_vm7, %v639_v56, %v435_v41  ;;  %v458_v58 = vsel %vm6329_vm11, %v6563_v36, %v6562_v37  ;;  %v3083_v57 = vunpack.i.h.bf16 %v6564_v51  ;;  %v3082_v50 = vunpack.i.l.bf16 %v6564_v51  ;;  %v6565_v51 = vld [vmem:[#allocation73_spill] sm:$0xff] }
 0x17d   :  { %6561 = vst [vmem:[#allocation51_spill] sm:$0xff] %v4613_v52  ;;  %1322 = vrot.lane.b32.xlu1 %v4590_v6, %s3383_s19  ;;  %v3073_v24 = vunpack.i.h.bf16 %v6551_v22  ;;  %v4626_v1 = vsel %vm6327_vm13, %v652_v61, %v455_v45  ;;  %v655_v29 = vsel %vm4572_vm7, %v647_v12, %v437_v18  ;;  %v663_v41 = vsel %vm6327_vm13, %v653_v49, %v456_v15  ;;  %v6567_v18 = vld [vmem:[#allocation26_spill] sm:$0xff] }
 0x17e   :  { %v974_v56 = vpop.permute.xlu0 %973  ;;  %v4634_v37 = vsel %vm6329_vm11, %v3908_v59, %v6563_v36  ;;  %v3092_v21 = vunpack.i.l.bf16 %v6565_v51  ;;  %v3388_v22 = vmov 65535   ;;  %v671_v45 = vsel %vm6327_vm13, %v655_v29, %v458_v58  ;;  %v6568_v29 = vld [vmem:[#allocation67_spill] sm:$0xff] }
 0x17f   :  { %v976_v60 = vpop.permute.xlu1 %975  ;;  %v996_v61 = vsel %vm6300_vm12, 4294967295, %v3388_v22  ;;  %v474_v12 = vsel %vm6329_vm11, %v3077_v16, %v3078_v40  ;;  %v4645_v59 = vcombine.high %v4613_v52, %v4613_v52  ;;  %v2447_v15 = vcombine.low %v6567_v18, %v6567_v18  ;;  %vm4667_vm12 = vmand %vm6325_vm9, %vm674_vm0 }
 0x180   :  { %2727 = vrot.lane.b32.xlu0 %v4613_v52, %s3389_s25  ;;  %v475_v49 = vsel %vm6329_vm11, %v3078_v40, %v3082_v50  ;;  %v4651_v36 = vsel %vm6329_vm11, %v3082_v50, %v3083_v57  ;;  %v1338_v16 = vrot.slane %v4254_v33, 4  ;;  %v1339_v58 = vrot.slane %v4267_v2, 4  ;;  %v6570_v52 = vld [vmem:[#allocation69_spill] sm:$0xff]  ;;  %vm4682_vm0 = vmand %vm697_vm3, %vm698_vm6 }
 0x181   :  { %6566 = vst [vmem:[#allocation48_spill] sm:$0xff] %v4645_v59  ;;  %2729 = vrot.lane.b32.xlu1 %v3607_v8, %s3389_s25  ;;  %v3087_v22 = vunpack.i.l.bf16 %v6568_v29  ;;  %v503_v44 = vsel %vm6326_vm14, %v6570_v52, %v6569_v35  ;;  %v983_v18 = vsel %vm6330_vm10, %v974_v56, %v976_v60  ;;  %v4663_v40 = vsel %vm6328_vm4, %v996_v61, 0  ;;  %v6575_v8 = vld [vmem:[#allocation74_spill] sm:$0xff] }
 0x182   :  { %v978_v6 = vpop.permute.xlu0 %977  ;;  %6571 = vst [vmem:[#allocation52_spill] sm:$0xff] %v4663_v40  ;;  %v6572_v50 = vmov 0  ;;  %v3098_v13 = vunpack.i.h.bf16 %v6575_v8  ;;  %v3097_v29 = vunpack.i.l.bf16 %v6575_v8  ;;  %v6576_v11 = vunpack.i.h.bf16 %v6565_v51  ;;  %v6721_v4 = vld [vmem:[#allocation46_spill] sm:$0xff] }
 0x183   :  { %v6573_v50 = vsel %vm4667_vm12, 4294967295, %v6572_v50  ;;  %v980_v14 = vpop.permute.xlu1 %979  ;;  %v984_v39 = vsel %vm6330_vm10, %v976_v60, %v978_v6  ;;  %v6578_v46 = vsel %vm4682_vm0, 4294967295, %v6577_v46  ;;  %v4687_v8 = vrot.slane %v2447_v15, %v3428_v10  ;;  %v6581_v10 = vld [vmem:[#allocation68_spill] sm:$0xff] }
 0x184   :  { %6574 = vst [vmem:[#allocation15_spill] sm:$0xff] %v6573_v50  ;;  %v522_v56 = vsel %vm6330_vm10, %v3092_v21, %v6576_v11  ;;  %2731 = vrot.lane.b32.xlu0 %v4645_v59, %s3389_s25  ;;  %v1002_v61 = vand.u32 %v4663_v40, %v984_v39  ;;  %6579 = vst [vmem:[#allocation58_spill] sm:$0xff] %v6578_v46  ;;  %v1336_v60 = vrot.slane %v4276_v38, 4  ;;  %v1340_v34 = vrot.slane %v4264_v43, 4 }
 0x185   :  { %6580 = vst [vmem:[#allocation54_spill] sm:$0xff] %v4687_v8  ;;  %2733 = vrot.lane.b32.xlu1 %v3966_v31, %s3389_s25  ;;  %v999_v11 = vand.u32 %v4663_v40, %v983_v18  ;;  %v677_v39 = vsel %vm4667_vm12, %v663_v41, %v475_v49  ;;  %v3224_v59 = vpack.i.bf16 %v1339_v58, %v1338_v16  ;;  %vm6586_vm6 = vcmask 1039360  }
 0x186   :  { %v676_v54 = vsel %vm4667_vm12, %v4626_v1, %v474_v12  ;;  %v477_v15 = vsel %vm6329_vm11, %v3083_v57, %v3087_v22  ;;  %v502_v30 = vsel %vm6326_vm14, %v6581_v10, %v6570_v52  ;;  %1022 = vmatprep.subr.bf16.mxu0 %v1002_v61  ;;  %v982_v19 = vpop.permute.xlu0 %981  ;;  %v687_v31 = vsel %vm6325_vm9, %v677_v39, %v503_v44  ;;  %v6585_v61 = vld [vmem:[#allocation75_spill] sm:$0xff]  ;;  %vm6587_vm3 = vmmov %vm6586_vm6 }
 0x187   :  { %v985_v18 = vsel %vm6330_vm10, %v978_v6, %v980_v14  ;;  %v505_v41 = vsel %vm6326_vm14, %v6583_v62, %v6582_v47  ;;  %v4708_v49 = vpop.permute.xlu1 %3150  ;;  %1023 = vmatpush1.bf16.msra.mxu0 %v999_v11  ;;  %v701_v57 = vsel %vm4682_vm0, %v687_v31, %v522_v56  ;;  %v986_v1 = vsel %vm6330_vm10, %v980_v14, %v982_v19 }
 0x188   :  { %v521_v10 = vsel %vm6330_vm10, %v3073_v24, %v3092_v21  ;;  %1024 = vmatprep.subr.bf16.mxu0 %v701_v57  ;;  %2735 = vrot.lane.b32.xlu0 %v4687_v8, %s3389_s25  ;;  %v1008_v44 = vand.u32 %v4663_v40, %v986_v1  ;;  %v3229_v6 = vpack.i.bf16 %v1336_v60, %v1340_v34  ;;  %v3152_v22 = vunpack.i.l.bf16 %v4708_v49 }
 0x189   :  { %v524_v52 = vsel %vm6330_vm10, %v3097_v29, %v3098_v13  ;;  %3225 = vrot.lane.b32.xlu1 %v3224_v59, %s3383_s19  ;;  %v683_v47 = vsel %vm6325_vm9, %v676_v54, %v502_v30  ;;  %v1005_v12 = vand.u32 %v4663_v40, %v985_v18  ;;  %v1361_v31 = vcombine.low %v4190_v32, %v4190_v32 }
 0x18a   :  { %v679_v21 = vsel %vm4667_vm12, %v671_v45, %v477_v15  ;;  %v654_v19 = vsel %vm4572_vm7, %v4593_v23, %v4598_v48  ;;  %v504_v13 = vsel %vm6326_vm14, %v6569_v35, %v6583_v62  ;;  %1065 = vmatprep.subr.bf16.mxu1 %v1008_v44  ;;  %v4732_v14 = vpop.permute.xlu0 %3155  ;;  %v700_v54 = vsel %vm4682_vm0, %v683_v47, %v521_v10  ;;  %vm6589_vm14 = vmmov %vm6587_vm3 }
 0x18b   :  { %v695_v30 = vsel %vm6325_vm9, %v679_v21, %v505_v41  ;;  %v667_v34 = vsel %vm6327_vm13, %v654_v19, %v4634_v37  ;;  %v1159_v24 = vpop.permute.xlu1 %1158  ;;  %1025 = vmatpush1.bf16.msra.mxu0 %v700_v54  ;;  %1066 = vmatpush1.bf16.msra.mxu1 %v1005_v12  ;;  %v6584_v48 = vunpack.i.h.bf16 %v6565_v51  ;;  %v3113_v60 = vunpack.i.h.bf16 %v6585_v61 }
 0x18c   :  { %v703_v23 = vsel %vm4682_vm0, %v695_v30, %v524_v52  ;;  %3230 = vrot.lane.b32.xlu0 %v3229_v6, %s3383_s19  ;;  %v678_v62 = vsel %vm4667_vm12, %v667_v34, %v4651_v36  ;;  %v3153_v36 = vunpack.i.h.bf16 %v4708_v49  ;;  %v3157_v41 = vunpack.i.l.bf16 %v4732_v14 }
 0x18d   :  { %v523_v35 = vsel %vm6330_vm10, %v6584_v48, %v3097_v29  ;;  %1067 = vmatprep.subr.bf16.mxu1 %v703_v23  ;;  %1364 = vrot.lane.b32.xlu1 %v1361_v31, %s3384_s0  ;;  %v691_v37 = vsel %vm6325_vm9, %v678_v62, %v504_v13  ;;  %v1125_v18 = vsel %vm6586_vm6, %v3113_v60, %v3152_v22  ;;  %vm6588_vm9 = vmmov %vm6587_vm3  ;;  %vm6590_vm13 = vcmask 1031168  }
 0x18e   :  { %v1161_v45 = vpop.permute.xlu0 %1160  ;;  %v702_v59 = vsel %vm4682_vm0, %v691_v37, %v523_v35  ;;  %v6331_v52 = vrot.slane %v4276_v38, 6  ;;  %v6334_v47 = vrot.slane %v4199_v53, 6  ;;  %v1484_v12 = vsel %vm3802_vm2, %v3451_v17, %v1125_v18  ;;  %vm6591_vm6 = vmmov %vm6590_vm13 }
 0x18f   :  { %v1163_v16 = vpop.permute.xlu1 %1162  ;;  %1068 = vmatpush1.bf16.msra.mxu1 %v702_v59  ;;  %v1168_v1 = vsel %vm6588_vm9, %v1159_v24, %v1161_v45  ;;  %vm6594_vm9 = vcmask 1040384   ;;  %vm6598_vm10 = vmmov %vm6591_vm6 }
 0x190   :  { %1368 = vrot.lane.b32.xlu0 %v4190_v32, %s3384_s0  ;;  %v1126_v32 = vsel %vm6587_vm3, %v3152_v22, %v3153_v36  ;;  %v1169_v49 = vsel %vm6589_vm14, %v1161_v45, %v1163_v16  ;;  %vm6592_vm14 = vmmov %vm6587_vm3  ;;  %v1490_v30 = vsel %vm6594_vm9, %v1484_v12, %v1168_v1  ;;  %v6332_v1 = vrot.slane %v4267_v2, 6 }
 0x191   :  { %1370 = vrot.lane.b32.xlu1 %v4429_v7, %s3384_s0  ;;  %v6336_v7 = vunpack.i.h.bf16 %v4732_v14  ;;  %v1485_v31 = vsel %vm3802_vm2, %v6503_v27, %v1126_v32  ;;  %v1127_v13 = vsel %vm6592_vm14, %v3153_v36, %v3157_v41  ;;  %vm6600_vm14 = vcmask 1041408  }
 0x192   :  { %v1165_v51 = vpop.permute.xlu0 %1164 }
 0x193   :  { %v4756_v58 = vpop.permute.xlu1 %1166 }
 0x196   :  { %v3161_v29 = vpop.permute.xlu0 %3160 }
 0x197   :  { %v3166_v56 = vpop.permute.xlu1 %3165  ;;  %v3163_v11 = vunpack.i.h.bf16 %v3161_v29  ;;  %v3162_v39 = vunpack.i.l.bf16 %v3161_v29  ;;  %v6604_v29 = vld [vmem:[#allocation9_spill] sm:$0xff] }
 0x198   :  { %v3167_v15 = vunpack.i.l.bf16 %v3166_v56  ;;  %v3168_v6 = vunpack.i.h.bf16 %v3166_v56 }
 0x199   :  { %v1187_v44 = vsel %vm6590_vm13, %v3162_v39, %v3163_v11  ;;  %vm6593_vm13 = vmmov %vm6587_vm3  ;;  %v6333_v39 = vrot.slane %v4254_v33, 6 }
 0x19a   :  { %v4765_v57 = vpop.permute.xlu0 %3170  ;;  %v1188_v21 = vsel %vm6591_vm6, %v3163_v11, %v3167_v15  ;;  %v1128_v54 = vsel %vm6593_vm13, %v3157_v41, %v6336_v7  ;;  %vm6595_vm3 = vmmov %vm6594_vm9  ;;  %v4792_v48 = vsel %vm3824_vm5, %v1490_v30, %v1187_v44  ;;  %v1189_v62 = vsel %vm6591_vm6, %v3167_v15, %v3168_v6 }
 0x19b   :  { %v1213_v10 = vpop.permute.xlu1 %1212  ;;  %v6335_v19 = vunpack.i.l.bf16 %v4765_v57  ;;  %v1494_v34 = vsel %vm6595_vm3, %v1485_v31, %v1169_v49  ;;  %vm6596_vm4 = vmmov %vm6593_vm13  ;;  %6599 = vst [vmem:[#allocation53_spill] sm:$0xff] %v4792_v48  ;;  %v1487_v56 = vsel %vm3802_vm2, %v6604_v29, %v1128_v54 }
 0x19c   :  { %v1170_v17 = vsel %vm6596_vm4, %v1163_v16, %v1165_v51  ;;  %vm6597_vm11 = vmmov %vm6596_vm4  ;;  %v4800_v59 = vsel %vm3824_vm5, %v1494_v34, %v1188_v21  ;;  %v1486_v16 = vsel %vm3802_vm2, %v3493_v28, %v1127_v13 }
 0x19d   :  { %v1171_v27 = vsel %vm6597_vm11, %v1165_v51, %v4756_v58  ;;  %vm6601_vm13 = vmmov %vm6591_vm6 }
 0x19e   :  { %v1215_v24 = vpop.permute.xlu0 %1214  ;;  %vm6603_vm11 = vmmov %vm6600_vm14 }
 0x19f   :  { %v1222_v23 = vsel %vm6598_vm10, %v1213_v10, %v1215_v24  ;;  %v1217_v35 = vpop.permute.xlu1 %1216  ;;  %vm6602_vm10 = vmmov %vm6591_vm6 }
 0x1a0   :  { %v1510_v37 = vsel %vm6600_vm14, %v4792_v48, %v1222_v23  ;;  %v1223_v45 = vsel %vm6601_vm13, %v1215_v24, %v1217_v35  ;;  %v1190_v51 = vsel %vm6602_vm10, %v3168_v6, %v6335_v19  ;;  %vm6605_vm4 = vmmov %vm6595_vm3  ;;  %vm6611_vm10 = vcmask 1039360   ;;  %v6622_v19 = vld [vmem:[#allocation18_spill] sm:$0xff] }
 0x1a1   :  { %v1524_v36 = vsel %vm4058_vm15, %v1510_v37, %v6331_v52  ;;  %v1514_v22 = vsel %vm6603_vm11, %v4800_v59, %v1223_v45  ;;  %v1498_v61 = vsel %vm6605_vm4, %v1486_v16, %v1170_v17  ;;  %vm6606_vm9 = vmmov %vm6595_vm3 }
 0x1a2   :  { %v1219_v60 = vpop.permute.xlu0 %1218  ;;  %v1525_v28 = vsel %vm4058_vm15, %v1514_v22, %v6334_v47  ;;  %v1502_v11 = vsel %vm6606_vm9, %v1487_v56, %v1171_v27  ;;  %vm6607_vm3 = vmmov %vm6591_vm6  ;;  %v4827_v18 = vsel %vm3824_vm5, %v1498_v61, %v1189_v62 }
 0x1a3   :  { %v1224_v15 = vsel %vm6607_vm3, %v1217_v35, %v1219_v60  ;;  %v1221_v32 = vpop.permute.xlu1 %1220  ;;  %vm6608_vm6 = vmmov %vm6603_vm11  ;;  %v4835_v10 = vsel %vm3824_vm5, %v1502_v11, %v1190_v51  ;;  %vm6613_vm11 = vcmask 1042432  }
 0x1a4   :  { %v1518_v41 = vsel %vm6608_vm6, %v4827_v18, %v1224_v15  ;;  %vm6609_vm14 = vmmov %vm6607_vm3 }
 0x1a5   :  { %v1225_v49 = vsel %vm6609_vm14, %v1219_v60, %v1221_v32  ;;  %v1526_v44 = vsel %vm4058_vm15, %v1518_v41, %v6333_v39  ;;  %vm6610_vm13 = vmmov %vm6608_vm6 }
 0x1a6   :  { %v1522_v6 = vsel %vm6610_vm13, %v4835_v10, %v1225_v49  ;;  %v1280_v31 = vpop.permute.xlu0 %1279  ;;  %vm6614_vm4 = vmmov %vm6611_vm10  ;;  %v1773_v49 = vsel %vm3802_vm2, %v6555_v63, %v4264_v43 }
 0x1a7   :  { %v4847_v12 = vsel %vm4058_vm15, %v1522_v6, %v6332_v1  ;;  %v4849_v21 = vpop.permute.xlu1 %1281  ;;  %vm6615_vm9 = vmmov %vm6613_vm11  ;;  %v6619_v6 = vld [vmem:[#allocation16_spill] sm:$0xff] }
 0x1a8   :  { %v4853_v13 = vsel %vm6611_vm10, %v1280_v31, %v4849_v21  ;;  %vm6616_vm3 = vmmov %vm6614_vm4  ;;  %v1771_v31 = vsel %vm3802_vm2, %v6619_v6, %v4254_v33 }
 0x1a9   :  { %6612 = vst [vmem:[#allocation55_spill] sm:$0xff] %v4853_v13  ;;  %v4857_v54 = vsel %vm6613_vm11, %v1524_v36, %v4853_v13  ;;  %vm6618_vm6 = vmmov %vm6615_vm9 }
 0x1aa   :  { %v1284_v30 = vpop.permute.xlu0 %1283  ;;  %vm6620_vm14 = vmmov %vm6616_vm3 }
 0x1ab   :  { %v4861_v34 = vsel %vm6614_vm4, %v4849_v21, %v1284_v30  ;;  %v4863_v24 = vpop.permute.xlu1 %1285  ;;  %vm6621_vm13 = vmmov %vm6616_vm3  ;;  %vm1691_vm4 = vcmask 924672  }
 0x1ac   :  { %v4867_v17 = vsel %vm6615_vm9, %v1525_v28, %v4861_v34  ;;  %v4871_v27 = vsel %vm6616_vm3, %v1284_v30, %v4863_v24  ;;  %vm6623_vm10 = vmmov %vm6616_vm3  ;;  %vm6626_vm9 = vcmask 1040384  }
 0x1ad   :  { %6617 = vst [vmem:[#allocation59_spill] sm:$0xff] %v4871_v27  ;;  %v4875_v23 = vsel %vm6618_vm6, %v1526_v44, %v4871_v27  ;;  %v1770_v44 = vsel %vm3802_vm2, %v6538_v42, %v4199_v53  ;;  %v1772_v42 = vsel %vm3802_vm2, %v6622_v19, %v4267_v2  ;;  %vm6625_vm11 = vmmov %vm6616_vm3 }
 0x1ae   :  { %v4877_v35 = vpop.permute.xlu0 %1647  ;;  %vm6627_vm3 = vmmov %vm6626_vm9 }
 0x1af   :  { %v1650_v62 = vpop.permute.xlu1 %1649  ;;  %v1654_v30 = vsel %vm6620_vm14, %v4877_v35, %v4863_v24  ;;  %vm6628_vm6 = vmmov %vm6623_vm10 }
 0x1b0   :  { %v1655_v52 = vsel %vm6621_vm13, %v4863_v24, %v1650_v62  ;;  %v1780_v40 = vsel %vm6626_vm9, %v1770_v44, %v1654_v30  ;;  %vm6629_vm14 = vmmov %vm6628_vm6  ;;  %vm6636_vm9 = vcmask 916480  }
 0x1b1   :  { %v1784_v8 = vsel %vm6627_vm3, %v1771_v31, %v1655_v52  ;;  %vm6630_vm13 = vmmov %vm6627_vm3 }
 0x1b2   :  { %v1652_v37 = vpop.permute.xlu0 %1651 }
 0x1b3   :  { %v4879_v45 = vpop.permute.xlu1 %3175  ;;  %v1656_v46 = vsel %vm6623_vm10, %v1650_v62, %v1652_v37  ;;  %vm6631_vm10 = vmmov %vm6627_vm3 }
 0x1b4   :  { %v3178_v41 = vunpack.i.h.bf16 %v4879_v45  ;;  %v6624_v50 = vunpack.i.l.bf16 %v4879_v45  ;;  %v1788_v9 = vsel %vm6630_vm13, %v1772_v42, %v1656_v46  ;;  %v1792_v27 = vsel %vm6631_vm10, %v1773_v49, %v1652_v37  ;;  %vm6637_vm3 = vmmov %vm6636_vm9 }
 0x1b5   :  { %vm6641_vm13 = vmmov %vm6637_vm3 }
 0x1b6   :  { %v3181_v16 = vpop.permute.xlu0 %3180 }
 0x1b7   :  { %v4881_v51 = vpop.permute.xlu1 %3185  ;;  %v3183_v1 = vunpack.i.h.bf16 %v3181_v16  ;;  %v3182_v39 = vunpack.i.l.bf16 %v3181_v16  ;;  %v1673_v16 = vsel %vm6625_vm11, %v6624_v50, %v3178_v41  ;;  %vm6634_vm11 = vcmask 1041408  }
 0x1b8   :  { %v4945_v52 = vsel %vm3824_vm5, %v1780_v40, %v1673_v16 }
 0x1b9   :  { %v1674_v63 = vsel %vm6628_vm6, %v3178_v41, %v3182_v39  ;;  %v1675_v62 = vsel %vm6629_vm14, %v3182_v39, %v3183_v1  ;;  %v1798_v44 = vsel %vm3824_vm5, %v1792_v27, %v3183_v1  ;;  %v6635_v1 = vunpack.i.h.bf16 %v3960_v55  ;;  %vm6639_vm6 = vmmov %vm6634_vm11 }
 0x1ba   :  { %v4883_v36 = vpop.permute.xlu0 %1683  ;;  %v4954_v46 = vsel %vm3824_vm5, %v1784_v8, %v1674_v63  ;;  %v4958_v37 = vsel %vm3824_vm5, %v1788_v9, %v1675_v62  ;;  %vm6640_vm14 = vmmov %vm6639_vm6 }
 0x1bb   :  { %v1686_v22 = vpop.permute.xlu1 %1685  ;;  %6632 = vst [vmem:[#allocation56_spill] sm:$0xff] %v4954_v46  ;;  %6633 = vst [vmem:[#allocation57_spill] sm:$0xff] %v4958_v37 }
 0x1bc   :  { %v1693_v19 = vsel %vm1691_vm4, %v4883_v36, %v1686_v22  ;;  %vm6643_vm10 = vmmov %vm6639_vm6 }
 0x1be   :  { %v1688_v29 = vpop.permute.xlu0 %1687 }
 0x1bf   :  { %v1690_v56 = vpop.permute.xlu1 %1689  ;;  %v1694_v39 = vsel %vm1691_vm4, %v1686_v22, %v1688_v29  ;;  %v1805_v22 = vsel %vm6634_vm11, %v4945_v52, %v1693_v19  ;;  %vm6644_vm11 = vmmov %vm6637_vm3 }
 0x1c0   :  { %v1695_v40 = vsel %vm1691_vm4, %v1688_v29, %v1690_v56  ;;  %v1809_v9 = vsel %vm6639_vm6, %v4954_v46, %v1694_v39  ;;  %v1817_v29 = vsel %vm6640_vm14, %v1798_v44, %v1690_v56  ;;  %v6357_v56 = vmov 0   ;;  %v4998_v44 = vld [vmem:[%s6164_s1] sm:$0xff]   ;;  %vm6651_vm14 = vmmov %vm6644_vm11 }
 0x1c1   :  { %v1813_v63 = vsel %vm6643_vm10, %v4958_v37, %v1695_v40  ;;  %1085 = vmatprep.mubr.bf16.mxu1 %v6357_v56  ;;  %6648 = vst [vmem:[#allocation61_spill] sm:$0xff] %v4998_v44  ;;  %1042 = vmatprep.mubr.bf16.mxu0 %v6357_v56  ;;  %vm6374_vm6 = vcmask 203776  }
 0x1c2   :  { %v4885_v61 = vpop.permute.xlu0 %1681  ;;  %3369 = vset.pattern.permute.xlu0 %v6357_v56  ;;  %3370 = vset.pattern.permute.xlu1 %v6357_v56 }
 0x1c3   :  { %v4887_v60 = vpop.permute.xlu1 %3190  ;;  %2992 = vmatmul.mubr.msk.bf16.vlgmr.msra.gmra.mxu1 %vm6374_vm6, %v4998_v44  ;;  %2991 = vmatmul.mubr.msk.bf16.vlgmr.msra.gmra.mxu0 %vm6374_vm6, %v4998_v44 }
 0x1c4   :  { %v3193_v13 = vunpack.i.h.bf16 %v4887_v60  ;;  %v3192_v50 = vunpack.i.l.bf16 %v4887_v60  ;;  %1970 = vmatprep.mubr.bf16.mxu1 %v6357_v56  ;;  %1927 = vmatprep.mubr.bf16.mxu0 %v6357_v56 }
 0x1c6   :  { %v4889_v28 = vpop.permute.xlu0 %3195  ;;  %v4966_v27 = vsel %vm6636_vm9, %v6635_v1, %v3192_v50  ;;  %v4969_v30 = vsel %vm6637_vm3, %v3192_v50, %v3193_v13  ;;  %vm6646_vm9 = vcmask 908288   ;;  %v3187_v1 = vunpack.i.l.bf16 %v4881_v51 }
 0x1c7   :  { %v4891_v11 = vpop.permute.xlu1 %1366  ;;  %6638 = vst [vmem:[#allocation60_spill] sm:$0xff] %v4969_v30  ;;  %v3197_v8 = vunpack.i.l.bf16 %v4889_v28  ;;  %vm6649_vm3 = vmmov %vm6646_vm9 }
 0x1c9   :  { %v1823_v37 = vsel %vm4058_vm15, %v1817_v29, %v3197_v8 }
 0x1ca   :  { %v1724_v15 = vpop.permute.xlu0 %1723 }
 0x1cb   :  { %v4893_v32 = vpop.permute.xlu1 %1725  ;;  %v4979_v16 = vsel %vm6641_vm13, %v4891_v11, %v1724_v15  ;;  %vm6653_vm13 = vcmask 1042432  }
 0x1cc   :  { %6642 = vst [vmem:[#allocation17_spill] sm:$0xff] %v4979_v16  ;;  %v4987_v62 = vsel %vm6644_vm11, %v1724_v15, %v4893_v32  ;;  %v1820_v15 = vsel %vm4058_vm15, %v1805_v22, %v4966_v27  ;;  %vm6654_vm10 = vmmov %vm6653_vm13 }
 0x1cd   :  { %6645 = vst [vmem:[#allocation23_spill] sm:$0xff] %v4987_v62  ;;  %v1830_v22 = vsel %vm6653_vm13, %v1820_v15, %v4979_v16  ;;  %vm6660_vm13 = vmmov %vm6649_vm3 }
 0x1ce   :  { %v4910_v47 = vpop.permute.xlu0 %1727 }
 0x1cf   :  { %v4916_v7 = vpop.permute.xlu1 %1721  ;;  %v1842_v46 = vsel %vm6654_vm10, %v1823_v37, %v4910_v47 }
 0x1d2   :  { %v4937_v48 = vpop.permute.xlu0 %3200 }
 0x1d3   :  { %v3206_v41 = vpop.permute.xlu1 %3205  ;;  %v3203_v60 = vunpack.i.h.bf16 %v4937_v48  ;;  %v6350_v31 = vunpack.i.l.bf16 %v4937_v48 }
 0x1d4   :  { %v3207_v49 = vunpack.i.l.bf16 %v3206_v41  ;;  %v3208_v50 = vunpack.i.h.bf16 %v3206_v41  ;;  %v1821_v41 = vsel %vm4058_vm15, %v1809_v9, %v4969_v30 }
 0x1d5   :  { %v4992_v39 = vsel %vm6646_vm9, %v6350_v31, %v3203_v60  ;;  %v5014_v31 = vsel %vm6651_vm14, %v3193_v13, %v3197_v8  ;;  %v5029_v13 = vsel %vm6644_vm11, %v4893_v32, %v4910_v47  ;;  %vm6656_vm9 = vmmov %vm6649_vm3  ;;  %vm6659_vm14 = vcmask 1043456  }
 0x1d6   :  { %v4972_v42 = vpop.permute.xlu0 %1407  ;;  %6647 = vst [vmem:[#allocation62_spill] sm:$0xff] %v4992_v39  ;;  %v5008_v40 = vsel %vm6649_vm3, %v3203_v60, %v3207_v49  ;;  %6652 = vst [vmem:[#allocation64_spill] sm:$0xff] %v5014_v31  ;;  %v1834_v60 = vsel %vm6654_vm10, %v1821_v41, %v4987_v62  ;;  %v1845_v29 = vsel %vm4081_vm1, %v1830_v22, %v4992_v39  ;;  %v1379_v47 = vrot.slane %v4162_v25, 3 }
 0x1d7   :  { %v4981_v19 = vpop.permute.xlu1 %3210  ;;  %6650 = vst [vmem:[#allocation65_spill] sm:$0xff] %v5008_v40  ;;  %6655 = vst [vmem:[#allocation63_spill] sm:$0xff] %v5029_v13  ;;  %v1846_v32 = vsel %vm4081_vm1, %v1834_v60, %v5008_v40  ;;  %v5049_v62 = vsel %vm6660_vm13, %v3207_v49, %v3208_v50  ;;  %v1822_v22 = vsel %vm4058_vm15, %v1813_v63, %v5014_v31  ;;  %v1378_v60 = vrot.slane %v3954_v0, 3 }
 0x1d8   :  { %6661 = vst [vmem:[#allocation26_spill] sm:$0xff] %v5049_v62  ;;  %vm6662_vm11 = vmmov %vm6659_vm14  ;;  %v1848_v63 = vsel %vm4081_vm1, %v1842_v46, %v3208_v50 }
 0x1da   :  { %v1760_v9 = vpop.permute.xlu0 %1759 }
 0x1db   :  { %v5033_v15 = vsel %vm6656_vm9, %v1760_v9, %v4972_v42  ;;  %v1762_v8 = vpop.permute.xlu1 %1761  ;;  %vm6663_vm9 = vmmov %vm6654_vm10 }
 0x1dc   :  { %6657 = vst [vmem:[#allocation66_spill] sm:$0xff] %v5033_v15  ;;  %v5041_v30 = vsel %vm6649_vm3, %v4972_v42, %v1762_v8  ;;  %v1854_v41 = vsel %vm6659_vm14, %v1845_v29, %v5033_v15  ;;  %v3198_v29 = vunpack.i.h.bf16 %v4889_v28  ;;  %v1838_v49 = vsel %vm6663_vm9, %v1822_v22, %v5029_v13  ;;  %vm6665_vm14 = vmmov %vm6660_vm13  ;;  %v6703_v13 = vld [vmem:[#allocation39_spill] sm:$0xff] }
 0x1dd   :  { %6658 = vst [vmem:[#allocation73_spill] sm:$0xff] %v5041_v30  ;;  %v1857_v44 = vsel %vm6662_vm11, %v1846_v32, %v5041_v30  ;;  %1871 = vrot.lane.b32.xlu0 %v1854_v41, %s3385_s22  ;;  %vm6664_vm3 = vcmask 1039360   ;;  %vm6667_vm13 = vmmov %vm6662_vm11  ;;  %v6668_v22 = vunpack.i.l.bf16 %v4879_v45  ;;  %v6670_v30 = vld [vmem:[#allocation98_spill] sm:$0xff]  ;;  %v6672_v45 = vld [vmem:[#allocation97_spill] sm:$0xff]  ;;  %vm6674_vm9 = vcmask 1040384  }
 0x1de   :  { %1873 = vrot.lane.b32.xlu1 %v1857_v44, %s3385_s22  ;;  %v1764_v56 = vpop.permute.xlu0 %1763  ;;  %v1653_v37 = vsel %vm6664_vm3, %v4849_v21, %v4877_v35  ;;  %v1847_v44 = vsel %vm4081_vm1, %v1838_v49, %v5049_v62  ;;  %vm6669_vm10 = vmmov %vm6664_vm3  ;;  %v5087_v21 = vcombine.low %v6670_v30, %v6670_v30  ;;  %v1692_v35 = vsel %vm1691_vm4, %v4885_v61, %v4883_v36 }
 0x1df   :  { %v5072_v32 = vsel %vm6665_vm14, %v1762_v8, %v1764_v56  ;;  %v5074_v41 = vpop.permute.xlu1 %1403  ;;  %v1863_v28 = vsel %vm6667_vm13, %v1848_v63, %v1764_v56  ;;  %v1672_v46 = vsel %vm6669_vm10, %v3187_v1, %v6668_v22  ;;  %v3212_v56 = vunpack.i.l.bf16 %v4981_v19  ;;  %v6671_v8 = vld [vmem:[#allocation27_spill] sm:$0xff]  ;;  %vm6681_vm14 = vmmov %vm6669_vm10 }
 0x1e0   :  { %6666 = vst [vmem:[#allocation67_spill] sm:$0xff] %v5072_v32  ;;  %v1860_v50 = vsel %vm6662_vm11, %v1847_v44, %v5072_v32  ;;  %v1376_v49 = vrot.slane %v6671_v8, 3  ;;  %v1380_v63 = vrot.slane %v6672_v45, 3  ;;  %v6673_v1 = vsel %vm3802_vm2, %v3463_v20, %v4276_v38 }
 0x1e1   :  { %1875 = vrot.lane.b32.xlu0 %v1860_v50, %s3385_s22  ;;  %v1776_v44 = vsel %vm6674_vm9, %v6673_v1, %v1653_v37  ;;  %v6675_v22 = vunpack.i.h.bf16 %v3960_v55  ;;  %vm6676_vm3 = vcmask 916480   ;;  %v3234_v61 = vpack.i.bf16 %v1379_v47, %v1378_v60 }
 0x1e2   :  { %1877 = vrot.lane.b32.xlu1 %v1863_v28, %s3385_s22  ;;  %v5108_v36 = vpop.permute.xlu0 %1287  ;;  %v3188_v50 = vunpack.i.h.bf16 %v4881_v51  ;;  %v5113_v62 = vsel %vm3824_vm5, %v1776_v44, %v1672_v46  ;;  %vm6679_vm4 = vmmov %vm6676_vm3  ;;  %vm6682_vm13 = vcmask 1041408   ;;  %vm6683_vm10 = vcmask 1042432  }
 0x1e3   :  { %v5105_v32 = vsel %vm6676_vm3, %v3198_v29, %v6675_v22  ;;  %6678 = vst [vmem:[#allocation69_spill] sm:$0xff] %v5113_v62  ;;  %v5118_v37 = vsel %vm6679_vm4, %v4916_v7, %v4891_v11  ;;  %v5123_v55 = vsel %vm6681_vm14, %v4863_v24, %v5108_v36  ;;  %v3216_v29 = vpop.permute.xlu1 %3215  ;;  %v1801_v60 = vsel %vm6682_vm13, %v5113_v62, %v1692_v35  ;;  %vm6687_vm9 = vmmov %vm6683_vm10 }
 0x1e4   :  { %6677 = vst [vmem:[#allocation70_spill] sm:$0xff] %v5105_v32  ;;  %6680 = vst [vmem:[#allocation74_spill] sm:$0xff] %v5118_v37  ;;  %v1542_v51 = vsel %vm6683_vm10, %v4847_v12, %v5123_v55  ;;  %v3218_v47 = vunpack.i.h.bf16 %v3216_v29  ;;  %v3217_v28 = vunpack.i.l.bf16 %v3216_v29  ;;  %v1819_v7 = vsel %vm4058_vm15, %v1801_v60, %v5105_v32 }
 0x1e5   :  { %1362 = vrot.lane.b32.xlu0 %v5087_v21, %s3384_s0  ;;  %v3239_v46 = vpack.i.bf16 %v1376_v49, %v1380_v63  ;;  %v6684_v24 = vunpack.i.l.bf16 %v4937_v48  ;;  %vm6685_vm11 = vcmask 908288   ;;  %v1826_v35 = vsel %vm6687_vm9, %v1819_v7, %v5118_v37  ;;  %vm6688_vm3 = vmmov %vm6681_vm14  ;;  %v6695_v7 = vld [vmem:[#allocation100_spill] sm:$0xff] }
 0x1e6   :  { %v5143_v12 = vsel %vm6688_vm3, %v3188_v50, %v3217_v28  ;;  %vm6689_vm4 = vmmov %vm6688_vm3  ;;  %3235 = vrot.lane.b32.xlu1 %v3234_v61, %s3385_s22  ;;  %v5149_v22 = vpop.permute.xlu0 %3220  ;;  %vm6696_vm9 = vcmask 1031168   ;;  %v1997_v31 = vcombine.high %v6703_v13, %v6703_v13  ;;  %v1417_v15 = vrot.slane %v3954_v0, 2 }
 0x1e7   :  { %v5138_v1 = vsel %vm6685_vm11, %v3212_v56, %v6684_v24  ;;  %v5146_v44 = vsel %vm6689_vm4, %v3217_v28, %v3218_v47  ;;  %vm6690_vm14 = vmmov %vm6685_vm11  ;;  %v1545_v48 = vsel %vm4081_vm1, %v4867_v17, %v5143_v12  ;;  %v3223_v56 = vunpack.i.h.bf16 %v5149_v22  ;;  %v1325_v29 = vpop.permute.xlu1 %1324 }
 0x1e8   :  { %6686 = vst [vmem:[#allocation68_spill] sm:$0xff] %v5138_v1  ;;  %v5153_v49 = vsel %vm6690_vm14, %v5074_v41, %v1760_v9  ;;  %v6362_v63 = vunpack.i.l.bf16 %v5149_v22  ;;  %v1546_v61 = vsel %vm4081_vm1, %v4875_v23, %v5146_v44  ;;  %v1844_v9 = vsel %vm4081_vm1, %v1826_v35, %v5138_v1  ;;  %vm6692_vm13 = vmmov %vm6688_vm3 }
 0x1e9   :  { %6691 = vst [vmem:[#allocation72_spill] sm:$0xff] %v5153_v49  ;;  %v5169_v60 = vsel %vm6692_vm13, %v3223_v56, %v3188_v50  ;;  %vm6693_vm10 = vmmov %vm6688_vm3  ;;  %3240 = vrot.lane.b32.xlu0 %v3239_v46, %s3385_s22  ;;  %vm6694_vm11 = vcmask 1043456   ;;  %v1400_v24 = vcombine.low %v6695_v7, %v6695_v7  ;;  %v6701_v7 = vld [vmem:[#allocation14_spill] sm:$0xff]  ;;  %v1418_v1 = vrot.slane %v4162_v25, 2 }
 0x1ea   :  { %v5174_v17 = vsel %vm6693_vm10, %v3218_v47, %v6362_v63  ;;  %v1851_v28 = vsel %vm6694_vm11, %v1844_v9, %v5153_v49  ;;  %v5180_v23 = vpop.permute.xlu0 %1326  ;;  %v1544_v47 = vsel %vm4081_vm1, %v4857_v54, %v5169_v60  ;;  %vm6697_vm3 = vmmov %vm6696_vm9  ;;  %v1989_v63 = vcombine.low %v6701_v7, %v6701_v7  ;;  %v6707_v7 = vld [vmem:[#allocation33_spill] sm:$0xff] }
 0x1eb   :  { %1869 = vrot.lane.b32.xlu1 %v1851_v28, %s3385_s22  ;;  %v1547_v50 = vsel %vm4081_vm1, %v1542_v51, %v5174_v17  ;;  %v5193_v46 = vsel %vm6696_vm9, %v1325_v29, %v5180_v23  ;;  %v1329_v35 = vpop.permute.xlu1 %1328  ;;  %vm6698_vm4 = vmmov %vm6694_vm11  ;;  %v6700_v28 = vld [vmem:[#allocation99_spill] sm:$0xff]  ;;  %v1415_v39 = vrot.slane %v6671_v8, 2  ;;  %v2011_v62 = vrot.slane %v6707_v7, 4 }
 0x1ec   :  { %v5197_v56 = vsel %vm6697_vm3, %v5180_v23, %v1329_v35  ;;  %v5201_v9 = vsel %vm6698_vm4, %v1545_v48, %v5193_v46  ;;  %vm6699_vm14 = vmmov %vm6698_vm4  ;;  %v2014_v16 = vrot.slane %v6672_v45, 4 }
 0x1ed   :  { %v5205_v51 = vsel %vm6699_vm14, %v1546_v61, %v5197_v56  ;;  %1405 = vrot.lane.b32.xlu0 %v6700_v28, %s3385_s22  ;;  %vm6702_vm13 = vmmov %vm6697_vm3 }
 0x1ee   :  { %v5210_v54 = vpop.permute.xlu0 %1330  ;;  %vm6704_vm10 = vmmov %vm6698_vm4 }
 0x1ef   :  { %1409 = vrot.lane.b32.xlu1 %v1400_v24, %s3385_s22  ;;  %v5216_v40 = vsel %vm6702_vm13, %v1329_v35, %v5210_v54  ;;  %v1323_v48 = vpop.permute.xlu1 %1322  ;;  %vm6705_vm11 = vmmov %vm6697_vm3  ;;  %v1416_v35 = vrot.slane %v6707_v7, 2  ;;  %vm6713_vm3 = vcmask 1041408   ;;  %vm6720_vm13 = vcmask 1042432  }
 0x1f0   :  { %v5222_v61 = vsel %vm6704_vm10, %v1547_v50, %v5216_v40  ;;  %v5225_v49 = vsel %vm6705_vm11, %v1323_v48, %v1325_v29  ;;  %vm6706_vm9 = vmmov %vm6698_vm4  ;;  %v1399_v50 = vcombine.low %v6700_v28, %v6700_v28  ;;  %v1419_v29 = vrot.slane %v6672_v45, 2  ;;  %v6708_v48 = vld [vmem:[#allocation2_spill] sm:$0xff] }
 0x1f1   :  { %v5229_v24 = vsel %vm6706_vm9, %v1544_v47, %v5225_v49  ;;  %2000 = vrot.lane.b32.xlu0 %v1997_v31, %s3383_s19  ;;  %v5241_v37 = vrot.slane %v1989_v63, %v6708_v48  ;;  %v3244_v47 = vpack.i.bf16 %v1417_v15, %v1416_v35  ;;  %v3254_v28 = vpack.i.bf16 %v2011_v62, %v1415_v39  ;;  %v6709_v15 = vld [vmem:[#allocation104_spill] sm:$0xff]  ;;  %vm6716_vm14 = vmmov %vm6713_vm3 }
 0x1f2   :  { %v3249_v32 = vpack.i.bf16 %v1419_v29, %v1418_v1  ;;  %v1462_v1 = vrot.slane %v4199_v53, 1  ;;  %v1463_v63 = vrot.slane %v4254_v33, 1  ;;  %v1446_v62 = vcombine.low %v6709_v15, %v6709_v15  ;;  %vm6725_vm10 = vmmov %vm6720_vm13 }
 0x1f3   :  { %2002 = vrot.lane.b32.xlu1 %v6619_v6, %s3383_s19  ;;  %v1464_v39 = vrot.slane %v4267_v2, 1  ;;  %v1461_v35 = vrot.slane %v4276_v38, 1  ;;  %v2050_v29 = vrot.slane %v4199_v53, 3  ;;  %vm6715_vm4 = vcmask 1040384   ;;  %vm6726_vm11 = vmmov %vm6706_vm9 }
 0x1f5   :  { %2004 = vrot.lane.b32.xlu0 %v5241_v37, %s3383_s19 }
 0x1f7   :  { %1401 = vrot.lane.b32.xlu1 %v1399_v50, %s3385_s22 }
 0x1f9   :  { %3245 = vrot.lane.b32.xlu0 %v3244_v47, %s3386_s23  ;;  %v2012_v47 = vrot.slane %v3954_v0, 4 }
 0x1fb   :  { %3250 = vrot.lane.b32.xlu1 %v3249_v32, %s3386_s23  ;;  %v1465_v32 = vrot.slane %v4264_v43, 1 }
 0x1fd   :  { %1998 = vrot.lane.b32.xlu0 %v6703_v13, %s3383_s19  ;;  %v3264_v48 = vpack.i.bf16 %v1465_v32, %v1464_v39  ;;  %v6711_v39 = vunpack.i.h.bf16 %v4732_v14  ;;  %v6712_v32 = vld [vmem:[#allocation4_spill] sm:$0xff] }
 0x1ff   :  { %3255 = vrot.lane.b32.xlu1 %v3254_v28, %s3386_s23  ;;  %v3269_v28 = vpack.i.bf16 %v2050_v29, %v1461_v35  ;;  %v2273_v35 = vsel %vm6713_vm3, %v4800_v59, %v3463_v20 }
 0x201   :  { %1449 = vrot.lane.b32.xlu0 %v5087_v21, %s3386_s23  ;;  %v3259_v21 = vpack.i.bf16 %v1463_v63, %v1462_v1  ;;  %v6710_v63 = vld [vmem:[#allocation103_spill] sm:$0xff] }
 0x203   :  { %1451 = vrot.lane.b32.xlu1 %v6709_v15, %s3386_s23  ;;  %v2010_v15 = vrot.slane %v6671_v8, 4 }
 0x205   :  { %1453 = vrot.lane.b32.xlu0 %v6670_v30, %s3386_s23  ;;  %v2013_v30 = vrot.slane %v4162_v25, 4  ;;  %v3279_v1 = vpack.i.bf16 %v2010_v15, %v2014_v16  ;;  %v6714_v16 = vld [vmem:[#allocation102_spill] sm:$0xff] }
 0x207   :  { %1455 = vrot.lane.b32.xlu1 %v1399_v50, %s3386_s23  ;;  %v3274_v50 = vpack.i.bf16 %v2013_v30, %v2012_v47  ;;  %v6717_v47 = vunpack.i.l.bf16 %v4765_v57  ;;  %v2285_v30 = vsel %vm4058_vm15, %v2273_v35, %v6718_v3  ;;  %v6730_v35 = vunpack.i.l.bf16 %v5149_v22 }
 0x208   :  { %v2293_v59 = vsel %vm6720_vm13, %v2285_v30, %v4861_v34 }
 0x209   :  { %1447 = vrot.lane.b32.xlu0 %v1446_v62, %s3386_s23  ;;  %v2034_v62 = vcombine.low %v6710_v63, %v6710_v63 }
 0x20b   :  { %3260 = vrot.lane.b32.xlu1 %v3259_v21, %s3384_s0  ;;  %v2264_v21 = vsel %vm3802_vm2, %v6712_v32, %v6711_v39  ;;  %vm6719_vm2 = vmmov %vm6713_vm3  ;;  %v2052_v32 = vrot.slane %v4267_v2, 3 }
 0x20c   :  { %v2267_v29 = vsel %vm6715_vm4, %v2264_v21, %v4756_v58  ;;  %v2278_v58 = vsel %vm6719_vm2, %v4835_v10, %v6619_v6  ;;  %v2306_v10 = vsel %vm4081_vm1, %v2293_v59, %v5143_v12  ;;  %vm6728_vm3 = vmmov %vm6725_vm10 }
 0x20d   :  { %3265 = vrot.lane.b32.xlu0 %v3264_v48, %s3384_s0  ;;  %v2276_v48 = vsel %vm6716_vm14, %v4827_v18, %v1997_v31  ;;  %v2269_v14 = vsel %vm3824_vm5, %v2267_v29, %v6717_v47  ;;  %v2261_v18 = vrot.slane %v4264_v43, 6  ;;  %v6722_v31 = vrot.slane %v4254_v33, 6  ;;  %vm6723_vm5 = vmmov %vm6719_vm2 }
 0x20e   :  { %v2282_v15 = vsel %vm6723_vm5, %v2269_v14, %v5241_v37  ;;  %v2313_v6 = vsel %vm6726_vm11, %v2306_v10, %v5193_v46  ;;  %v2051_v46 = vrot.slane %v4254_v33, 3  ;;  %vm6729_vm4 = vmmov %vm6728_vm3  ;;  %v2049_v47 = vrot.slane %v4276_v38, 3  ;;  %v6733_v14 = vld [vmem:[#allocation53_spill] sm:$0xff] }
 0x20f   :  { %3270 = vrot.lane.b32.xlu1 %v3269_v28, %s3384_s0  ;;  %v2286_v28 = vsel %vm4058_vm15, %v2276_v48, %v6722_v31  ;;  %v2288_v12 = vsel %vm4058_vm15, %v2282_v15, %v2261_v18  ;;  %vm6731_vm14 = vmmov %vm6706_vm9  ;;  %v6739_v15 = vld [vmem:[#allocation24_spill] sm:$0xff]  ;;  %v2072_v10 = vcombine.low %v6703_v13, %v6703_v13  ;;  %vm2737_vm11 = vcmask 7168  }
 0x210   :  { %v2303_v21 = vsel %vm6729_vm4, %v2288_v12, %v5108_v36  ;;  %vm6732_vm2 = vmmov %vm6706_vm9  ;;  %v2033_v36 = vcombine.low %v6714_v16, %v6714_v16  ;;  %v3284_v22 = vpack.i.bf16 %v2052_v32, %v2051_v46  ;;  %v6743_v12 = vld [vmem:[#allocation19_spill] sm:$0xff] }
 0x211   :  { %3275 = vrot.lane.b32.xlu0 %v3274_v50, %s3386_s23  ;;  %v6724_v50 = vld [vmem:[#allocation59_spill] sm:$0xff]  ;;  %v2309_v29 = vsel %vm4081_vm1, %v2303_v21, %v6730_v35  ;;  %vm6734_vm13 = vmmov %vm6723_vm5  ;;  %v2128_v35 = vrot.slane %v3954_v0, 1  ;;  %v6746_v0 = vld [vmem:[#allocation12_spill] sm:$0xff] }
 0x212   :  { %v2320_v48 = vsel %vm6732_vm2, %v2309_v29, %v5210_v54  ;;  %v2271_v3 = vsel %vm6734_vm13, %v6733_v14, %v6703_v13  ;;  %v6735_v54 = vrot.slane %v4276_v38, 6  ;;  %vm6737_vm5 = vmmov %vm6728_vm3  ;;  %v2478_v14 = vrot.slane %v6746_v0, 4 }
 0x213   :  { %3280 = vrot.lane.b32.xlu1 %v3279_v1, %s3386_s23  ;;  %v2296_v1 = vsel %vm6725_vm10, %v2286_v28, %v6724_v50  ;;  %vm6738_vm10 = vmmov %vm6732_vm2  ;;  %v2073_v28 = vcombine.low %v5241_v37, %v5241_v37  ;;  %v2089_v50 = vrot.slane %v4199_v53, 2 }
 0x214   :  { %v2307_v34 = vsel %vm4081_vm1, %v2296_v1, %v5146_v44  ;;  %v2284_v30 = vsel %vm4058_vm15, %v2271_v3, %v6735_v54  ;;  %v2090_v1 = vrot.slane %v4254_v33, 2  ;;  %v6747_v3 = vld [vmem:[#allocation11_spill] sm:$0xff]  ;;  %vm6758_vm2 = vmmov %vm6734_vm13 }
 0x215   :  { %2037 = vrot.lane.b32.xlu0 %v2034_v62, %s3384_s0  ;;  %v2315_v39 = vsel %vm6706_vm9, %v2307_v34, %v5197_v56  ;;  %v2091_v34 = vrot.slane %v4267_v2, 2  ;;  %vm6748_vm9 = vcmask 908288  }
 0x216   :  { %v3294_v53 = vpack.i.bf16 %v2090_v1, %v2089_v50  ;;  %v6752_v50 = vld [vmem:[#allocation10_spill] sm:$0xff] }
 0x217   :  { %2039 = vrot.lane.b32.xlu1 %v6714_v16, %s3384_s0  ;;  %v2477_v1 = vrot.slane %v6752_v50, 4 }
 0x219   :  { %2041 = vrot.lane.b32.xlu0 %v6710_v63, %s3384_s0  ;;  %v6727_v63 = vrot.slane %v4267_v2, 6  ;;  %v6744_v2 = vld [vmem:[#allocation51_spill] sm:$0xff] }
 0x21b   :  { %2043 = vrot.lane.b32.xlu1 %v6721_v4, %s3384_s0  ;;  %v2287_v62 = vsel %vm4058_vm15, %v2278_v58, %v6727_v63  ;;  %v6736_v58 = vld [vmem:[#allocation55_spill] sm:$0xff] }
 0x21c   :  { %v2299_v44 = vsel %vm6728_vm3, %v2287_v62, %v5123_v55  ;;  %v2290_v59 = vsel %vm6737_vm5, %v2284_v30, %v6736_v58  ;;  %v6742_v62 = vld [vmem:[#allocation54_spill] sm:$0xff]  ;;  %v6749_v58 = vld [vmem:[#allocation13_spill] sm:$0xff]  ;;  %vm6753_vm3 = vmmov %vm6748_vm9 }
 0x21d   :  { %2328 = vrot.lane.b32.xlu0 %v2313_v6, %s3391_s28  ;;  %v2308_v56 = vsel %vm4081_vm1, %v2299_v44, %v5174_v17  ;;  %v2053_v17 = vrot.slane %v4264_v43, 3  ;;  %v2305_v18 = vsel %vm4081_vm1, %v2290_v59, %v5169_v60  ;;  %v5389_v60 = vpop.permute.xlu0 %2727  ;;  %v2092_v6 = vrot.slane %v4264_v43, 2  ;;  %vm6754_vm4 = vmmov %vm6753_vm3 }
 0x21e   :  { %v2317_v55 = vsel %vm6731_vm14, %v2308_v56, %v5216_v40  ;;  %v2311_v31 = vsel %vm6738_vm10, %v2305_v18, %v5225_v49  ;;  %v5391_v49 = vpop.permute.xlu1 %2729  ;;  %v2517_v44 = vrot.slane %v6743_v12, 3  ;;  %v2127_v56 = vrot.slane %v6707_v7, 1  ;;  %vm6756_vm14 = vmmov %vm6734_vm13 }
 0x21f   :  { %2330 = vrot.lane.b32.xlu1 %v2315_v39, %s3391_s28  ;;  %v3289_v40 = vpack.i.bf16 %v2049_v47, %v2053_v17  ;;  %v3299_v33 = vpack.i.bf16 %v2092_v6, %v2091_v34  ;;  %v2088_v39 = vrot.slane %v4276_v38, 2  ;;  %v6745_v38 = vld [vmem:[#allocation101_spill] sm:$0xff]  ;;  %v2126_v7 = vrot.slane %v6671_v8, 1  ;;  %v6750_v8 = vld [vmem:[#allocation7_spill] sm:$0xff]  ;;  %vm6764_vm13 = vmmov %vm6758_vm2 }
 0x220   :  { %v2111_v29 = vcombine.low %v6745_v38, %v6745_v38  ;;  %v3309_v17 = vpack.i.bf16 %v2128_v35, %v2127_v56  ;;  %v2480_v59 = vrot.slane %v6749_v58, 4  ;;  %v2481_v18 = vrot.slane %v6750_v8, 4  ;;  %vm6767_vm5 = vmmov %vm6758_vm2 }
 0x221   :  { %2332 = vrot.lane.b32.xlu0 %v2317_v55, %s3391_s28  ;;  %v5399_v37 = vpop.permute.xlu0 %2731  ;;  %v3304_v43 = vpack.i.bf16 %v2517_v44, %v2088_v39  ;;  %v2129_v55 = vrot.slane %v4162_v25, 1  ;;  %v2479_v25 = vrot.slane %v6747_v3, 4  ;;  %vm6768_vm10 = vmmov %vm6753_vm3 }
 0x222   :  { %v5407_v63 = vpop.permute.xlu1 %2733  ;;  %v3329_v44 = vpack.i.bf16 %v2481_v18, %v2480_v59  ;;  %v6763_v59 = vld [vmem:[#allocation28_spill] sm:$0xff] }
 0x223   :  { %2334 = vrot.lane.b32.xlu1 %v2320_v48, %s3391_s28  ;;  %v2130_v48 = vrot.slane %v6672_v45, 1 }
 0x225   :  { %2035 = vrot.lane.b32.xlu0 %v2033_v36, %s3384_s0 }
 0x226   :  { %v5415_v46 = vpop.permute.xlu1 %3225 }
 0x227   :  { %3285 = vrot.lane.b32.xlu1 %v3284_v22, %s3384_s0  ;;  %v2594_v22 = vrot.slane %v6746_v0, 1  ;;  %v6759_v0 = vld [vmem:[#allocation30_spill] sm:$0xff] }
 0x229   :  { %3290 = vrot.lane.b32.xlu0 %v3289_v40, %s3384_s0  ;;  %v3319_v30 = vpack.i.bf16 %v2594_v22, %v2126_v7  ;;  %v2501_v22 = vcombine.low %v6759_v0, %v6759_v0 }
 0x22a   :  { %v5423_v21 = vpop.permute.xlu1 %1364 }
 0x22b   :  { %2326 = vrot.lane.b32.xlu1 %v2311_v31, %s3391_s28  ;;  %v6751_v31 = vld [vmem:[#allocation52_spill] sm:$0xff] }
 0x22d   :  { %2076 = vrot.lane.b32.xlu0 %v6721_v4, %s3385_s22  ;;  %v6740_v4 = vld [vmem:[#allocation48_spill] sm:$0xff] }
 0x22f   :  { %2078 = vrot.lane.b32.xlu1 %v6703_v13, %s3385_s22  ;;  %v2736_v13 = vpop.permute.xlu0 %2735 }
 0x231   :  { %2080 = vrot.lane.b32.xlu0 %v3463_v20, %s3385_s22  ;;  %v6741_v20 = vld [vmem:[#allocation76_spill] sm:$0xff] }
 0x233   :  { %2082 = vrot.lane.b32.xlu1 %v2073_v28, %s3385_s22  ;;  %v5420_v32 = vpop.permute.xlu0 %3230 }
 0x235   :  { %2465 = vrot.lane.b32.xlu0 %v6739_v15, %s3383_s19 }
 0x237   :  { %2467 = vrot.lane.b32.xlu1 %v6740_v4, %s3383_s19  ;;  %v5436_v47 = vpop.permute.xlu0 %1368  ;;  %v3324_v4 = vpack.i.bf16 %v2479_v25, %v2478_v14  ;;  %v6760_v14 = vrot.slane %v6743_v12, 6 }
 0x239   :  { %2469 = vrot.lane.b32.xlu0 %v6741_v20, %s3383_s19  ;;  %v2556_v20 = vrot.slane %v6743_v12, 2 }
 0x23b   :  { %2471 = vrot.lane.b32.xlu1 %v6742_v62, %s3383_s19  ;;  %v3334_v56 = vpack.i.bf16 %v2556_v20, %v2477_v1 }
 0x23d   :  { %2074 = vrot.lane.b32.xlu0 %v2072_v10, %s3385_s22 }
 0x23f   :  { %3295 = vrot.lane.b32.xlu1 %v3294_v53, %s3385_s22  ;;  %v2738_v53 = vsel %vm2737_vm11, %v5389_v60, %v5391_v49 }
 0x241   :  { %3300 = vrot.lane.b32.xlu0 %v3299_v33, %s3385_s22 }
 0x243   :  { %2463 = vrot.lane.b32.xlu1 %v6744_v2, %s3383_s19 }
 0x245   :  { %3305 = vrot.lane.b32.xlu0 %v3304_v43, %s3385_s22  ;;  %v2739_v43 = vsel %vm2737_vm11, %v5391_v49, %v5399_v37  ;;  %v2740_v49 = vsel %vm2737_vm11, %v5399_v37, %v5407_v63 }
 0x246   :  { %v2761_v18 = vsel %vm6764_vm13, %v6763_v59, %v2740_v49  ;;  %v6779_v49 = vld [vmem:[#allocation42_spill] sm:$0xff]  ;;  %vm6787_vm13 = vcmask 1031168  }
 0x247   :  { %2114 = vrot.lane.b32.xlu1 %v2033_v36, %s3386_s23  ;;  %v5438_v36 = vpop.permute.xlu1 %1370 }
 0x249   :  { %2116 = vrot.lane.b32.xlu0 %v6745_v38, %s3386_s23 }
 0x24b   :  { %2118 = vrot.lane.b32.xlu1 %v6714_v16, %s3386_s23  ;;  %v3314_v16 = vpack.i.bf16 %v2130_v48, %v2129_v55 }
 0x24d   :  { %2120 = vrot.lane.b32.xlu0 %v2072_v10, %s3386_s23 }
 0x24f   :  { %2112 = vrot.lane.b32.xlu1 %v2111_v29, %s3386_s23  ;;  %v1872_v40 = vpop.permute.xlu0 %1871  ;;  %v6755_v29 = vld [vmem:[#allocation5_spill] sm:$0xff] }
 0x250   :  { %v1874_v45 = vpop.permute.xlu1 %1873  ;;  %v2755_v55 = vsel %vm6756_vm14, %v6755_v29, %v2738_v53 }
 0x251   :  { %v1880_v54 = vsel %vm6748_vm9, %v1872_v40, %v1874_v45  ;;  %3310 = vrot.lane.b32.xlu0 %v3309_v17, %s3391_s28  ;;  %v6757_v17 = vld [vmem:[#allocation34_spill] sm:$0xff]  ;;  %v2768_v25 = vsel %vm4058_vm15, %v2755_v55, %v6760_v14  ;;  %v6776_v55 = vld [vmem:[#allocation37_spill] sm:$0xff] }
 0x252   :  { %v1887_v28 = vand.u32 %v1880_v54, %v6751_v31  ;;  %v2758_v7 = vsel %vm6758_vm2, %v6757_v17, %v2739_v43  ;;  %v6761_v54 = vld [vmem:[#allocation20_spill] sm:$0xff] }
 0x253   :  { %3315 = vrot.lane.b32.xlu1 %v3314_v16, %s3391_s28  ;;  %v1876_v10 = vpop.permute.xlu0 %1875  ;;  %v2741_v16 = vsel %vm2737_vm11, %v5407_v63, %v2736_v13  ;;  %v6762_v37 = vrot.slane %v6761_v54, 6  ;;  %v6766_v13 = vld [vmem:[#allocation40_spill] sm:$0xff]  ;;  %vm6770_vm11 = vcmask 1042432  }
 0x254   :  { %v1878_v34 = vpop.permute.xlu1 %1877  ;;  %1907 = vmatprep.subr.bf16.mxu0 %v1887_v28  ;;  %v1881_v6 = vsel %vm6753_vm3, %v1874_v45, %v1876_v10  ;;  %v6765_v28 = vld [vmem:[#allocation22_spill] sm:$0xff]  ;;  %v2765_v1 = vsel %vm6767_vm5, %v6766_v13, %v2741_v16  ;;  %vm6774_vm9 = vmmov %vm6770_vm11  ;;  %v6780_v16 = vld [vmem:[#allocation31_spill] sm:$0xff] }
 0x255   :  { %v1882_v33 = vsel %vm6754_vm4, %v1876_v10, %v1878_v34  ;;  %v1890_v39 = vand.u32 %v1881_v6, %v6751_v31  ;;  %3320 = vrot.lane.b32.xlu0 %v3319_v30, %s3391_s28  ;;  %v2769_v30 = vsel %vm4058_vm15, %v2758_v7, %v6762_v37  ;;  %v6769_v10 = vld [vmem:[#allocation29_spill] sm:$0xff]  ;;  %vm6777_vm3 = vmmov %vm6758_vm2  ;;  %vm6784_vm2 = vcmask 1043456   ;;  %v6788_v13 = vld [vmem:[#allocation3_spill] sm:$0xff] }
 0x256   :  { %v1893_v38 = vand.u32 %v1882_v33, %v6751_v31  ;;  %v2776_v34 = vsel %vm6770_vm11, %v2768_v25, %v6769_v10  ;;  %v6771_v6 = vld [vmem:[#allocation21_spill] sm:$0xff]  ;;  %v2752_v17 = vsel %vm6777_vm3, %v6776_v55, %v5389_v60  ;;  %vm6781_vm4 = vmmov %vm6774_vm9  ;;  %v6794_v55 = vld [vmem:[#allocation44_spill] sm:$0xff] }
 0x257   :  { %3325 = vrot.lane.b32.xlu1 %v3324_v4, %s3386_s23  ;;  %v5466_v35 = vpop.permute.xlu0 %1362  ;;  %v2742_v4 = vrot.slane %v6765_v28, 6  ;;  %v6772_v53 = vrot.slane %v6771_v6, 6  ;;  %v6778_v7 = vld [vmem:[#allocation25_spill] sm:$0xff]  ;;  %vm6782_vm14 = vmmov %vm6781_vm4 }
 0x258   :  { %v5470_v48 = vpop.permute.xlu1 %3235  ;;  %1950 = vmatprep.subr.bf16.mxu1 %v1893_v38  ;;  %vm6789_vm5 = vmmov %vm6784_vm2 }
 0x259   :  { %1951 = vmatpush1.bf16.msra.mxu1 %v1890_v39  ;;  %3330 = vrot.lane.b32.xlu0 %v3329_v44, %s3386_s23  ;;  %v2770_v33 = vsel %vm4058_vm15, %v2761_v18, %v6772_v53  ;;  %v6773_v44 = vld [vmem:[#allocation36_spill] sm:$0xff]  ;;  %v2771_v43 = vsel %vm4058_vm15, %v2765_v1, %v2742_v4  ;;  %vm6795_vm11 = vmmov %vm6784_vm2 }
 0x25a   :  { %v2782_v14 = vsel %vm6781_vm4, %v2770_v33, %v6780_v16  ;;  %v6785_v18 = vld [vmem:[#allocation8_spill] sm:$0xff]  ;;  %vm6799_vm3 = vmmov %vm6784_vm2 }
 0x25b   :  { %3335 = vrot.lane.b32.xlu1 %v3334_v56, %s3386_s23  ;;  %v5487_v45 = vpop.permute.xlu0 %3240  ;;  %v6775_v56 = vld [vmem:[#allocation35_spill] sm:$0xff]  ;;  %v6786_v60 = vrot.slane %v6785_v18, 6 }
 0x25c   :  { %v2789_v29 = vsel %vm4081_vm1, %v2776_v34, %v6775_v56  ;;  %v6791_v34 = vld [vmem:[#allocation45_spill] sm:$0xff] }
 0x25d   :  { %v1870_v63 = vpop.permute.xlu1 %1869  ;;  %2504 = vrot.lane.b32.xlu0 %v2501_v22, %s3384_s0  ;;  %v2767_v4 = vsel %vm4058_vm15, %v2752_v17, %v6786_v60  ;;  %v6792_v53 = vunpack.i.h.bf16 %v6791_v34 }
 0x25e   :  { %v1879_v12 = vsel %vm6768_vm10, %v1870_v63, %v1872_v40  ;;  %v2779_v40 = vsel %vm6774_vm9, %v2769_v30, %v6773_v44  ;;  %v6783_v30 = vld [vmem:[#allocation38_spill] sm:$0xff]  ;;  %v2518_v44 = vrot.slane %v6761_v54, 3  ;;  %vm6793_vm10 = vmmov %vm6787_vm13 }
 0x25f   :  { %v1884_v20 = vand.u32 %v1879_v12, %v6751_v31  ;;  %2506 = vrot.lane.b32.xlu1 %v6769_v10, %s3384_s0  ;;  %v5509_v39 = vpop.permute.xlu0 %1405  ;;  %v2790_v22 = vsel %vm4081_vm1, %v2779_v40, %v6779_v49  ;;  %v2796_v59 = vsel %vm6784_vm2, %v2789_v29, %v6783_v30  ;;  %v6790_v12 = vld [vmem:[#allocation6_spill] sm:$0xff]  ;;  %v2519_v40 = vrot.slane %v6771_v6, 3  ;;  %vm6797_vm9 = vmmov %vm6781_vm4 }
 0x260   :  { %v2798_v1 = vsel %vm6789_vm5, %v2790_v22, %v6788_v13  ;;  %v5565_v49 = vcombine.low %v6769_v10, %v6769_v10  ;;  %v6796_v22 = vld [vmem:[#allocation32_spill] sm:$0xff]  ;;  %v3173_v13 = vunpack.i.h.bf16 %v4765_v57  ;;  %vm6801_vm4 = vmmov %vm6793_vm10  ;;  %vm6806_vm5 = vcmask 916480  }
 0x261   :  { %1908 = vmatpush1.bf16.msra.mxu0 %v1884_v20  ;;  %v5515_v38 = vpop.permute.xlu1 %1409  ;;  %2508 = vrot.lane.b32.xlu0 %v6759_v0, %s3384_s0  ;;  %v2786_v0 = vsel %vm6782_vm14, %v2771_v43, %v6744_v2  ;;  %v2791_v20 = vsel %vm4081_vm1, %v2782_v14, %v6790_v12  ;;  %v2773_v16 = vsel %vm6797_vm9, %v2767_v4, %v6796_v22  ;;  %v3227_v14 = vunpack.i.l.bf16 %v5415_v46  ;;  %vm6803_vm14 = vmmov %vm6784_vm2 }
 0x262   :  { %v2792_v33 = vsel %vm4081_vm1, %v2786_v0, %v6792_v53  ;;  %v2800_v17 = vsel %vm6795_vm11, %v2791_v20, %v6794_v55  ;;  %v6798_v0 = vld [vmem:[#allocation49_spill] sm:$0xff]  ;;  %v3339_v60 = vpack.i.bf16 %v2519_v40, %v2518_v44  ;;  %v3232_v4 = vunpack.i.l.bf16 %v5420_v32  ;;  %v6802_v44 = vld [vmem:[#allocation43_spill] sm:$0xff]  ;;  %vm6804_vm2 = vmmov %vm6801_vm4 }
 0x263   :  { %2510 = vrot.lane.b32.xlu1 %v6778_v7, %s3384_s0  ;;  %v2001_v25 = vpop.permute.xlu0 %2000  ;;  %v2803_v30 = vsel %vm6799_vm3, %v2792_v33, %v6798_v0  ;;  %v6800_v20 = vld [vmem:[#allocation41_spill] sm:$0xff]  ;;  %v1352_v33 = vsel %vm6801_vm4, %v3173_v13, %v3227_v14  ;;  %v2540_v55 = vcombine.low %v6742_v62, %v6742_v62  ;;  %vm6809_vm11 = vmmov %vm6804_vm2 }
 0x264   :  { %v2788_v34 = vsel %vm4081_vm1, %v2773_v16, %v6800_v20  ;;  %vm6810_vm9 = vmmov %vm6806_vm5  ;;  %v3243_v20 = vunpack.i.h.bf16 %v5487_v45 }
 0x265   :  { %v2003_v37 = vpop.permute.xlu1 %2002  ;;  %2811 = vrot.lane.b32.xlu0 %v2796_v59, %s3392_s29  ;;  %v2520_v59 = vrot.slane %v6765_v28, 3  ;;  %v2794_v40 = vsel %vm6803_vm14, %v2788_v34, %v6802_v44  ;;  %vm6811_vm3 = vmmov %vm6806_vm5  ;;  %vm6813_vm14 = vcmask 1041408  }
 0x266   :  { %v5541_v63 = vsel %vm6787_vm13, %v2001_v25, %v2003_v37  ;;  %vm6805_vm13 = vmmov %vm6804_vm2 }
 0x267   :  { %2813 = vrot.lane.b32.xlu1 %v2798_v1, %s3392_s29  ;;  %v2005_v43 = vpop.permute.xlu0 %2004  ;;  %v3228_v1 = vunpack.i.h.bf16 %v5415_v46  ;;  %v3213_v46 = vunpack.i.h.bf16 %v4981_v19  ;;  %v1373_v19 = vsel %vm6806_vm5, %v5423_v21, %v4891_v11  ;;  %vm6812_vm4 = vmmov %vm6811_vm3  ;;  %vm6816_vm5 = vcmask 908288  }
 0x268   :  { %v5557_v56 = vsel %vm6793_vm10, %v2003_v37, %v2005_v43  ;;  %v2516_v37 = vrot.slane %v6785_v18, 3  ;;  %v3233_v43 = vunpack.i.h.bf16 %v5420_v32  ;;  %v2557_v32 = vrot.slane %v6761_v54, 2  ;;  %vm6808_vm10 = vmmov %vm6804_vm2 }
 0x269   :  { %v5559_v29 = vpop.permute.xlu1 %1401  ;;  %2815 = vrot.lane.b32.xlu0 %v2800_v17, %s3392_s29  ;;  %v1353_v17 = vsel %vm6804_vm2, %v3227_v14, %v3228_v1  ;;  %v1354_v16 = vsel %vm6805_vm13, %v3228_v1, %v3232_v4  ;;  %v2007_v62 = vsel %vm6808_vm10, %v5180_v23, %v2001_v25  ;;  %v2555_v14 = vrot.slane %v6785_v18, 2  ;;  %vm6817_vm10 = vmmov %vm6816_vm5 }
 0x26a   :  { %v3344_v57 = vpack.i.bf16 %v2516_v37, %v2520_v59  ;;  %v1565_v59 = vsel %vm4523_vm8, %v5201_v9, %v1352_v33  ;;  %v1351_v1 = vsel %vm6809_vm11, %v3233_v43, %v3173_v13  ;;  %v3237_v54 = vunpack.i.l.bf16 %v5470_v48 }
 0x26b   :  { %2817 = vrot.lane.b32.xlu1 %v2803_v30, %s3392_s29  ;;  %v5579_v12 = vpop.permute.xlu0 %3245  ;;  %v2558_v30 = vrot.slane %v6771_v6, 2  ;;  %v3242_v6 = vunpack.i.l.bf16 %v5487_v45  ;;  %v2559_v4 = vrot.slane %v6765_v28, 2  ;;  %v1374_v9 = vsel %vm6810_vm9, %v4891_v11, %v5436_v47  ;;  %vm6819_vm9 = vmmov %vm6816_vm5 }
 0x26c   :  { %v1567_v25 = vsel %vm4523_vm8, %v5222_v61, %v1354_v16  ;;  %v3238_v18 = vunpack.i.h.bf16 %v5470_v48  ;;  %v5626_v13 = vcombine.low %v6744_v2, %v6744_v2  ;;  %v1375_v28 = vsel %vm6811_vm3, %v5436_v47, %v5438_v36 }
 0x26d   :  { %v5584_v53 = vpop.permute.xlu1 %3250  ;;  %2502 = vrot.lane.b32.xlu0 %v5565_v49, %s3384_s0  ;;  %v1372_v11 = vsel %vm6812_vm4, %v5466_v35, %v5423_v21  ;;  %v2154_v61 = vsel %vm6813_vm14, %v4945_v52, %v2007_v62  ;;  %vm6814_vm2 = vcmask 1044480   ;;  %v1566_v33 = vsel %vm4523_vm8, %v5205_v51, %v1353_v17  ;;  %vm6821_vm4 = vmmov %vm6816_vm5 }
 0x26e   :  { %v1574_v34 = vsel %vm6814_vm2, %v1565_v59, %v1373_v19  ;;  %v1564_v47 = vsel %vm4523_vm8, %v5229_v24, %v1351_v1  ;;  %v3349_v43 = vpack.i.bf16 %v2558_v30, %v2557_v32  ;;  %vm6815_vm13 = vmmov %vm6814_vm2  ;;  %v1392_v35 = vsel %vm6816_vm5, %v3213_v46, %v3237_v54 }
 0x26f   :  { %3340 = vrot.lane.b32.xlu1 %v3339_v60, %s3385_s22  ;;  %v1999_v0 = vpop.permute.xlu0 %1998  ;;  %v1578_v21 = vsel %vm6815_vm13, %v1566_v33, %v1374_v9  ;;  %v1394_v45 = vsel %vm6817_vm10, %v3238_v18, %v3242_v6  ;;  %v3354_v52 = vpack.i.bf16 %v2555_v14, %v2559_v4  ;;  %vm6818_vm11 = vmmov %vm6814_vm2  ;;  %v1393_v51 = vsel %vm6819_vm9, %v3237_v54, %v3238_v18  ;;  %v6827_v14 = vld [vmem:[#allocation17_spill] sm:$0xff]  ;;  %v6841_v33 = vld [vmem:[#allocation70_spill] sm:$0xff] }
 0x270   :  { %vm6820_vm3 = vmmov %vm6814_vm2  ;;  %v2163_v24 = vsel %vm4058_vm15, %v2154_v61, %v4966_v27  ;;  %v3248_v17 = vunpack.i.h.bf16 %v5579_v12  ;;  %v3252_v16 = vunpack.i.l.bf16 %v5584_v53  ;;  %v1585_v59 = vsel %vm4572_vm7, %v1574_v34, %v1392_v35  ;;  %v6833_v6 = vld [vmem:[#allocation69_spill] sm:$0xff] }
 0x271   :  { %v5608_v60 = vpop.permute.xlu1 %3255  ;;  %3345 = vrot.lane.b32.xlu0 %v3344_v57, %s3385_s22  ;;  %v1582_v57 = vsel %vm6818_vm11, %v1567_v25, %v1375_v28  ;;  %v1570_v44 = vsel %vm6820_vm3, %v1564_v47, %v1372_v11  ;;  %vm6822_vm14 = vmmov %vm6821_vm4  ;;  %vm6824_vm2 = vcmask 1031168   ;;  %vm6828_vm10 = vcmask 1042432   ;;  %v6838_v28 = vld [vmem:[#allocation62_spill] sm:$0xff] }
 0x272   :  { %v1412_v30 = vsel %vm6822_vm14, %v5074_v41, %v5509_v39  ;;  %v1587_v27 = vsel %vm4572_vm7, %v1582_v57, %v1394_v45  ;;  %vm6825_vm13 = vmmov %vm6821_vm4  ;;  %v5678_v1 = vsel %vm6828_vm10, %v2163_v24, %v6827_v14  ;;  %v3253_v54 = vunpack.i.h.bf16 %v5584_v53 }
 0x273   :  { %2809 = vrot.lane.b32.xlu1 %v2794_v40, %s3392_s29  ;;  %v1450_v48 = vpop.permute.xlu0 %1449  ;;  %v1391_v40 = vsel %vm6821_vm4, %v3243_v20, %v3213_v46  ;;  %vm6826_vm5 = vmmov %vm6821_vm4  ;;  %vm6830_vm9 = vcmask 1045504   ;;  %vm6831_vm3 = vcmask 900096   ;;  %vm6834_vm14 = vcmask 1041408  }
 0x274   :  { %v1414_v62 = vsel %vm6826_vm5, %v4972_v42, %v5515_v38  ;;  %vm6829_vm11 = vmmov %vm6821_vm4  ;;  %v1594_v38 = vsel %vm6830_vm9, %v1585_v59, %v1412_v30 }
 0x275   :  { %v1452_v36 = vpop.permute.xlu1 %1451  ;;  %2543 = vrot.lane.b32.xlu0 %v6778_v7, %s3385_s22  ;;  %v3247_v7 = vunpack.i.l.bf16 %v5579_v12  ;;  %v1413_v12 = vsel %vm6825_vm13, %v5509_v39, %v4972_v42  ;;  %v1411_v39 = vsel %vm6829_vm11, %v5559_v29, %v5074_v41  ;;  %v3257_v42 = vunpack.i.l.bf16 %v5608_v60  ;;  %vm6832_vm4 = vmmov %vm6831_vm3 }
 0x276   :  { %vm6837_vm5 = vmmov %vm6831_vm3 }
 0x277   :  { %2545 = vrot.lane.b32.xlu1 %v6744_v2, %s3385_s22  ;;  %v1454_v32 = vpop.permute.xlu0 %1453  ;;  %v2006_v2 = vsel %vm6824_vm2, %v1999_v0, %v5180_v23  ;;  %v1586_v23 = vsel %vm4572_vm7, %v1578_v21, %v1393_v51  ;;  %v1584_v0 = vsel %vm4572_vm7, %v1570_v44, %v1391_v40  ;;  %v1431_v53 = vsel %vm6831_vm3, %v3247_v7, %v3248_v17  ;;  %vm6835_vm2 = vmmov %vm6830_vm9 }
 0x278   :  { %v2151_v4 = vsel %vm6834_vm14, %v6833_v6, %v2006_v2  ;;  %v1598_v25 = vsel %vm6835_vm2, %v1586_v23, %v1413_v12  ;;  %vm6836_vm13 = vmmov %vm6835_vm2  ;;  %v1458_v41 = vsel %vm6837_vm5, %v1450_v48, %v1452_v36  ;;  %v1605_v57 = vsel %vm4667_vm12, %v1594_v38, %v1431_v53  ;;  %v6849_v2 = vld [vmem:[#allocation74_spill] sm:$0xff] }
 0x279   :  { %v1456_v46 = vpop.permute.xlu1 %1455  ;;  %2547 = vrot.lane.b32.xlu0 %v6739_v15, %s3385_s22  ;;  %v1432_v15 = vsel %vm6832_vm4, %v3248_v17, %v3252_v16  ;;  %v1602_v18 = vsel %vm6836_vm13, %v1587_v27, %v1414_v62  ;;  %vm6839_vm10 = vmmov %vm6835_vm2  ;;  %v2162_v47 = vsel %vm4058_vm15, %v2151_v4, %v6841_v33  ;;  %v1459_v51 = vsel %vm6831_vm3, %v1452_v36, %v1454_v32 }
 0x27a   :  { %v1590_v11 = vsel %vm6839_vm10, %v1584_v0, %v1411_v39  ;;  %vm6840_vm11 = vmmov %vm6831_vm3  ;;  %v1606_v45 = vsel %vm4667_vm12, %v1598_v25, %v1432_v15  ;;  %vm6845_vm14 = vcmask 916480   ;;  %vm6846_vm2 = vcmask 1046528   ;;  %v6857_v15 = vld [vmem:[#allocation68_spill] sm:$0xff] }
 0x27b   :  { %2549 = vrot.lane.b32.xlu1 %v2540_v55, %s3385_s22  ;;  %v1448_v9 = vpop.permute.xlu0 %1447  ;;  %v2179_v55 = vsel %vm4081_vm1, %v5678_v1, %v6838_v28  ;;  %v1433_v20 = vsel %vm6840_vm11, %v3252_v16, %v3253_v54  ;;  %vm6842_vm9 = vmmov %vm6831_vm3  ;;  %v1614_v17 = vsel %vm6846_vm2, %v1605_v57, %v1458_v41  ;;  %vm6850_vm5 = vcmask 1042432   ;;  %v6859_v41 = vld [vmem:[#allocation66_spill] sm:$0xff]  ;;  %v2931_v57 = vld [vmem:[%s6165_s2 + $0x8] sm:$0xff] }
 0x27c   :  { %v1430_v21 = vsel %vm6842_vm9, %v3257_v42, %v3247_v7  ;;  %vm6844_vm4 = vmmov %vm6831_vm3  ;;  %v2167_v12 = vsel %vm6850_vm5, %v2162_v47, %v6849_v2  ;;  %v2596_v25 = vrot.slane %v6749_v58, 1  ;;  %v2593_v28 = vrot.slane %v6752_v50, 1  ;;  %v6864_v50 = vld [vmem:[#allocation61_spill] sm:$0xff] }
 0x27d   :  { %v3261_v29 = vpop.permute.xlu1 %3260  ;;  %2541 = vrot.lane.b32.xlu0 %v5626_v13, %s3385_s22  ;;  %v1460_v44 = vsel %vm6844_vm4, %v1454_v32, %v1456_v46  ;;  %vm6847_vm13 = vmmov %vm6831_vm3  ;;  %v1604_v36 = vsel %vm4667_vm12, %v1590_v11, %v1430_v21  ;;  %v2178_v6 = vsel %vm4081_vm1, %v2167_v12, %v6857_v15  ;;  %v6865_v33 = vmov 0  }
 0x27e   :  { %v3263_v61 = vunpack.i.h.bf16 %v3261_v29  ;;  %v3262_v34 = vunpack.i.l.bf16 %v3261_v29  ;;  %v1457_v16 = vsel %vm6847_vm13, %v1448_v9, %v1450_v48  ;;  %v1607_v48 = vsel %vm4667_vm12, %v1602_v18, %v1433_v20  ;;  %vm6851_vm10 = vmmov %vm6846_vm2 }
 0x27f   :  { %3350 = vrot.lane.b32.xlu1 %v3349_v43, %s3386_s23  ;;  %v3266_v24 = vpop.permute.xlu0 %3265  ;;  %v1618_v46 = vsel %vm6851_vm10, %v1606_v45, %v1459_v51  ;;  %vm6852_vm11 = vmmov %vm6845_vm14  ;;  %v2595_v9 = vrot.slane %v6747_v3, 1 }
 0x280   :  { %v1477_v40 = vsel %vm6845_vm14, %v3262_v34, %v3263_v61  ;;  %v3268_v7 = vunpack.i.h.bf16 %v3266_v24  ;;  %v3267_v30 = vunpack.i.l.bf16 %v3266_v24  ;;  %vm6853_vm9 = vmmov %vm6846_vm2 }
 0x281   :  { %v5722_v59 = vpop.permute.xlu1 %3270  ;;  %v1625_v43 = vsel %vm4682_vm0, %v1614_v17, %v1477_v40  ;;  %3355 = vrot.lane.b32.xlu0 %v3354_v52, %s3386_s23  ;;  %v1622_v14 = vsel %vm6853_vm9, %v1607_v48, %v1460_v44  ;;  %vm6854_vm3 = vmmov %vm6852_vm11  ;;  %vm6866_vm9 = vcmask 1031168  }
 0x282   :  { %v3272_v32 = vunpack.i.l.bf16 %v5722_v59  ;;  %1909 = vmatprep.subr.bf16.mxu0 %v1625_v43  ;;  %v1479_v62 = vsel %vm6852_vm11, %v3267_v30, %v3268_v7  ;;  %v1478_v1 = vsel %vm6854_vm3, %v3263_v61, %v3267_v30  ;;  %vm6855_vm4 = vmmov %vm6846_vm2  ;;  %v3359_v61 = vpack.i.bf16 %v2596_v25, %v2595_v9  ;;  %v6871_v9 = vld [vmem:[#allocation57_spill] sm:$0xff] }
 0x283   :  { %2581 = vrot.lane.b32.xlu1 %v5565_v49, %s3386_s23  ;;  %v1610_v54 = vsel %vm6855_vm4, %v1604_v36, %v1457_v16  ;;  %v5741_v23 = vpop.permute.xlu0 %3275  ;;  %vm6856_vm14 = vmmov %vm6854_vm3  ;;  %v1627_v0 = vsel %vm4682_vm0, %v1622_v14, %v1479_v62  ;;  %v1626_v39 = vsel %vm4682_vm0, %v1618_v46, %v1478_v1  ;;  %v3258_v49 = vunpack.i.h.bf16 %v5608_v60 }
 0x284   :  { %v1476_v52 = vsel %vm6856_vm14, %v3272_v32, %v3262_v34  ;;  %v3277_v42 = vunpack.i.l.bf16 %v5741_v23  ;;  %1952 = vmatprep.subr.bf16.mxu1 %v1627_v0  ;;  %v2578_v60 = vcombine.low %v6796_v22, %v6796_v22  ;;  %vm6858_vm2 = vmmov %vm6847_vm13  ;;  %vm6860_vm13 = vcmask 1043456  }
 0x285   :  { %v5750_v38 = vpop.permute.xlu1 %3280  ;;  %v1624_v53 = vsel %vm4682_vm0, %v1610_v54, %v1476_v52  ;;  %2583 = vrot.lane.b32.xlu0 %v6796_v22, %s3386_s23  ;;  %1953 = vmatpush1.bf16.msra.mxu1 %v1626_v39  ;;  %v5773_v29 = vsel %vm6860_vm13, %v2179_v55, %v6859_v41  ;;  %v2597_v22 = vrot.slane %v6750_v8, 1  ;;  %vm6861_vm5 = vmmov %vm6858_vm2  ;;  %vm2141_vm11 = vcmask 785408  }
 0x286   :  { %v3283_v4 = vunpack.i.h.bf16 %v5750_v38  ;;  %1910 = vmatpush1.bf16.msra.mxu0 %v1624_v53  ;;  %v5767_v18 = vsel %vm6858_vm2, %v3258_v49, %v3277_v42  ;;  %vm6863_vm10 = vmmov %vm6860_vm13  ;;  %vm6870_vm14 = vcmask 1041408   ;;  %vm6876_vm13 = vcmask 1042432  }
 0x287   :  { %2585 = vrot.lane.b32.xlu1 %v6769_v10, %s3386_s23  ;;  %v5780_v58 = vpop.permute.xlu0 %2037  ;;  %v2195_v11 = vsel %vm4523_vm8, %v5773_v29, %v5767_v18  ;;  %v6862_v10 = vld [vmem:[#allocation72_spill] sm:$0xff]  ;;  %v3364_v34 = vpack.i.bf16 %v2593_v28, %v2597_v22  ;;  %vm6867_vm3 = vmmov %vm6866_vm9 }
 0x288   :  { %v5778_v3 = vsel %vm6861_vm5, %v3283_v4, %v3258_v49  ;;  %v5788_v20 = vsel %vm6863_vm10, %v2178_v6, %v6862_v10  ;;  %2994 = vmatmul.mubr.msk.bf16.vlgmr.msra.gmra.mxu1 %vm6374_vm6, %v6864_v50  ;;  %vm6868_vm4 = vmmov %vm6867_vm3  ;;  %v6869_v4 = vld [vmem:[#allocation56_spill] sm:$0xff] }
 0x289   :  { %v5790_v55 = vpop.permute.xlu1 %2039  ;;  %v2194_v8 = vsel %vm4523_vm8, %v5788_v20, %v5778_v3  ;;  %2993 = vmatmul.mubr.msk.bf16.vlgmr.msra.gmra.mxu0 %vm6374_vm6, %v6864_v50  ;;  %2587 = vrot.lane.b32.xlu0 %v5626_v13, %s3386_s23  ;;  %v2930_v13 = vld [vmem:[%s6165_s2] sm:$0xff]  ;;  %vm6872_vm2 = vmmov %vm6870_vm14  ;;  %v6873_v22 = vld [vmem:[#allocation60_spill] sm:$0xff] }
 0x28a   :  { %2427 = vmatprep.mubr.bf16.mxu1 %v6865_v33  ;;  %2384 = vmatprep.mubr.bf16.mxu0 %v6865_v33  ;;  %v2160_v25 = vsel %vm6872_vm2, %v6871_v9, %v5557_v56  ;;  %v6874_v50 = vld [vmem:[#allocation64_spill] sm:$0xff]  ;;  %vm6878_vm5 = vmmov %vm6876_vm13  ;;  %v3278_v56 = vunpack.i.h.bf16 %v5741_v23 }
 0x28b   :  { %2579 = vrot.lane.b32.xlu1 %v2578_v60, %s3386_s23  ;;  %v5804_v47 = vpop.permute.xlu0 %2041  ;;  %v2157_v60 = vsel %vm6870_vm14, %v6869_v4, %v5541_v63  ;;  %v6877_v63 = vld [vmem:[#allocation63_spill] sm:$0xff]  ;;  %vm6879_vm10 = vmmov %vm6867_vm3  ;;  %vm6886_vm14 = vcmask 1043456  }
 0x28c   :  { %v2164_v10 = vsel %vm4058_vm15, %v2157_v60, %v6873_v22  ;;  %vm6888_vm2 = vmmov %vm6886_vm14 }
 0x28d   :  { %v5807_v21 = vpop.permute.xlu1 %2043  ;;  %3360 = vrot.lane.b32.xlu0 %v3359_v61, %s3391_s28  ;;  %v2165_v61 = vsel %vm4058_vm15, %v2160_v25, %v6874_v50 }
 0x28f   :  { %3365 = vrot.lane.b32.xlu1 %v3364_v34, %s3391_s28  ;;  %v2329_v45 = vpop.permute.xlu0 %2328 }
 0x291   :  { %v2331_v51 = vpop.permute.xlu1 %2330  ;;  %2934 = vperm.xlu0 %3369, %v2930_v13   ;;  %v6875_v13 = vld [vmem:[#allocation23_spill] sm:$0xff] }
 0x292   :  { %v2337_v44 = vsel %vm2141_vm11, %v2329_v45, %v2331_v51 }
 0x293   :  { %v2344_v24 = vand.u32 %v2337_v44, %v6751_v31  ;;  %2939 = vperm.xlu1 %3370, %v2931_v57   ;;  %v2333_v40 = vpop.permute.xlu0 %2332  ;;  %v2176_v57 = vsel %vm6878_vm5, %v2165_v61, %v6877_v63  ;;  %vm6890_vm5 = vcmask 1044480  }
 0x294   :  { %v2338_v16 = vsel %vm2141_vm11, %v2331_v51, %v2333_v40  ;;  %v3282_v51 = vunpack.i.l.bf16 %v5750_v38 }
 0x295   :  { %v2335_v17 = vpop.permute.xlu1 %2334  ;;  %2364 = vmatprep.subr.bf16.mxu0 %v2344_v24  ;;  %v2347_v30 = vand.u32 %v2338_v16, %v6751_v31  ;;  %v6881_v16 = vld [vmem:[#allocation26_spill] sm:$0xff] }
 0x296   :  { %v2339_v7 = vsel %vm2141_vm11, %v2333_v40, %v2335_v17  ;;  %v6880_v40 = vld [vmem:[#allocation65_spill] sm:$0xff] }
 0x297   :  { %v2350_v43 = vand.u32 %v2339_v7, %v6751_v31  ;;  %v2036_v2 = vpop.permute.xlu0 %2035  ;;  %v2181_v7 = vsel %vm4081_vm1, %v2176_v57, %v6881_v16 }
 0x299   :  { %v5823_v12 = vpop.permute.xlu1 %3285  ;;  %2407 = vmatprep.subr.bf16.mxu1 %v2350_v43 }
 0x29a   :  { %2408 = vmatpush1.bf16.msra.mxu1 %v2347_v30 }
 0x29b   :  { %v3291_v36 = vpop.permute.xlu0 %3290 }
 0x29c   :  { %v3293_v23 = vunpack.i.h.bf16 %v3291_v36  ;;  %v3292_v60 = vunpack.i.l.bf16 %v3291_v36 }
 0x29d   :  { %v2327_v32 = vpop.permute.xlu1 %2326 }
 0x29e   :  { %v2336_v48 = vsel %vm2141_vm11, %v2327_v32, %v2329_v45  ;;  %v2173_v45 = vsel %vm6876_vm13, %v2164_v10, %v6875_v13 }
 0x29f   :  { %v2341_v46 = vand.u32 %v2336_v48, %v6751_v31  ;;  %v5827_v62 = vpop.permute.xlu0 %2076  ;;  %v2180_v17 = vsel %vm4081_vm1, %v2173_v45, %v6880_v40 }
 0x2a1   :  { %v2079_v14 = vpop.permute.xlu1 %2078  ;;  %2365 = vmatpush1.bf16.msra.mxu0 %v2341_v46  ;;  %v3288_v46 = vunpack.i.h.bf16 %v5823_v12 }
 0x2a3   :  { %v2081_v1 = vpop.permute.xlu0 %2080 }
 0x2a5   :  { %v2083_v54 = vpop.permute.xlu1 %2082 }
 0x2a7   :  { %v2466_v52 = vpop.permute.xlu0 %2465 }
 0x2a9   :  { %v2468_v0 = vpop.permute.xlu1 %2467 }
 0x2aa   :  { %v5830_v39 = vsel %vm6866_vm9, %v2466_v52, %v2468_v0  ;;  %vm6882_vm9 = vcmask 900096  }
 0x2ab   :  { %v2470_v49 = vpop.permute.xlu0 %2469  ;;  %v2027_v43 = vsel %vm6882_vm9, %v3277_v42, %v3278_v56  ;;  %v3273_v42 = vunpack.i.h.bf16 %v5722_v59 }
 0x2ac   :  { %v5833_v15 = vsel %vm6867_vm3, %v2468_v0, %v2470_v49  ;;  %vm6883_vm3 = vmmov %vm6882_vm9  ;;  %v6885_v0 = vld [vmem:[#allocation73_spill] sm:$0xff] }
 0x2ad   :  { %v2472_v53 = vpop.permute.xlu1 %2471  ;;  %v2028_v38 = vsel %vm6883_vm3, %v3278_v56, %v3282_v51 }
 0x2ae   :  { %v5836_v6 = vsel %vm6868_vm4, %v2470_v49, %v2472_v53  ;;  %vm6884_vm4 = vcmask 916480   ;;  %v2189_v49 = vsel %vm6886_vm14, %v2180_v17, %v6885_v0  ;;  %v6887_v53 = vld [vmem:[#allocation67_spill] sm:$0xff]  ;;  %vm6895_vm14 = vmmov %vm6890_vm5 }
 0x2af   :  { %v2075_v41 = vpop.permute.xlu0 %2074  ;;  %v2046_v48 = vsel %vm6884_vm4, %v5780_v58, %v5790_v55  ;;  %v2192_v4 = vsel %vm6888_vm2, %v2181_v7, %v6887_v53  ;;  %vm6889_vm13 = vmmov %vm6884_vm4  ;;  %v2196_v25 = vsel %vm4523_vm8, %v2189_v49, %v2027_v43 }
 0x2b0   :  { %v2047_v9 = vsel %vm6889_vm13, %v5790_v55, %v5804_v47  ;;  %v2204_v36 = vsel %vm6890_vm5, %v2195_v11, %v2046_v48  ;;  %vm6892_vm9 = vmmov %vm6884_vm4 }
 0x2b1   :  { %v5844_v28 = vpop.permute.xlu1 %3295  ;;  %vm6893_vm3 = vmmov %vm6884_vm4  ;;  %v2208_v18 = vsel %vm6895_vm14, %v2196_v25, %v2047_v9  ;;  %vm6904_vm14 = vcmask 1045504  }
 0x2b2   :  { %v3298_v55 = vunpack.i.h.bf16 %v5844_v28  ;;  %v3297_v10 = vunpack.i.l.bf16 %v5844_v28  ;;  %vm6896_vm2 = vmmov %vm6893_vm3 }
 0x2b3   :  { %v3301_v34 = vpop.permute.xlu0 %3300  ;;  %v2064_v29 = vsel %vm6896_vm2, %v3293_v23, %v3273_v42  ;;  %vm6897_vm13 = vmmov %vm6896_vm2 }
 0x2b4   :  { %v3302_v63 = vunpack.i.l.bf16 %v3301_v34  ;;  %v2067_v11 = vsel %vm6897_vm13, %v3288_v46, %v3292_v60  ;;  %vm6905_vm2 = vmmov %vm6904_vm14 }
 0x2b5   :  { %v2464_v44 = vpop.permute.xlu1 %2463  ;;  %vm6906_vm13 = vmmov %vm6905_vm2 }
 0x2b6   :  { %v5859_v24 = vsel %vm6879_vm10, %v2464_v44, %v2466_v52  ;;  %v3287_v52 = vunpack.i.l.bf16 %v5823_v12  ;;  %v2197_v12 = vsel %vm4523_vm8, %v2192_v4, %v2028_v38  ;;  %vm6891_vm10 = vmmov %vm6884_vm4 }
 0x2b7   :  { %v5867_v30 = vpop.permute.xlu0 %3305  ;;  %v2048_v59 = vsel %vm6891_vm10, %v5804_v47, %v5807_v21  ;;  %vm6894_vm4 = vmmov %vm6893_vm3  ;;  %v3303_v47 = vunpack.i.h.bf16 %v3301_v34  ;;  %vm6898_vm10 = vcmask 908288  }
 0x2b8   :  { %v2065_v61 = vsel %vm6892_vm9, %v3273_v42, %v3287_v52  ;;  %v2066_v13 = vsel %vm6893_vm3, %v3287_v52, %v3288_v46  ;;  %v2045_v45 = vsel %vm6894_vm4, %v2036_v2, %v5780_v58  ;;  %v2212_v21 = vsel %vm6890_vm5, %v2197_v12, %v2048_v59  ;;  %vm6899_vm6 = vmmov %vm6898_vm10 }
 0x2b9   :  { %v2115_v32 = vpop.permute.xlu1 %2114  ;;  %v2085_v28 = vsel %vm6898_vm10, %v5827_v62, %v2079_v14  ;;  %v2086_v57 = vsel %vm6899_vm6, %v2079_v14, %v2081_v1  ;;  %vm6900_vm9 = vmmov %vm6899_vm6  ;;  %v2215_v2 = vsel %vm4572_vm7, %v2204_v36, %v2065_v61  ;;  %v2216_v34 = vsel %vm4572_vm7, %v2208_v18, %v2066_v13 }
 0x2ba   :  { %v2087_v56 = vsel %vm6900_vm9, %v2081_v1, %v2083_v54  ;;  %vm6901_vm3 = vmmov %vm6890_vm5  ;;  %v2217_v14 = vsel %vm4572_vm7, %v2212_v21, %v2067_v11  ;;  %v3307_v3 = vunpack.i.l.bf16 %v5867_v30  ;;  %v2224_v20 = vsel %vm6904_vm14, %v2215_v2, %v2085_v28  ;;  %v5978_v28 = vld [vmem:[%s6164_s1] sm:$0xff]  }
 0x2bb   :  { %v2117_v22 = vpop.permute.xlu0 %2116  ;;  %v2200_v58 = vsel %vm6901_vm3, %v2194_v8, %v2045_v45  ;;  %vm6902_vm4 = vmmov %vm6899_vm6  ;;  %v2228_v8 = vsel %vm6905_vm2, %v2216_v34, %v2086_v57  ;;  %v2232_v17 = vsel %vm6906_vm13, %v2217_v14, %v2087_v56  ;;  %vm6909_vm9 = vcmask 900096   ;;  %v6921_v2 = vld [vmem:[#allocation78_spill] sm:$0xff] }
 0x2bc   :  { %v2104_v44 = vsel %vm6902_vm4, %v3297_v10, %v3298_v55  ;;  %v2214_v1 = vsel %vm4572_vm7, %v2200_v58, %v2064_v29  ;;  %vm6903_vm6 = vmmov %vm6902_vm4  ;;  %v2123_v43 = vsel %vm6909_vm9, %v2115_v32, %v2117_v22  ;;  %vm6913_vm14 = vcmask 1046528  }
 0x2bd   :  { %v2119_v50 = vpop.permute.xlu1 %2118  ;;  %v2105_v54 = vsel %vm6903_vm6, %v3298_v55, %v3302_v63  ;;  %vm6907_vm5 = vmmov %vm6902_vm4  ;;  %v2235_v46 = vsel %vm4667_vm12, %v2224_v20, %v2104_v44 }
 0x2be   :  { %v2106_v16 = vsel %vm6907_vm5, %v3302_v63, %v3303_v47  ;;  %vm6908_vm10 = vmmov %vm6902_vm4  ;;  %v2236_v52 = vsel %vm4667_vm12, %v2228_v8, %v2105_v54  ;;  %v6926_v8 = vld [vmem:[#allocation84_spill] sm:$0xff] }
 0x2bf   :  { %v2121_v51 = vpop.permute.xlu0 %2120  ;;  %v2084_v7 = vsel %vm6908_vm10, %v2075_v41, %v5827_v62  ;;  %vm6910_vm3 = vmmov %vm6909_vm9  ;;  %v2237_v41 = vsel %vm4667_vm12, %v2232_v17, %v2106_v16  ;;  %vm6917_vm10 = vcmask 1045504   ;;  %v6928_v16 = vld [vmem:[#allocation81_spill] sm:$0xff] }
 0x2c0   :  { %v2124_v38 = vsel %vm6910_vm3, %v2117_v22, %v2119_v50  ;;  %vm6911_vm4 = vmmov %vm6910_vm3 }
 0x2c1   :  { %v2113_v40 = vpop.permute.xlu1 %2112  ;;  %v2125_v0 = vsel %vm6911_vm4, %v2119_v50, %v2121_v51  ;;  %vm6912_vm6 = vmmov %vm6907_vm5  ;;  %v2248_v42 = vsel %vm6913_vm14, %v2236_v52, %v2124_v38  ;;  %v2220_v50 = vsel %vm6917_vm10, %v2214_v1, %v2084_v7  ;;  %v6924_v1 = vld [vmem:[#allocation77_spill] sm:$0xff]  ;;  %vm6932_vm10 = vcmask 900096  }
 0x2c2   :  { %v2103_v23 = vsel %vm6912_vm6, %v3307_v3, %v3297_v10  ;;  %vm6914_vm2 = vmmov %vm6910_vm3  ;;  %vm6919_vm3 = vcmask 203776   ;;  %vm6922_vm6 = vcmask 1041408  }
 0x2c3   :  { %v3311_v48 = vpop.permute.xlu0 %3310  ;;  %v2122_v9 = vsel %vm6914_vm2, %v2113_v40, %v2115_v32  ;;  %vm6915_vm13 = vmmov %vm6913_vm14  ;;  %v2234_v63 = vsel %vm4667_vm12, %v2220_v50, %v2103_v23  ;;  %v2620_v34 = vsel %vm6922_vm6, %v6921_v2, %v5830_v39  ;;  %vm2819_vm14 = vcmask 777216   ;;  %v6923_v40 = vld [vmem:[#allocation82_spill] sm:$0xff] }
 0x2c4   :  { %v3313_v53 = vunpack.i.h.bf16 %v3311_v48  ;;  %v3312_v4 = vunpack.i.l.bf16 %v3311_v48  ;;  %v2244_v12 = vsel %vm6915_vm13, %v2235_v46, %v2123_v43  ;;  %vm6916_vm5 = vmmov %vm6915_vm13  ;;  %v2629_v14 = vsel %vm4058_vm15, %v2620_v34, %v6923_v40 }
 0x2c5   :  { %v3316_v49 = vpop.permute.xlu1 %3315  ;;  %v2252_v55 = vsel %vm6916_vm5, %v2237_v41, %v2125_v0  ;;  %vm6918_vm9 = vmmov %vm6916_vm5  ;;  %vm6927_vm13 = vcmask 1042432   ;;  %v6929_v0 = vld [vmem:[#allocation83_spill] sm:$0xff] }
 0x2c6   :  { %v3318_v60 = vunpack.i.h.bf16 %v3316_v49  ;;  %v3317_v62 = vunpack.i.l.bf16 %v3316_v49  ;;  %v2143_v25 = vsel %vm2141_vm11, %v3312_v4, %v3313_v53  ;;  %v2240_v18 = vsel %vm6918_vm9, %v2234_v63, %v2122_v9  ;;  %vm6920_vm4 = vmmov %vm6919_vm3 }
 0x2c7   :  { %v5950_v22 = vpop.permute.xlu0 %3320  ;;  %v2255_v36 = vsel %vm4682_vm0, %v2244_v12, %v2143_v25  ;;  %vm6925_vm2 = vmmov %vm6922_vm6  ;;  %v2636_v17 = vsel %vm6927_vm13, %v2629_v14, %v6926_v8  ;;  %vm6933_vm9 = vcmask 916480   ;;  %v3308_v25 = vunpack.i.h.bf16 %v5867_v30  ;;  %v6934_v12 = vld [vmem:[#allocation92_spill] sm:$0xff]  ;;  %v6945_v8 = vld [vmem:[#allocation79_spill] sm:$0xff] }
 0x2c8   :  { %v2145_v59 = vsel %vm2141_vm11, %v3317_v62, %v3318_v60  ;;  %v2144_v10 = vsel %vm2141_vm11, %v3313_v53, %v3317_v62  ;;  %v3322_v32 = vunpack.i.l.bf16 %v5950_v22  ;;  %2366 = vmatprep.subr.bf16.mxu0 %v2255_v36  ;;  %v2617_v54 = vsel %vm6925_vm2, %v6924_v1, %v5859_v24  ;;  %vm6930_vm5 = vmmov %vm6927_vm13 }
 0x2c9   :  { %v5958_v61 = vpop.permute.xlu1 %3325  ;;  %v2257_v13 = vsel %vm4682_vm0, %v2252_v55, %v2145_v59  ;;  %v2256_v45 = vsel %vm4682_vm0, %v2248_v42, %v2144_v10  ;;  %v2628_v39 = vsel %vm4058_vm15, %v2617_v54, %v6928_v16  ;;  %v6936_v55 = vld [vmem:[#allocation85_spill] sm:$0xff]  ;;  %vm6938_vm6 = vcmask 1044480   ;;  %vm6940_vm13 = vmmov %vm6933_vm9  ;;  %v6947_v16 = vld [vmem:[#allocation80_spill] sm:$0xff] }
 0x2ca   :  { %2409 = vmatprep.subr.bf16.mxu1 %v2257_v13  ;;  %v2142_v29 = vsel %vm2141_vm11, %v3322_v32, %v3312_v4  ;;  %v3328_v7 = vunpack.i.h.bf16 %v5958_v61  ;;  %v3327_v43 = vunpack.i.l.bf16 %v5958_v61  ;;  %v2633_v49 = vsel %vm6930_vm5, %v2628_v39, %v6929_v0  ;;  %v6931_v4 = vld [vmem:[#allocation86_spill] sm:$0xff] }
 0x2cb   :  { %2410 = vmatpush1.bf16.msra.mxu1 %v2256_v45  ;;  %v5969_v11 = vpop.permute.xlu0 %3330  ;;  %v2254_v47 = vsel %vm4682_vm0, %v2240_v18, %v2142_v29  ;;  %v2645_v23 = vsel %vm4081_vm1, %v2636_v17, %v6931_v4  ;;  %v2644_v10 = vsel %vm4081_vm1, %v2633_v49, %v6936_v55  ;;  %vm6939_vm2 = vcmask 908288   ;;  %v6941_v18 = vld [vmem:[#allocation91_spill] sm:$0xff]  ;;  %v6953_v49 = vld [vmem:[#allocation90_spill] sm:$0xff] }
 0x2cc   :  { %2367 = vmatpush1.bf16.msra.mxu0 %v2254_v47  ;;  %v2493_v62 = vsel %vm6932_vm10, %v3327_v43, %v3328_v7  ;;  %v3332_v4 = vunpack.i.l.bf16 %v5969_v11 }
 0x2cd   :  { %v5973_v21 = vpop.permute.xlu1 %3335 }
 0x2ce   :  { %2996 = vmatmul.mubr.msk.bf16.vlgmr.msra.gmra.mxu1 %vm6919_vm3, %v5978_v28  ;;  %v3337_v53 = vunpack.i.l.bf16 %v5973_v21  ;;  %vm6935_vm3 = vcmask 1043456  }
 0x2cf   :  { %2911 = vmatprep.mubr.bf16.mxu1 %v6865_v33  ;;  %v2505_v57 = vpop.permute.xlu0 %2504  ;;  %2995 = vmatmul.mubr.msk.bf16.vlgmr.msra.gmra.mxu0 %vm6920_vm4, %v5978_v28  ;;  %v2652_v36 = vsel %vm6935_vm3, %v2645_v23, %v6934_v12  ;;  %vm6937_vm4 = vmmov %vm6932_vm10  ;;  %v6955_v23 = vld [vmem:[#allocation93_spill] sm:$0xff] }
 0x2d0   :  { %2868 = vmatprep.mubr.bf16.mxu0 %v6865_v33  ;;  %v2492_v50 = vsel %vm6937_vm4, %v3337_v53, %v3327_v43  ;;  %v2661_v32 = vsel %vm4523_vm8, %v2652_v36, %v2493_v62  ;;  %vm6942_vm5 = vmmov %vm6935_vm3  ;;  %vm6946_vm3 = vcmask 1041408   ;;  %v6956_v62 = vld [vmem:[#allocation94_spill] sm:$0xff]  ;;  %v6957_v36 = vld [vmem:[#allocation95_spill] sm:$0xff] }
 0x2d1   :  { %v5985_v56 = vpop.permute.xlu1 %2506  ;;  %v2649_v29 = vsel %vm6942_vm5, %v2644_v10, %v6941_v18  ;;  %vm6943_vm10 = vmmov %vm6938_vm6  ;;  %v2623_v17 = vsel %vm6946_vm3, %v6945_v8, %v5833_v15  ;;  %v6959_v10 = vld [vmem:[#allocation96_spill] sm:$0xff] }
 0x2d2   :  { %v2513_v42 = vsel %vm6933_vm9, %v2505_v57, %v5985_v56  ;;  %v2660_v40 = vsel %vm4523_vm8, %v2649_v29, %v2492_v50  ;;  %vm6944_vm9 = vmmov %vm6939_vm2 }
 0x2d3   :  { %v5988_v51 = vpop.permute.xlu0 %2508  ;;  %v6035_v13 = vsel %vm6938_vm6, %v2661_v32, %v2513_v42  ;;  %vm6948_vm4 = vmmov %vm6946_vm3  ;;  %v3338_v32 = vunpack.i.h.bf16 %v5973_v21 }
 0x2d4   :  { %vm6965_vm3 = vmmov %vm6944_vm9 }
 0x2d5   :  { %v5990_v58 = vpop.permute.xlu1 %2510 }
 0x2d7   :  { %v2812_v44 = vpop.permute.xlu0 %2811 }
 0x2d9   :  { %v2814_v3 = vpop.permute.xlu1 %2813 }
 0x2da   :  { %v2821_v33 = vsel %vm2819_vm14, %v2812_v44, %v2814_v3 }
 0x2db   :  { %v2828_v20 = vand.u32 %v2821_v33, %v6751_v31  ;;  %v2816_v38 = vpop.permute.xlu0 %2815 }
 0x2dc   :  { %v2822_v24 = vsel %vm2819_vm14, %v2814_v3, %v2816_v38 }
 0x2dd   :  { %v2818_v48 = vpop.permute.xlu1 %2817  ;;  %2848 = vmatprep.subr.bf16.mxu0 %v2828_v20  ;;  %v2831_v52 = vand.u32 %v2822_v24, %v6751_v31 }
 0x2de   :  { %v2823_v46 = vsel %vm2819_vm14, %v2816_v38, %v2818_v48  ;;  %v6949_v38 = vld [vmem:[#allocation87_spill] sm:$0xff]  ;;  %v6950_v48 = vld [vmem:[#allocation88_spill] sm:$0xff] }
 0x2df   :  { %v2834_v60 = vand.u32 %v2823_v46, %v6751_v31  ;;  %v2503_v41 = vpop.permute.xlu0 %2502 }
 0x2e0   :  { %v2512_v30 = vsel %vm6940_vm13, %v2503_v41, %v2505_v57  ;;  %vm6961_vm13 = vcmask 900096  }
 0x2e1   :  { %v3341_v9 = vpop.permute.xlu1 %3340  ;;  %2891 = vmatprep.subr.bf16.mxu1 %v2834_v60  ;;  %v2666_v1 = vsel %vm6943_vm10, %v2660_v40, %v2512_v30 }
 0x2e2   :  { %v3342_v59 = vunpack.i.l.bf16 %v3341_v9  ;;  %2892 = vmatpush1.bf16.msra.mxu1 %v2831_v52  ;;  %v6951_v52 = vld [vmem:[#allocation89_spill] sm:$0xff] }
 0x2e3   :  { %v3346_v63 = vpop.permute.xlu0 %3345 }
 0x2e4   :  { %v6038_v45 = vsel %vm6939_vm2, %v3308_v25, %v3342_v59  ;;  %v3348_v2 = vunpack.i.h.bf16 %v3346_v63  ;;  %v3347_v12 = vunpack.i.l.bf16 %v3346_v63  ;;  %vm6960_vm2 = vmmov %vm6942_vm5 }
 0x2e5   :  { %v2810_v47 = vpop.permute.xlu1 %2809  ;;  %v2681_v34 = vsel %vm4572_vm7, %v6035_v13, %v6038_v45  ;;  %v2494_v13 = vsel %vm6961_vm13, %v3328_v7, %v3332_v4 }
 0x2e6   :  { %v2820_v14 = vsel %vm2819_vm14, %v2810_v47, %v2812_v44  ;;  %v2531_v54 = vsel %vm6944_vm9, %v3348_v2, %v3308_v25  ;;  %v2626_v44 = vsel %vm6948_vm4, %v6947_v16, %v5836_v6  ;;  %vm6952_vm14 = vcmask 1042432   ;;  %vm6966_vm4 = vmmov %vm6965_vm3 }
 0x2e7   :  { %v2825_v57 = vand.u32 %v2820_v14, %v6751_v31  ;;  %v2544_v3 = vpop.permute.xlu0 %2543  ;;  %v2680_v33 = vsel %vm4572_vm7, %v2666_v1, %v2531_v54  ;;  %v2630_v31 = vsel %vm4058_vm15, %v2623_v17, %v6949_v38  ;;  %v2631_v24 = vsel %vm4058_vm15, %v2626_v44, %v6950_v48  ;;  %vm6954_vm6 = vmmov %vm6952_vm14 }
 0x2e8   :  { %v2639_v0 = vsel %vm6952_vm14, %v2630_v31, %v6951_v52  ;;  %v2642_v15 = vsel %vm6954_vm6, %v2631_v24, %v6953_v49  ;;  %v3333_v6 = vunpack.i.h.bf16 %v5969_v11  ;;  %v3343_v25 = vunpack.i.h.bf16 %v3341_v9  ;;  %vm6958_vm15 = vmmov %vm6942_vm5 }
 0x2e9   :  { %v2546_v20 = vpop.permute.xlu1 %2545  ;;  %2849 = vmatpush1.bf16.msra.mxu0 %v2825_v57  ;;  %v2646_v60 = vsel %vm4081_vm1, %v2639_v0, %v6955_v23  ;;  %v2647_v26 = vsel %vm4081_vm1, %v2642_v15, %v6956_v62  ;;  %v3323_v11 = vunpack.i.h.bf16 %v5950_v22  ;;  %vm6962_vm5 = vmmov %vm6961_vm13  ;;  %vm6963_vm1 = vcmask 916480  }
 0x2ea   :  { %v2655_v55 = vsel %vm6958_vm15, %v2646_v60, %v6957_v36  ;;  %v2658_v50 = vsel %vm6960_vm2, %v2647_v26, %v6959_v10  ;;  %v2495_v5 = vsel %vm6962_vm5, %v3332_v4, %v3333_v6  ;;  %v2514_v9 = vsel %vm6963_vm1, %v5985_v56, %v5988_v51  ;;  %vm6964_vm10 = vmmov %vm6963_vm1  ;;  %v1044_v10 = vpop.f32.mrf.mxu0 }
 0x2eb   :  { %v2548_v39 = vpop.permute.xlu0 %2547  ;;  %v2515_v30 = vsel %vm6964_vm10, %v5988_v51, %v5990_v58  ;;  %v2533_v21 = vsel %vm6944_vm9, %v3342_v59, %v3343_v25  ;;  %v2534_v61 = vsel %vm6965_vm3, %v3343_v25, %v3347_v12  ;;  %v2662_v47 = vsel %vm4523_vm8, %v2655_v55, %v2494_v13  ;;  %vm6967_vm14 = vmmov %vm6965_vm3 }
 0x2ec   :  { %v2663_v2 = vsel %vm4523_vm8, %v2658_v50, %v2495_v5  ;;  %v2552_v56 = vsel %vm6966_vm4, %v2544_v3, %v2546_v20  ;;  %v2553_v40 = vsel %vm6967_vm14, %v2546_v20, %v2548_v39  ;;  %vm6968_vm6 = vcmask 1044480   ;;  %vm6970_vm2 = vmmov %vm6965_vm3  ;;  %v1087_v50 = vpop.f32.mrf.mxu1 }
 0x2ed   :  { %v2550_v43 = vpop.permute.xlu1 %2549  ;;  %v2674_v51 = vsel %vm6968_vm6, %v2662_v47, %v2514_v9  ;;  %vm6969_vm15 = vmmov %vm6968_vm6  ;;  %vm6973_vm1 = vcmask 1045504  }
 0x2ee   :  { %v2678_v58 = vsel %vm6969_vm15, %v2663_v2, %v2515_v30  ;;  %v2554_v59 = vsel %vm6970_vm2, %v2548_v39, %v2550_v43  ;;  %vm6971_vm13 = vmmov %vm6970_vm2  ;;  %v2682_v57 = vsel %vm4572_vm7, %v2674_v51, %v2533_v21  ;;  %v2690_v17 = vsel %vm6973_vm1, %v2681_v34, %v2552_v56 }
 0x2ef   :  { %v2542_v46 = vpop.permute.xlu0 %2541  ;;  %v2683_v37 = vsel %vm4572_vm7, %v2678_v58, %v2534_v61  ;;  %vm6972_vm8 = vmmov %vm6962_vm5 }
 0x2f0   :  { %v2551_v14 = vsel %vm6971_vm13, %v2542_v46, %v2544_v3  ;;  %vm6974_vm10 = vmmov %vm6973_vm1  ;;  %vm6983_vm13 = vcmask 1046528  }
 0x2f1   :  { %v3351_v53 = vpop.permute.xlu1 %3350  ;;  %v2694_v16 = vsel %vm6974_vm10, %v2682_v57, %v2553_v40  ;;  %vm6975_vm9 = vmmov %vm6962_vm5 }
 0x2f2   :  { %v3353_v63 = vunpack.i.h.bf16 %v3351_v53  ;;  %v3352_v18 = vunpack.i.l.bf16 %v3351_v53  ;;  %vm6976_vm3 = vmmov %vm6962_vm5 }
 0x2f3   :  { %v3356_v41 = vpop.permute.xlu0 %3355  ;;  %vm6977_vm4 = vmmov %vm6973_vm1 }
 0x2f4   :  { %v3358_v29 = vunpack.i.h.bf16 %v3356_v41  ;;  %v3357_v7 = vunpack.i.l.bf16 %v3356_v41  ;;  %v2571_v54 = vsel %vm6972_vm8, %v3338_v32, %v3352_v18  ;;  %v2572_v8 = vsel %vm6962_vm5, %v3352_v18, %v3353_v63  ;;  %vm6978_vm14 = vmmov %vm6973_vm1 }
 0x2f5   :  { %v2582_v42 = vpop.permute.xlu1 %2581  ;;  %v2698_v39 = vsel %vm6977_vm4, %v2683_v37, %v2554_v59  ;;  %v2686_v43 = vsel %vm6978_vm14, %v2680_v33, %v2551_v14  ;;  %vm6979_vm6 = vmmov %vm6976_vm3  ;;  %v2702_v31 = vsel %vm4667_vm12, %v2694_v16, %v2572_v8  ;;  %v2701_v46 = vsel %vm4667_vm12, %v2690_v17, %v2571_v54 }
 0x2f6   :  { %v2570_v44 = vsel %vm6975_vm9, %v3358_v29, %v3338_v32  ;;  %v2573_v3 = vsel %vm6976_vm3, %v3353_v63, %v3357_v7  ;;  %vm6980_vm7 = vmmov %vm6976_vm3  ;;  %v1089_v32 = vpop.f32.mrf.mxu1 }
 0x2f7   :  { %v2584_v45 = vpop.permute.xlu0 %2583  ;;  %vm6981_vm15 = vmmov %vm6976_vm3  ;;  %v2700_v52 = vsel %vm4667_vm12, %v2686_v43, %v2570_v44  ;;  %v2703_v15 = vsel %vm4667_vm12, %v2698_v39, %v2573_v3  ;;  %vm6987_vm12 = vcmask 203776  }
 0x2f8   :  { %v2590_v19 = vsel %vm6979_vm6, %v2582_v42, %v2584_v45  ;;  %vm6982_vm2 = vmmov %vm6976_vm3  ;;  %v1091_v5 = vpop.f32.mrf.mxu1 }
 0x2f9   :  { %v2586_v22 = vpop.permute.xlu1 %2585  ;;  %vm6984_vm8 = vmmov %vm6983_vm13 }
 0x2fa   :  { %v2591_v38 = vsel %vm6980_vm7, %v2584_v45, %v2586_v22  ;;  %v2710_v23 = vsel %vm6984_vm8, %v2701_v46, %v2590_v19  ;;  %vm6985_vm5 = vmmov %vm6984_vm8  ;;  %v1093_v9 = vpop.f32.mrf.mxu1 }
 0x2fb   :  { %v2588_v1 = vpop.permute.xlu0 %2587  ;;  %v2714_v53 = vsel %vm6983_vm13, %v2702_v31, %v2591_v38  ;;  %vm6986_vm1 = vmmov %vm6985_vm5 }
 0x2fc   :  { %v2592_v34 = vsel %vm6982_vm2, %v2586_v22, %v2588_v1  ;;  %vm6988_vm10 = vmmov %vm6987_vm12 }
 0x2fd   :  { %v2580_v20 = vpop.permute.xlu1 %2579  ;;  %v2718_v26 = vsel %vm6986_vm1, %v2703_v15, %v2592_v34 }
 0x2fe   :  { %v2589_v48 = vsel %vm6981_vm15, %v2580_v20, %v2582_v42 }
 0x2ff   :  { %v3361_v24 = vpop.permute.xlu0 %3360  ;;  %v2706_v60 = vsel %vm6985_vm5, %v2700_v52, %v2589_v48 }
 0x300   :  { %v3363_v33 = vunpack.i.h.bf16 %v3361_v24  ;;  %v3362_v49 = vunpack.i.l.bf16 %v3361_v24 }
 0x301   :  { %v3366_v0 = vpop.permute.xlu1 %3365 }
 0x302   :  { %v3368_v6 = vunpack.i.h.bf16 %v3366_v0  ;;  %v3367_v4 = vunpack.i.l.bf16 %v3366_v0  ;;  %v2609_v62 = vsel %vm2141_vm11, %v3323_v11, %v3362_v49  ;;  %v2610_v41 = vsel %vm2141_vm11, %v3362_v49, %v3363_v33 }
 0x303   :  { %v2721_v42 = vsel %vm4682_vm0, %v2710_v23, %v2609_v62  ;;  %v2722_v12 = vsel %vm4682_vm0, %v2714_v53, %v2610_v41 }
 0x304   :  { %v2611_v35 = vsel %vm2141_vm11, %v3363_v33, %v3367_v4  ;;  %v2608_v25 = vsel %vm2141_vm11, %v3368_v6, %v3323_v11  ;;  %2850 = vmatprep.subr.bf16.mxu0 %v2721_v42  ;;  %v1046_v11 = vpop.f32.mrf.mxu0 }
 0x305   :  { %v2723_v36 = vsel %vm4682_vm0, %v2718_v26, %v2611_v35  ;;  %v2720_v55 = vsel %vm4682_vm0, %v2706_v60, %v2608_v25 }
 0x306   :  { %2893 = vmatprep.subr.bf16.mxu1 %v2723_v36  ;;  %2851 = vmatpush1.bf16.msra.mxu0 %v2720_v55  ;;  %v1048_v13 = vpop.f32.mrf.mxu0 }
 0x307   :  { %2894 = vmatpush1.bf16.msra.mxu1 %v2722_v12 }
 0x308   :  { %v1050_v45 = vpop.f32.mrf.mxu0 }
 0x309   :  { %2997 = vmatmul.mubr.msk.bf16.vlgmr.msra.gmra.mxu0 %vm6987_vm12, %v5978_v28 }
 0x30a   :  { %2998 = vmatmul.mubr.msk.bf16.vlgmr.msra.gmra.mxu1 %vm6988_vm10, %v5978_v28 }
 0x30c   :  { %v2935_v16 = vpop.permute.xlu0 %2934 }
 0x30e   :  { %v2940_v53 = vpop.permute.xlu1 %2939 }
 0x348   :  { %v1972_v27 = vpop.f32.mrf.mxu1 }
 0x349   :  { %v1929_v30 = vpop.f32.mrf.mxu0  ;;  %v1983_v58 = vmax.f32 %v1087_v50, %v1972_v27 }
 0x34a   :  { %v1974_v18 = vpop.f32.mrf.mxu1  ;;  %v1981_v40 = vmax.f32 %v1044_v10, %v1929_v30 }
 0x34b   :  { %v1931_v63 = vpop.f32.mrf.mxu0  ;;  %v1984_v14 = vmax.f32 %v1089_v32, %v1974_v18 }
 0x34c   :  { %v1976_v21 = vpop.f32.mrf.mxu1  ;;  %v1982_v59 = vmax.f32 %v1046_v11, %v1931_v63 }
 0x34d   :  { %v1933_v22 = vpop.f32.mrf.mxu0  ;;  %v1987_v8 = vmax.f32 %v1091_v5, %v1976_v21 }
 0x34e   :  { %v1978_v29 = vpop.f32.mrf.mxu1  ;;  %v1985_v57 = vmax.f32 %v1048_v13, %v1933_v22 }
 0x34f   :  { %v1935_v61 = vpop.f32.mrf.mxu0  ;;  %v1988_v19 = vmax.f32 %v1093_v9, %v1978_v29 }
 0x350   :  { %v1986_v44 = vmax.f32 %v1050_v45, %v1935_v61 }
 0x38e   :  { %v2429_v47 = vpop.f32.mrf.mxu1 }
 0x38f   :  { %v2386_v7 = vpop.f32.mrf.mxu0  ;;  %v2440_v20 = vmax.f32 %v1983_v58, %v2429_v47 }
 0x390   :  { %v2431_v28 = vpop.f32.mrf.mxu1  ;;  %v2438_v37 = vmax.f32 %v1981_v40, %v2386_v7 }
 0x391   :  { %v2388_v2 = vpop.f32.mrf.mxu0  ;;  %v2441_v38 = vmax.f32 %v1984_v14, %v2431_v28 }
 0x392   :  { %v2433_v51 = vpop.f32.mrf.mxu1  ;;  %v2439_v3 = vmax.f32 %v1982_v59, %v2388_v2 }
 0x393   :  { %v2390_v56 = vpop.f32.mrf.mxu0  ;;  %v2444_v0 = vmax.f32 %v1987_v8, %v2433_v51 }
 0x394   :  { %v2435_v54 = vpop.f32.mrf.mxu1  ;;  %v2442_v34 = vmax.f32 %v1985_v57, %v2390_v56 }
 0x395   :  { %v2392_v1 = vpop.f32.mrf.mxu0  ;;  %v2445_v62 = vmax.f32 %v1988_v19, %v2435_v54 }
 0x396   :  { %v2443_v6 = vmax.f32 %v1986_v44, %v2392_v1 }
 0x3c9   :  { %v2870_v17 = vpop.f32.mrf.mxu0 }
 0x3ca   :  { %v2922_v39 = vmax.f32 %v2438_v37, %v2870_v17  ;;  %v2913_v43 = vpop.f32.mrf.mxu1 }
 0x3cb   :  { %v2924_v31 = vmax.f32 %v2440_v20, %v2913_v43  ;;  %v2872_v48 = vpop.f32.mrf.mxu0 }
 0x3cc   :  { %v2942_v24 = vadd.f32 %v2935_v16, %v2922_v39  ;;  %v2923_v46 = vmax.f32 %v2439_v3, %v2872_v48  ;;  %v2915_v52 = vpop.f32.mrf.mxu1 }
 0x3cd   :  { %v2944_v33 = vadd.f32 %v2935_v16, %v2924_v31  ;;  %v2925_v49 = vmax.f32 %v2441_v38, %v2915_v52  ;;  %v2874_v15 = vpop.f32.mrf.mxu0 }
 0x3ce   :  { %v2943_v4 = vadd.f32 %v2935_v16, %v2923_v46  ;;  %v2926_v23 = vmax.f32 %v2442_v34, %v2874_v15  ;;  %v2917_v60 = vpop.f32.mrf.mxu1  ;;  %v2950_v35 = vmax.f32 %v2942_v24, 0.0 }
 0x3cf   :  { %v2945_v26 = vadd.f32 %v2935_v16, %v2925_v49  ;;  %v2928_v41 = vmax.f32 %v2444_v0, %v2917_v60  ;;  %v2876_v42 = vpop.f32.mrf.mxu0  ;;  %v2952_v10 = vmax.f32 %v2944_v33, 0.0 }
 0x3d0   :  { %v2951_v25 = vmax.f32 %v2943_v4, 0.0  ;;  %v2946_v12 = vadd.f32 %v2940_v53, %v2926_v23  ;;  %v2927_v36 = vmax.f32 %v2443_v6, %v2876_v42  ;;  %v2919_v55 = vpop.f32.mrf.mxu1 }
 0x3d1   :  { %v2953_v50 = vmax.f32 %v2945_v26, 0.0  ;;  %v2948_v11 = vadd.f32 %v2940_v53, %v2928_v41  ;;  %v2929_v32 = vmax.f32 %v2445_v62, %v2919_v55 }
 0x3d2   :  { %v3003_v13 = vpack.c.bf16 %v2951_v25, %v2950_v35  ;;  %v2947_v5 = vadd.f32 %v2940_v53, %v2927_v36  ;;  %v2954_v30 = vmax.f32 %v2946_v12, 0.0 }
 0x3d3   :  { %v3004_v45 = vpack.c.bf16 %v2953_v50, %v2952_v10  ;;  %v2949_v9 = vadd.f32 %v2940_v53, %v2929_v32  ;;  %v2956_v63 = vmax.f32 %v2948_v11, 0.0 }
 0x3d4   :  { %2982 = vst [vmem:[%s6166_s3] sm:$0xff] %v3003_v13  ;;  %v2955_v27 = vmax.f32 %v2947_v5, 0.0 }
 0x3d5   :  { %2983 = vst [vmem:[%s6166_s3 + $0x8] sm:$0xff] %v3004_v45  ;;  %v2957_v18 = vmax.f32 %v2949_v9, 0.0 }
 0x3d6   :  { %v3005_v22 = vpack.c.bf16 %v2955_v27, %v2954_v30 }
 0x3d7   :  { %v3006_v21 = vpack.c.bf16 %v2957_v18, %v2956_v63 }
 0x3d8   :  { %2984 = vst [vmem:[%s6166_s3 + $0x10] sm:$0xff] %v3005_v22 }
 0x3d9   :  { %2985 = vst [vmem:[%s6166_s3 + $0x18] sm:$0xff] %v3006_v21 }

// kernel: cnn_forward.5
= control target key start
LH: loop header
LB: loop body
LE: loop exit
PB: predicated region body
PF: predicated region fallthrough
CT: control target
= control target key end

     0   :  { %vm1517_vm0 = vmmov 0   ;;  %vm858_vm1 = vcmask 261120   ;;  %s1859_s1 = inlined_call_operand.vmem [shape: bf16[1568,128], index: 1, kind: input, shape index: {}]   ;;  %s1860_s0 = inlined_call_operand.vmem [shape: bf16[8,1568], index: 0, kind: input, shape index: {}]   ;;  %s1861_s2 = inlined_call_operand.vmem [shape: f32[1,128], index: 2, kind: input, shape index: {}]   ;;  %s1862_s3 = inlined_call_operand.vmem [shape: f32[8,128], index: 3, kind: output, shape index: {}]  }
   0x1   :  { %v1405_v0 = vld [vmem:[%s1859_s1 + $0x78] sm:$0xff]   ;;  %v1409_v4 = vld [vmem:[%s1859_s1 + $0x70] sm:$0xff]   ;;  %v1413_v8 = vld [vmem:[%s1859_s1 + $0x68] sm:$0xff]  }
   0x2   :  { %v1406_v1 = vld [vmem:[%s1859_s1 + $0xf8] sm:$0xff]   ;;  %1260 = vmatprep.subr.bf16.mxu0 %v1405_v0  ;;  %v1410_v5 = vld [vmem:[%s1859_s1 + $0xf0] sm:$0xff]   ;;  %v1414_v9 = vld [vmem:[%s1859_s1 + $0xe8] sm:$0xff]  }
   0x3   :  { %v1407_v2 = vld [vmem:[%s1859_s1 + $0x38] sm:$0xff]   ;;  %1282 = vmatprep.subr.bf16.mxu1 %v1406_v1  ;;  %v1411_v6 = vld [vmem:[%s1859_s1 + $0x30] sm:$0xff]   ;;  %v1415_v10 = vld [vmem:[%s1859_s1 + $0x28] sm:$0xff]  }
   0x4   :  { %v1408_v3 = vld [vmem:[%s1859_s1 + $0xb8] sm:$0xff]   ;;  %1261 = vmatpush3.bf16.msra.mxu0 %v1407_v2  ;;  %v1412_v7 = vld [vmem:[%s1859_s1 + $0xb0] sm:$0xff]   ;;  %v1416_v11 = vld [vmem:[%s1859_s1 + $0xa8] sm:$0xff]  }
   0x5   :  { %1283 = vmatpush3.bf16.msra.mxu1 %v1408_v3  ;;  %1262 = vmatprep.subr.bf16.mxu0 %v1409_v4  ;;  %v1417_v12 = vld [vmem:[%s1859_s1 + $0x60] sm:$0xff]   ;;  %v1421_v16 = vld [vmem:[%s1859_s1 + $0x58] sm:$0xff]   ;;  %v1425_v20 = vld [vmem:[%s1859_s1 + $0x50] sm:$0xff]  }
   0x6   :  { %1284 = vmatprep.subr.bf16.mxu1 %v1410_v5  ;;  %v1418_v13 = vld [vmem:[%s1859_s1 + $0xe0] sm:$0xff]   ;;  %v1422_v17 = vld [vmem:[%s1859_s1 + $0xd8] sm:$0xff]   ;;  %v1426_v21 = vld [vmem:[%s1859_s1 + $0xd0] sm:$0xff]  }
   0x7   :  { %v1419_v14 = vld [vmem:[%s1859_s1 + $0x20] sm:$0xff]   ;;  %v1423_v18 = vld [vmem:[%s1859_s1 + $0x18] sm:$0xff]   ;;  %v1427_v22 = vld [vmem:[%s1859_s1 + $0x10] sm:$0xff]  }
   0x8   :  { %1263 = vmatpush3.bf16.msra.mxu0 %v1411_v6  ;;  %v1420_v15 = vld [vmem:[%s1859_s1 + $0xa0] sm:$0xff]   ;;  %v1424_v19 = vld [vmem:[%s1859_s1 + $0x98] sm:$0xff]   ;;  %v1428_v23 = vld [vmem:[%s1859_s1 + $0x90] sm:$0xff]  }
   0x9   :  { %1285 = vmatpush3.bf16.msra.mxu1 %v1412_v7  ;;  %1264 = vmatprep.subr.bf16.mxu0 %v1413_v8  ;;  %v1429_v24 = vld [vmem:[%s1859_s1 + $0x48] sm:$0xff]   ;;  %v1433_v28 = vld [vmem:[%s1859_s1 + $0x40] sm:$0xff]   ;;  %v1441_v38 = vld [vmem:[%s1859_s1 + $0x178] sm:$0xff]  }
   0xa   :  { %1286 = vmatprep.subr.bf16.mxu1 %v1414_v9  ;;  %v1430_v25 = vld [vmem:[%s1859_s1 + $0xc8] sm:$0xff]   ;;  %v1434_v29 = vld [vmem:[%s1859_s1 + $0xc0] sm:$0xff]   ;;  %v1442_v39 = vld [vmem:[%s1859_s1 + $0x1f8] sm:$0xff]  }
   0xb   :  { %v1431_v26 = vld [vmem:[%s1859_s1 + $0x8] sm:$0xff]   ;;  %v1435_v30 = vld [vmem:[%s1859_s1] sm:$0xff]   ;;  %v1443_v40 = vld [vmem:[%s1859_s1 + $0x138] sm:$0xff]  }
   0xc   :  { %1265 = vmatpush3.bf16.msra.mxu0 %v1415_v10  ;;  %v1432_v27 = vld [vmem:[%s1859_s1 + $0x88] sm:$0xff]   ;;  %v1436_v31 = vld [vmem:[%s1859_s1 + $0x80] sm:$0xff]   ;;  %v1444_v41 = vld [vmem:[%s1859_s1 + $0x1b8] sm:$0xff]  }
   0xd   :  { %1287 = vmatpush3.bf16.msra.mxu1 %v1416_v11  ;;  %1266 = vmatprep.subr.bf16.mxu0 %v1417_v12  ;;  %v15_v32 = vld [vmem:[%s1860_s0] sm:$0xff]  ;;  %v16_v33 = vld [vmem:[%s1860_s0 + $0x8] sm:$0xff]  ;;  %v1445_v42 = vld [vmem:[%s1859_s1 + $0x170] sm:$0xff]  }
   0xe   :  { %1288 = vmatprep.subr.bf16.mxu1 %v1418_v13  ;;  %v1148_v34 = vcombine.low %v15_v32, %v15_v32  ;;  %v1149_v35 = vcombine.high %v15_v32, %v15_v32  ;;  %v1150_v36 = vcombine.low %v16_v33, %v16_v33  ;;  %v1151_v37 = vcombine.high %v16_v33, %v16_v33  ;;  %v1446_v43 = vld [vmem:[%s1859_s1 + $0x1f0] sm:$0xff]   ;;  %v1449_v46 = vld [vmem:[%s1859_s1 + $0x168] sm:$0xff]   ;;  %v1453_v50 = vld [vmem:[%s1859_s1 + $0x160] sm:$0xff]  }
   0xf   :  { %v1447_v44 = vld [vmem:[%s1859_s1 + $0x130] sm:$0xff]   ;;  %v1450_v47 = vld [vmem:[%s1859_s1 + $0x1e8] sm:$0xff]   ;;  %v1454_v51 = vld [vmem:[%s1859_s1 + $0x1e0] sm:$0xff]  }
  0x10   :  { %1267 = vmatpush3.bf16.msra.mxu0 %v1419_v14  ;;  %894 = vmatprep.mubr.bf16.mxu0 %v1149_v35  ;;  %v1448_v45 = vld [vmem:[%s1859_s1 + $0x1b0] sm:$0xff]   ;;  %v1451_v48 = vld [vmem:[%s1859_s1 + $0x128] sm:$0xff]   ;;  %v1455_v52 = vld [vmem:[%s1859_s1 + $0x120] sm:$0xff]  }
  0x11   :  { %1289 = vmatpush3.bf16.msra.mxu1 %v1420_v15  ;;  %1268 = vmatprep.subr.bf16.mxu0 %v1421_v16  ;;  %v1452_v49 = vld [vmem:[%s1859_s1 + $0x1a8] sm:$0xff]   ;;  %v1456_v53 = vld [vmem:[%s1859_s1 + $0x1a0] sm:$0xff]   ;;  %v1457_v54 = vld [vmem:[%s1859_s1 + $0x158] sm:$0xff]  }
  0x12   :  { %1290 = vmatprep.subr.bf16.mxu1 %v1422_v17  ;;  %934 = vmatprep.mubr.bf16.mxu1 %v1151_v37  ;;  %v1458_v55 = vld [vmem:[%s1859_s1 + $0x1d8] sm:$0xff]   ;;  %v1461_v58 = vld [vmem:[%s1859_s1 + $0x150] sm:$0xff]   ;;  %v1465_v62 = vld [vmem:[%s1859_s1 + $0x148] sm:$0xff]  }
  0x13   :  { %v1459_v56 = vld [vmem:[%s1859_s1 + $0x118] sm:$0xff]   ;;  %v1462_v59 = vld [vmem:[%s1859_s1 + $0x1d0] sm:$0xff]   ;;  %v1466_v63 = vld [vmem:[%s1859_s1 + $0x1c8] sm:$0xff]  }
  0x14   :  { %1269 = vmatpush3.bf16.msra.mxu0 %v1423_v18  ;;  %v1460_v57 = vld [vmem:[%s1859_s1 + $0x198] sm:$0xff]   ;;  %v1463_v60 = vld [vmem:[%s1859_s1 + $0x110] sm:$0xff]   ;;  %v1467_v0 = vld [vmem:[%s1859_s1 + $0x108] sm:$0xff]  }
  0x15   :  { %1291 = vmatpush3.bf16.msra.mxu1 %v1424_v19  ;;  %1270 = vmatprep.subr.bf16.mxu0 %v1425_v20  ;;  %v1464_v61 = vld [vmem:[%s1859_s1 + $0x190] sm:$0xff]   ;;  %v1468_v1 = vld [vmem:[%s1859_s1 + $0x188] sm:$0xff]   ;;  %v1469_v2 = vld [vmem:[%s1859_s1 + $0x140] sm:$0xff]  }
  0x16   :  { %1292 = vmatprep.subr.bf16.mxu1 %v1426_v21  ;;  %v1470_v3 = vld [vmem:[%s1859_s1 + $0x1c0] sm:$0xff]   ;;  %v17_v6 = vld [vmem:[%s1860_s0 + $0x10] sm:$0xff]  ;;  %v18_v9 = vld [vmem:[%s1860_s0 + $0x18] sm:$0xff] }
  0x17   :  { %v1471_v4 = vld [vmem:[%s1859_s1 + $0x100] sm:$0xff]   ;;  %v1152_v7 = vcombine.low %v17_v6, %v17_v6  ;;  %v1153_v8 = vcombine.high %v17_v6, %v17_v6  ;;  %v1154_v10 = vcombine.low %v18_v9, %v18_v9  ;;  %v1155_v11 = vcombine.high %v18_v9, %v18_v9  ;;  %v1477_v12 = vld [vmem:[%s1859_s1 + $0x278] sm:$0xff]   ;;  %v1481_v16 = vld [vmem:[%s1859_s1 + $0x270] sm:$0xff]  }
  0x18   :  { %1271 = vmatpush3.bf16.msra.mxu0 %v1427_v22  ;;  %v1472_v5 = vld [vmem:[%s1859_s1 + $0x180] sm:$0xff]   ;;  %v1478_v13 = vld [vmem:[%s1859_s1 + $0x2f8] sm:$0xff]   ;;  %v1482_v17 = vld [vmem:[%s1859_s1 + $0x2f0] sm:$0xff]  }
  0x19   :  { %1293 = vmatpush3.bf16.msra.mxu1 %v1428_v23  ;;  %1272 = vmatprep.subr.bf16.mxu0 %v1429_v24  ;;  %v1479_v14 = vld [vmem:[%s1859_s1 + $0x238] sm:$0xff]   ;;  %v1483_v18 = vld [vmem:[%s1859_s1 + $0x230] sm:$0xff]   ;;  %v1485_v20 = vld [vmem:[%s1859_s1 + $0x268] sm:$0xff]  }
  0x1a   :  { %1294 = vmatprep.subr.bf16.mxu1 %v1430_v25  ;;  %v1480_v15 = vld [vmem:[%s1859_s1 + $0x2b8] sm:$0xff]   ;;  %v1484_v19 = vld [vmem:[%s1859_s1 + $0x2b0] sm:$0xff]   ;;  %v1486_v21 = vld [vmem:[%s1859_s1 + $0x2e8] sm:$0xff]  }
  0x1b   :  { %v1487_v22 = vld [vmem:[%s1859_s1 + $0x228] sm:$0xff]   ;;  %v1489_v24 = vld [vmem:[%s1859_s1 + $0x260] sm:$0xff]   ;;  %v1497_v32 = vld [vmem:[%s1859_s1 + $0x250] sm:$0xff]  }
  0x1c   :  { %1273 = vmatpush3.bf16.msra.mxu0 %v1431_v26  ;;  %v1488_v23 = vld [vmem:[%s1859_s1 + $0x2a8] sm:$0xff]   ;;  %v1490_v25 = vld [vmem:[%s1859_s1 + $0x2e0] sm:$0xff]   ;;  %v1498_v33 = vld [vmem:[%s1859_s1 + $0x2d0] sm:$0xff]  }
  0x1d   :  { %1295 = vmatpush3.bf16.msra.mxu1 %v1432_v27  ;;  %1274 = vmatprep.subr.bf16.mxu0 %v1433_v28  ;;  %v1491_v26 = vld [vmem:[%s1859_s1 + $0x220] sm:$0xff]   ;;  %v1493_v28 = vld [vmem:[%s1859_s1 + $0x258] sm:$0xff]   ;;  %v1500_v35 = vld [vmem:[%s1859_s1 + $0x290] sm:$0xff]  }
  0x1e   :  { %1296 = vmatprep.subr.bf16.mxu1 %v1434_v29  ;;  %v1492_v27 = vld [vmem:[%s1859_s1 + $0x2a0] sm:$0xff]   ;;  %v1494_v29 = vld [vmem:[%s1859_s1 + $0x2d8] sm:$0xff]   ;;  %v1502_v37 = vld [vmem:[%s1859_s1 + $0x2c8] sm:$0xff]  }
  0x20   :  { %1275 = vmatpush3.bf16.msra.mxu0 %v1435_v30  ;;  %v1495_v30 = vld [vmem:[%s1859_s1 + $0x218] sm:$0xff]  }
  0x21   :  { %1297 = vmatpush3.bf16.msra.mxu1 %v1436_v31  ;;  %1304 = vmatprep.subr.bf16.mxu0 %v1441_v38  ;;  %v1496_v31 = vld [vmem:[%s1859_s1 + $0x298] sm:$0xff]   ;;  %v1503_v38 = vld [vmem:[%s1859_s1 + $0x208] sm:$0xff]  }
  0x22   :  { %1326 = vmatprep.subr.bf16.mxu1 %v1442_v39  ;;  %v1504_v39 = vld [vmem:[%s1859_s1 + $0x288] sm:$0xff]  }
  0x23   :  { %895 = vmatmul.mubr.bf16.vlgmr.msra.gmra.mxu0 %v1148_v34  ;;  %v1499_v34 = vld [vmem:[%s1859_s1 + $0x210] sm:$0xff]  }
  0x24   :  { %935 = vmatmul.mubr.bf16.vlgmr.msra.gmra.mxu1 %v1150_v36  ;;  %1305 = vmatpush3.bf16.msra.mxu0 %v1443_v40  ;;  %v1501_v36 = vld [vmem:[%s1859_s1 + $0x248] sm:$0xff]   ;;  %v1505_v40 = vld [vmem:[%s1859_s1 + $0x240] sm:$0xff]  }
  0x25   :  { %1327 = vmatpush3.bf16.msra.mxu1 %v1444_v41  ;;  %1306 = vmatprep.subr.bf16.mxu0 %v1445_v42  ;;  %v1506_v41 = vld [vmem:[%s1859_s1 + $0x2c0] sm:$0xff]  }
  0x26   :  { %1328 = vmatprep.subr.bf16.mxu1 %v1446_v43  ;;  %974 = vmatprep.mubr.bf16.mxu0 %v1153_v8  ;;  %v1507_v42 = vld [vmem:[%s1859_s1 + $0x200] sm:$0xff]  }
  0x27   :  { %1014 = vmatprep.mubr.bf16.mxu1 %v1155_v11  ;;  %v1508_v43 = vld [vmem:[%s1859_s1 + $0x280] sm:$0xff]  }
  0x28   :  { %1307 = vmatpush3.bf16.msra.mxu0 %v1447_v44  ;;  %v19_v44 = vld [vmem:[%s1860_s0 + $0x20] sm:$0xff] }
  0x29   :  { %1329 = vmatpush3.bf16.msra.mxu1 %v1448_v45  ;;  %1308 = vmatprep.subr.bf16.mxu0 %v1449_v46  ;;  %v20_v45 = vld [vmem:[%s1860_s0 + $0x28] sm:$0xff]  ;;  %v1156_v46 = vcombine.low %v19_v44, %v19_v44 }
  0x2a   :  { %1330 = vmatprep.subr.bf16.mxu1 %v1450_v47  ;;  %v1157_v47 = vcombine.high %v19_v44, %v19_v44 }
  0x2c   :  { %1309 = vmatpush3.bf16.msra.mxu0 %v1451_v48  ;;  %v1158_v48 = vcombine.low %v20_v45, %v20_v45 }
  0x2d   :  { %1331 = vmatpush3.bf16.msra.mxu1 %v1452_v49  ;;  %1310 = vmatprep.subr.bf16.mxu0 %v1453_v50  ;;  %v1159_v49 = vcombine.high %v20_v45, %v20_v45  ;;  %v1513_v50 = vld [vmem:[%s1859_s1 + $0x308] sm:$0xff]  }
  0x2e   :  { %1332 = vmatprep.subr.bf16.mxu1 %v1454_v51  ;;  %v1516_v51 = vmov 0.0  }
  0x30   :  { %1311 = vmatpush3.bf16.msra.mxu0 %v1455_v52  ;;  %v1514_v52 = vld [vmem:[%s1859_s1 + $0x300] sm:$0xff]  }
  0x31   :  { %1333 = vmatpush3.bf16.msra.mxu1 %v1456_v53  ;;  %1312 = vmatprep.subr.bf16.mxu0 %v1457_v54  ;;  %v1515_v53 = vld [vmem:[%s1860_s0 + $0x30] ss:$0 sps:$4 sm:$0xff]  }
  0x32   :  { %1334 = vmatprep.subr.bf16.mxu1 %v1458_v55 }
  0x34   :  { %1313 = vmatpush3.bf16.msra.mxu0 %v1459_v56 }
  0x35   :  { %1335 = vmatpush3.bf16.msra.mxu1 %v1460_v57  ;;  %1314 = vmatprep.subr.bf16.mxu0 %v1461_v58 }
  0x36   :  { %1336 = vmatprep.subr.bf16.mxu1 %v1462_v59 }
  0x38   :  { %1315 = vmatpush3.bf16.msra.mxu0 %v1463_v60 }
  0x39   :  { %1337 = vmatpush3.bf16.msra.mxu1 %v1464_v61  ;;  %1316 = vmatprep.subr.bf16.mxu0 %v1465_v62 }
  0x3a   :  { %1338 = vmatprep.subr.bf16.mxu1 %v1466_v63 }
  0x3c   :  { %1317 = vmatpush3.bf16.msra.mxu0 %v1467_v0 }
  0x3d   :  { %1339 = vmatpush3.bf16.msra.mxu1 %v1468_v1  ;;  %1318 = vmatprep.subr.bf16.mxu0 %v1469_v2 }
  0x3e   :  { %1340 = vmatprep.subr.bf16.mxu1 %v1470_v3 }
  0x40   :  { %1319 = vmatpush3.bf16.msra.mxu0 %v1471_v4 }
  0x41   :  { %1341 = vmatpush3.bf16.msra.mxu1 %v1472_v5  ;;  %1348 = vmatprep.subr.bf16.mxu0 %v1477_v12 }
  0x42   :  { %1370 = vmatprep.subr.bf16.mxu1 %v1478_v13 }
  0x43   :  { %975 = vmatmul.mubr.bf16.vlgmr.msra.gmra.mxu0 %v1152_v7  ;;  %v1147_v7 = vld [vmem:[%s1861_s2] ss:$0 sm:$0xff] }
  0x44   :  { %1015 = vmatmul.mubr.bf16.vlgmr.msra.gmra.mxu1 %v1154_v10  ;;  %1349 = vmatpush3.bf16.msra.mxu0 %v1479_v14 }
  0x45   :  { %1371 = vmatpush3.bf16.msra.mxu1 %v1480_v15  ;;  %1350 = vmatprep.subr.bf16.mxu0 %v1481_v16 }
  0x46   :  { %1372 = vmatprep.subr.bf16.mxu1 %v1482_v17  ;;  %1054 = vmatprep.mubr.bf16.mxu0 %v1157_v47 }
  0x47   :  { %1094 = vmatprep.mubr.bf16.mxu1 %v1159_v49 }
  0x48   :  { %1351 = vmatpush3.bf16.msra.mxu0 %v1483_v18 }
  0x49   :  { %1373 = vmatpush3.bf16.msra.mxu1 %v1484_v19  ;;  %1352 = vmatprep.subr.bf16.mxu0 %v1485_v20 }
  0x4a   :  { %1374 = vmatprep.subr.bf16.mxu1 %v1486_v21 }
  0x4c   :  { %1353 = vmatpush3.bf16.msra.mxu0 %v1487_v22 }
  0x4d   :  { %1375 = vmatpush3.bf16.msra.mxu1 %v1488_v23  ;;  %1354 = vmatprep.subr.bf16.mxu0 %v1489_v24 }
  0x4e   :  { %1376 = vmatprep.subr.bf16.mxu1 %v1490_v25 }
  0x50   :  { %1355 = vmatpush3.bf16.msra.mxu0 %v1491_v26 }
  0x51   :  { %1377 = vmatpush3.bf16.msra.mxu1 %v1492_v27  ;;  %1356 = vmatprep.subr.bf16.mxu0 %v1493_v28 }
  0x52   :  { %1378 = vmatprep.subr.bf16.mxu1 %v1494_v29 }
  0x54   :  { %1357 = vmatpush3.bf16.msra.mxu0 %v1495_v30 }
  0x55   :  { %1379 = vmatpush3.bf16.msra.mxu1 %v1496_v31  ;;  %1358 = vmatprep.subr.bf16.mxu0 %v1497_v32 }
  0x56   :  { %1380 = vmatprep.subr.bf16.mxu1 %v1498_v33 }
  0x58   :  { %1359 = vmatpush3.bf16.msra.mxu0 %v1499_v34 }
  0x59   :  { %1381 = vmatpush3.bf16.msra.mxu1 %v1500_v35  ;;  %1360 = vmatprep.subr.bf16.mxu0 %v1501_v36 }
  0x5a   :  { %1382 = vmatprep.subr.bf16.mxu1 %v1502_v37 }
  0x5c   :  { %1361 = vmatpush3.bf16.msra.mxu0 %v1503_v38 }
  0x5d   :  { %1383 = vmatpush3.bf16.msra.mxu1 %v1504_v39  ;;  %1362 = vmatprep.subr.bf16.mxu0 %v1505_v40 }
  0x5e   :  { %1384 = vmatprep.subr.bf16.mxu1 %v1506_v41 }
  0x60   :  { %1363 = vmatpush3.bf16.msra.mxu0 %v1507_v42 }
  0x61   :  { %1385 = vmatpush3.bf16.msra.mxu1 %v1508_v43  ;;  %1395 = vmatprep.subr.bf16.mxu0 %v1516_v51 }
  0x63   :  { %1055 = vmatmul.mubr.bf16.vlgmr.msra.gmra.mxu0 %v1156_v46 }
  0x64   :  { %1095 = vmatmul.mubr.bf16.vlgmr.msra.gmra.mxu1 %v1158_v48  ;;  %1396 = vmatpush3.bf16.msra.mxu0 %v1513_v50 }
  0x65   :  { %1397 = vmatprep.subr.bf16.mxu0 %v1516_v51  ;;  %1399 = vmatprep.mubr.msk.bf16.mxu0 %vm1517_vm0, %v1516_v51 }
  0x68   :  { %1398 = vmatpush3.bf16.msra.mxu0 %v1514_v52 }
  0x6b   :  { %1400 = vmatmul.mubr.msk.bf16.vlgmr.msra.gmra.mxu0 %vm858_vm1, %v1515_v53 }
  0xe3   :  { %v1276_v54 = vpop.f32.mrf.mxu0 }
  0xe4   :  { %v1298_v55 = vpop.f32.mrf.mxu1 }
  0xe5   :  { %v1277_v56 = vpop.f32.mrf.mxu0 }
  0xe6   :  { %v1299_v57 = vpop.f32.mrf.mxu1  ;;  %v1278_v6 = vadd.f32 %v1277_v56, %v1276_v54 }
  0xe7   :  { %v1279_v58 = vpop.f32.mrf.mxu0  ;;  %v1300_v9 = vadd.f32 %v1299_v57, %v1298_v55 }
  0xe8   :  { %v1301_v59 = vpop.f32.mrf.mxu1  ;;  %v897_v8 = vadd.f32 %v1278_v6, %v1147_v7 }
  0xe9   :  { %v1280_v60 = vpop.f32.mrf.mxu0 }
  0xea   :  { %v1302_v61 = vpop.f32.mrf.mxu1  ;;  %v937_v11 = vadd.f32 %v1300_v9, %v897_v8 }
 0x103   :  { %v1320_v62 = vpop.f32.mrf.mxu0 }
 0x104   :  { %v1342_v63 = vpop.f32.mrf.mxu1 }
 0x105   :  { %v1321_v0 = vpop.f32.mrf.mxu0 }
 0x106   :  { %v1343_v1 = vpop.f32.mrf.mxu1  ;;  %v1322_v10 = vadd.f32 %v1321_v0, %v1320_v62 }
 0x107   :  { %v1323_v2 = vpop.f32.mrf.mxu0  ;;  %v1344_v13 = vadd.f32 %v1343_v1, %v1342_v63 }
 0x108   :  { %v1345_v3 = vpop.f32.mrf.mxu1  ;;  %v977_v12 = vadd.f32 %v1322_v10, %v937_v11 }
 0x109   :  { %v1324_v4 = vpop.f32.mrf.mxu0 }
 0x10a   :  { %v1346_v5 = vpop.f32.mrf.mxu1  ;;  %v1017_v17 = vadd.f32 %v1344_v13, %v977_v12 }
 0x123   :  { %v1364_v14 = vpop.f32.mrf.mxu0 }
 0x124   :  { %v1386_v15 = vpop.f32.mrf.mxu1 }
 0x125   :  { %v1365_v16 = vpop.f32.mrf.mxu0 }
 0x126   :  { %v1366_v18 = vadd.f32 %v1365_v16, %v1364_v14  ;;  %v1387_v19 = vpop.f32.mrf.mxu1 }
 0x127   :  { %v1388_v20 = vadd.f32 %v1387_v19, %v1386_v15  ;;  %v1367_v21 = vpop.f32.mrf.mxu0 }
 0x128   :  { %v1057_v22 = vadd.f32 %v1366_v18, %v1017_v17  ;;  %v1389_v23 = vpop.f32.mrf.mxu1 }
 0x129   :  { %v1368_v24 = vpop.f32.mrf.mxu0 }
 0x12a   :  { %v1390_v25 = vpop.f32.mrf.mxu1  ;;  %v1097_v26 = vadd.f32 %v1388_v20, %v1057_v22 }
 0x12b   :  { %v1136_v27 = vpop.f32.mrf.mxu0 }
 0x12c   :  { %v1137_v28 = vadd.f32 %v1136_v27, %v1097_v26 }
 0x12d   :  { %v1401_v29 = vpop.f32.mrf.mxu0 }
 0x12e   :  { %1142 = vst [vmem:[%s1862_s3] sm:$0xff] %v1137_v28 }
 0x12f   :  { %v1139_v30 = vpop.f32.mrf.mxu0 }
 0x131   :  { %v1402_v31 = vpop.f32.mrf.mxu0 }

</bundles_post_ra>
